<compile_context>
chip_gen: v7x
topology: tpu7x:2x2x1
jax: 0.10.0
libtpu: 0.0.40
codegen_flags: <defaults>
</compile_context>

<pallas_src>
from functools import partial

import jax
import jax.numpy as jnp
from jax.experimental import pallas as pl
from jax.experimental.pallas import tpu as pltpu

LANE = 128  # every matmul output dim (Cout / FC features) is padded to this


# ----------------------------- Pallas kernels ------------------------------

def _conv_relu_pool_kernel(x_ref, w_ref, b_ref, o_ref):
    """Fused im2col-matmul + bias + ReLU + 2x2 max-pool.

    x_ref: (4, TM, K)   axis 0 = the four pooling candidates per output row
    w_ref: (K, LANE)    conv weight, Cout zero-padded to LANE
    b_ref: (1, LANE)
    o_ref: (TM, LANE)   pooled activations (lane-dense store)
    """
    w = w_ref[...]
    b = b_ref[...]

    def cand(q):
        acc = jnp.dot(x_ref[q], w, preferred_element_type=jnp.float32)
        return jnp.maximum(acc + b, 0.0)

    o_ref[...] = jnp.maximum(jnp.maximum(cand(0), cand(1)),
                             jnp.maximum(cand(2), cand(3)))


def _fc_chain_kernel(x_ref, w1_ref, b1_ref, w2_ref, b2_ref, w3_ref, b3_ref,
                     o_ref):
    """Fused fc1+ReLU -> fc2+ReLU -> fc3; intermediates stay on-chip."""
    h = jnp.dot(x_ref[...], w1_ref[...], preferred_element_type=jnp.float32)
    h = jnp.maximum(h + b1_ref[...], 0.0)
    h = jnp.dot(h, w2_ref[...], preferred_element_type=jnp.float32)
    h = jnp.maximum(h + b2_ref[...], 0.0)
    h = jnp.dot(h, w3_ref[...], preferred_element_type=jnp.float32)
    o_ref[...] = (h + b3_ref[...]).astype(o_ref.dtype)


# ------------------------------ Pallas wrappers -----------------------------

def _choose_tile(m, max_tile=512):
    """M-tile: full block for tiny M, 512-row (8-aligned) tiles otherwise."""
    return m if m <= max_tile else max_tile


def conv_relu_pool(x_nhwc, w_pad, b_pad, cin, kh=5, kw=5):
    """x_nhwc: (N, H, W, C>=cin) f32.  Returns ((N*Hp*Wp, LANE), Hp, Wp)."""
    n, h, w, _ = x_nhwc.shape
    ho, wo = h - kh + 1, w - kw + 1
    hp, wp = ho // 2, wo // 2

    # im2col glue (plain JAX, layout only): build patches (4, Mp, K) where
    # axis 0 enumerates the 2x2 pooling window and K is ordered (kh, kw, cin)
    # to match the flattened PyTorch conv weight.
    cols = []
    for i in range(kh):
        for j in range(kw):
            cols.append(x_nhwc[:, i:i + ho, j:j + wo, :cin])
    p = jnp.stack(cols, axis=3)                       # (N, Ho, Wo, kh*kw, cin)
    p = p.reshape(n, hp, 2, wp, 2, kh * kw, cin)
    p = p.transpose(2, 4, 0, 1, 3, 5, 6)              # (2, 2, N, Hp, Wp, kh*kw, cin)
    k = kh * kw * cin
    mp = n * hp * wp
    patches = p.reshape(4, mp, k)

    tm = _choose_tile(mp)
    grid = (pl.cdiv(mp, tm),)
    out = pl.pallas_call(
        _conv_relu_pool_kernel,
        out_shape=jax.ShapeDtypeStruct((mp, LANE), jnp.float32),
        grid=grid,
        in_specs=[
            pl.BlockSpec((4, tm, k), lambda i: (0, i, 0)),
            pl.BlockSpec((k, LANE), lambda i: (0, 0)),
            pl.BlockSpec((1, LANE), lambda i: (0, 0)),
        ],
        out_specs=pl.BlockSpec((tm, LANE), lambda i: (i, 0)),
        compiler_params=pltpu.CompilerParams(
            dimension_semantics=("parallel",)),
        cost_estimate=pl.CostEstimate(
            flops=2 * 4 * mp * k * LANE,
            transcendentals=0,
            bytes_accessed=4 * (4 * mp * k + k * LANE + LANE + mp * LANE)),
    )(patches, w_pad, b_pad)
    return out, hp, wp


def fc_chain(x, w1, b1, w2, b2, w3, b3):
    """x: (M, K) f32; weights pre-padded to LANE-wide outputs. -> (M, LANE)."""
    m, k = x.shape
    tm = _choose_tile(m)
    grid = (pl.cdiv(m, tm),)
    flops = 2 * m * (k * LANE + LANE * LANE + LANE * LANE)
    nbytes = 4 * (m * k + k * LANE + 2 * LANE * LANE + 3 * LANE + m * LANE)
    return pl.pallas_call(
        _fc_chain_kernel,
        out_shape=jax.ShapeDtypeStruct((m, LANE), jnp.float32),
        grid=grid,
        in_specs=[
            pl.BlockSpec((tm, k), lambda i: (i, 0)),
            pl.BlockSpec((k, LANE), lambda i: (0, 0)),
            pl.BlockSpec((1, LANE), lambda i: (0, 0)),
            pl.BlockSpec((LANE, LANE), lambda i: (0, 0)),
            pl.BlockSpec((1, LANE), lambda i: (0, 0)),
            pl.BlockSpec((LANE, LANE), lambda i: (0, 0)),
            pl.BlockSpec((1, LANE), lambda i: (0, 0)),
        ],
        out_specs=pl.BlockSpec((tm, LANE), lambda i: (i, 0)),
        compiler_params=pltpu.CompilerParams(
            dimension_semantics=("parallel",)),
        cost_estimate=pl.CostEstimate(flops=flops, transcendentals=0,
                                      bytes_accessed=nbytes),
    )(x, w1, b1, w2, b2, w3, b3)


# --------------------------------- Params -----------------------------------

def init_lenet5_params(key):
    """Deterministic synthetic parameters matching the PyTorch module shapes."""
    ks = jax.random.split(key, 10)

    def u(k, shape, fan_in):
        bound = 1.0 / jnp.sqrt(fan_in)
        return jax.random.uniform(k, shape, jnp.float32, -bound, bound)

    return {
        "conv1_w": u(ks[0], (6, 1, 5, 5), 1 * 5 * 5),
        "conv1_b": u(ks[1], (6,), 1 * 5 * 5),
        "conv2_w": u(ks[2], (16, 6, 5, 5), 6 * 5 * 5),
        "conv2_b": u(ks[3], (16,), 6 * 5 * 5),
        "fc1_w": u(ks[4], (120, 256), 256),
        "fc1_b": u(ks[5], (120,), 256),
        "fc2_w": u(ks[6], (84, 120), 120),
        "fc2_b": u(ks[7], (84,), 120),
        "fc3_w": u(ks[8], (10, 84), 84),
        "fc3_b": u(ks[9], (10,), 84),
    }


def prepare_params(params):
    """One-time (hoisted) packing of PyTorch-layout params into kernel layout."""

    def conv_pack(w, b):
        cout, cin, kh, kw = w.shape
        wf = jnp.transpose(w, (2, 3, 1, 0)).reshape(kh * kw * cin, cout)
        wp = jnp.zeros((kh * kw * cin, LANE), jnp.float32).at[:, :cout].set(wf)
        bp = jnp.zeros((1, LANE), jnp.float32).at[0, :cout].set(b)
        return wp, bp

    def fc_pack(w, b, in_pad):
        out_f, in_f = w.shape
        wp = jnp.zeros((in_pad, LANE), jnp.float32).at[:in_f, :out_f].set(w.T)
        bp = jnp.zeros((1, LANE), jnp.float32).at[0, :out_f].set(b)
        return wp, bp

    c1_w, c1_b = conv_pack(params["conv1_w"], params["conv1_b"])
    c2_w, c2_b = conv_pack(params["conv2_w"], params["conv2_b"])

    # fc1 consumes the flattened (Hp, Wp, Cpad=128) conv2+pool output, so
    # permute its columns from PyTorch (c, h, w) order to (h, w, c) and
    # zero-pad the channel axis 16 -> LANE.
    w1 = params["fc1_w"].reshape(120, 16, 4, 4)          # (out, c, h, w)
    w1 = jnp.transpose(w1, (0, 2, 3, 1))                 # (out, h, w, c)
    w1 = jnp.zeros((120, 4, 4, LANE), jnp.float32).at[..., :16].set(w1)
    w1 = w1.reshape(120, 4 * 4 * LANE).T                 # (2048, 120)
    f1_w = jnp.zeros((4 * 4 * LANE, LANE), jnp.float32).at[:, :120].set(w1)
    f1_b = jnp.zeros((1, LANE), jnp.float32).at[0, :120].set(params["fc1_b"])

    f2_w, f2_b = fc_pack(params["fc2_w"], params["fc2_b"], LANE)
    f3_w, f3_b = fc_pack(params["fc3_w"], params["fc3_b"], LANE)

    return dict(c1_w=c1_w, c1_b=c1_b, c2_w=c2_w, c2_b=c2_b,
                f1_w=f1_w, f1_b=f1_b, f2_w=f2_w, f2_b=f2_b,
                f3_w=f3_w, f3_b=f3_b)


# --------------------------------- LeNet-5 ----------------------------------

@jax.jit
def lenet5_forward(prep, img):
    """img: (N, 1, 28, 28) f32 (PyTorch NCHW) -> logits (N, 10) f32."""
    n = img.shape[0]
    x = jnp.transpose(img, (0, 2, 3, 1))                  # NHWC (C=1: free)
    y, hp, wp = conv_relu_pool(x, prep["c1_w"], prep["c1_b"], cin=1)
    x = y.reshape(n, hp, wp, LANE)                        # (N, 12, 12, 128)
    y, hp, wp = conv_relu_pool(x, prep["c2_w"], prep["c2_b"], cin=6)
    x = y.reshape(n, hp * wp * LANE)                      # (N, 2048), (h,w,c)
    out = fc_chain(x, prep["f1_w"], prep["f1_b"],
                   prep["f2_w"], prep["f2_b"],
                   prep["f3_w"], prep["f3_b"])            # (N, 128)
    return out[:, :10]


# ------------------------------- Reference check ----------------------------

def lenet5_reference(params, img):
    """Pure-JAX reference of the same forward (for correctness check)."""
    def conv(x, w, b):
        y = jax.lax.conv_general_dilated(
            x, w, window_strides=(1, 1), padding="VALID",
            dimension_numbers=("NCHW", "OIHW", "NCHW"))
        return jax.nn.relu(y + b[None, :, None, None])

    def pool(x):
        n, c, h, w = x.shape
        return x.reshape(n, c, h // 2, 2, w // 2, 2).max(axis=(3, 5))

    x = pool(conv(img, params["conv1_w"], params["conv1_b"]))
    x = pool(conv(x, params["conv2_w"], params["conv2_b"]))
    x = x.reshape(x.shape[0], -1)
    x = jax.nn.relu(x @ params["fc1_w"].T + params["fc1_b"])
    x = jax.nn.relu(x @ params["fc2_w"].T + params["fc2_b"])
    return x @ params["fc3_w"].T + params["fc3_b"]


if __name__ == "__main__":
    key = jax.random.PRNGKey(0)
    pkey, xkey = jax.random.split(key)
    params = init_lenet5_params(pkey)
    prep = prepare_params(params)

    # Spatial must be 28x28 so that fc1 input is 16*4*4 = 256.
    img = jax.random.normal(xkey, (2, 1, 28, 28), jnp.float32)

    logits = jax.block_until_ready(lenet5_forward(prep, img))
    assert logits.shape == (2, 10), logits.shape

    ref = jax.block_until_ready(lenet5_reference(params, img))
    assert jnp.allclose(logits, ref, atol=1e-4, rtol=1e-4), \
        float(jnp.max(jnp.abs(logits - ref)))

    print("KERNEL_OK")
</pallas_src>

<mosaic_0001>
module attributes {stable_mosaic.version = 11 : i64} {
  func.func @_conv_relu_pool_kernel(%arg0: i32, %arg1: memref<4x288x25xf32, #tpu.memory_space<vmem>>, %arg2: memref<25x128xf32, #tpu.memory_space<vmem>>, %arg3: memref<1x128xf32, #tpu.memory_space<vmem>>, %arg4: memref<288x128xf32, #tpu.memory_space<vmem>>) attributes {dimension_semantics = [#tpu.dimension_semantics<parallel>], iteration_bounds = array<i64: 1>, scalar_prefetch = 0 : i64, scratch_operands = 0 : i64, tpu.core_type = #tpu.core_type<tc>, window_params = [{transform_indices = @transform_0, window_bounds = array<i64: 4, 288, 25>}, {pipeline_mode = #tpu.pipeline_mode<synchronous>, transform_indices = @transform_1, window_bounds = array<i64: 25, 128>}, {pipeline_mode = #tpu.pipeline_mode<synchronous>, transform_indices = @transform_2, window_bounds = array<i64: 1, 128>}, {transform_indices = @transform_3, window_bounds = array<i64: 288, 128>}]} {
    %c0 = arith.constant 0 : index
    %c0_0 = arith.constant 0 : index
    %0 = vector.load %arg2[%c0, %c0_0] : memref<25x128xf32, #tpu.memory_space<vmem>>, vector<25x128xf32>
    %c0_1 = arith.constant 0 : index
    %c0_2 = arith.constant 0 : index
    %1 = vector.load %arg3[%c0_1, %c0_2] : memref<1x128xf32, #tpu.memory_space<vmem>>, vector<1x128xf32>
    %c0_3 = arith.constant 0 : index
    %c0_4 = arith.constant 0 : index
    %c0_5 = arith.constant 0 : index
    %2 = vector.load %arg1[%c0_3, %c0_4, %c0_5] : memref<4x288x25xf32, #tpu.memory_space<vmem>>, vector<1x288x25xf32>
    %3 = vector.shape_cast %2 : vector<1x288x25xf32> to vector<288x25xf32>
    %cst = arith.constant dense<0.000000e+00> : vector<288x128xf32>
    %4 = tpu.matmul %3, %0, %cst {dimension_numbers = #tpu.dot_dimension_numbers<[1], [0], [0], [1], [0, 0, 1, 1], [], []>} : vector<288x25xf32>, vector<25x128xf32>, vector<288x128xf32> -> vector<288x128xf32>
    %5 = vector.broadcast %1 : vector<1x128xf32> to vector<288x128xf32>
    %6 = arith.addf %4, %5 : vector<288x128xf32>
    %cst_6 = arith.constant 0.000000e+00 : f32
    %7 = vector.broadcast %cst_6 : f32 to vector<288x128xf32>
    %8 = arith.maximumf %6, %7 : vector<288x128xf32>
    %c1 = arith.constant 1 : index
    %c0_7 = arith.constant 0 : index
    %c0_8 = arith.constant 0 : index
    %9 = vector.load %arg1[%c1, %c0_7, %c0_8] : memref<4x288x25xf32, #tpu.memory_space<vmem>>, vector<1x288x25xf32>
    %10 = vector.shape_cast %9 : vector<1x288x25xf32> to vector<288x25xf32>
    %cst_9 = arith.constant dense<0.000000e+00> : vector<288x128xf32>
    %11 = tpu.matmul %10, %0, %cst_9 {dimension_numbers = #tpu.dot_dimension_numbers<[1], [0], [0], [1], [0, 0, 1, 1], [], []>} : vector<288x25xf32>, vector<25x128xf32>, vector<288x128xf32> -> vector<288x128xf32>
    %12 = vector.broadcast %1 : vector<1x128xf32> to vector<288x128xf32>
    %13 = arith.addf %11, %12 : vector<288x128xf32>
    %cst_10 = arith.constant 0.000000e+00 : f32
    %14 = vector.broadcast %cst_10 : f32 to vector<288x128xf32>
    %15 = arith.maximumf %13, %14 : vector<288x128xf32>
    %16 = arith.maximumf %8, %15 : vector<288x128xf32>
    %c2 = arith.constant 2 : index
    %c0_11 = arith.constant 0 : index
    %c0_12 = arith.constant 0 : index
    %17 = vector.load %arg1[%c2, %c0_11, %c0_12] : memref<4x288x25xf32, #tpu.memory_space<vmem>>, vector<1x288x25xf32>
    %18 = vector.shape_cast %17 : vector<1x288x25xf32> to vector<288x25xf32>
    %cst_13 = arith.constant dense<0.000000e+00> : vector<288x128xf32>
    %19 = tpu.matmul %18, %0, %cst_13 {dimension_numbers = #tpu.dot_dimension_numbers<[1], [0], [0], [1], [0, 0, 1, 1], [], []>} : vector<288x25xf32>, vector<25x128xf32>, vector<288x128xf32> -> vector<288x128xf32>
    %20 = vector.broadcast %1 : vector<1x128xf32> to vector<288x128xf32>
    %21 = arith.addf %19, %20 : vector<288x128xf32>
    %cst_14 = arith.constant 0.000000e+00 : f32
    %22 = vector.broadcast %cst_14 : f32 to vector<288x128xf32>
    %23 = arith.maximumf %21, %22 : vector<288x128xf32>
    %c3 = arith.constant 3 : index
    %c0_15 = arith.constant 0 : index
    %c0_16 = arith.constant 0 : index
    %24 = vector.load %arg1[%c3, %c0_15, %c0_16] : memref<4x288x25xf32, #tpu.memory_space<vmem>>, vector<1x288x25xf32>
    %25 = vector.shape_cast %24 : vector<1x288x25xf32> to vector<288x25xf32>
    %cst_17 = arith.constant dense<0.000000e+00> : vector<288x128xf32>
    %26 = tpu.matmul %25, %0, %cst_17 {dimension_numbers = #tpu.dot_dimension_numbers<[1], [0], [0], [1], [0, 0, 1, 1], [], []>} : vector<288x25xf32>, vector<25x128xf32>, vector<288x128xf32> -> vector<288x128xf32>
    %27 = vector.broadcast %1 : vector<1x128xf32> to vector<288x128xf32>
    %28 = arith.addf %26, %27 : vector<288x128xf32>
    %cst_18 = arith.constant 0.000000e+00 : f32
    %29 = vector.broadcast %cst_18 : f32 to vector<288x128xf32>
    %30 = arith.maximumf %28, %29 : vector<288x128xf32>
    %31 = arith.maximumf %23, %30 : vector<288x128xf32>
    %32 = arith.maximumf %16, %31 : vector<288x128xf32>
    %c0_19 = arith.constant 0 : index
    %c0_20 = arith.constant 0 : index
    %33 = vector.load %arg4[%c0_19, %c0_20] : memref<288x128xf32, #tpu.memory_space<vmem>>, vector<288x128xf32>
    tpu.vector_store %arg4[%c0_19, %c0_20], %32 {strides = array<i32>} : memref<288x128xf32, #tpu.memory_space<vmem>>, vector<288x128xf32>,
    return
  }
  func.func @transform_0(%arg0: i32) -> (i32, i32, i32) {
    %c0_i32 = arith.constant 0 : i32
    %c0_i32_0 = arith.constant 0 : i32
    %c0_i32_1 = arith.constant 0 : i32
    return %c0_i32, %arg0, %c0_i32_0 : i32, i32, i32
  }
  func.func @transform_1(%arg0: i32) -> (i32, i32) {
    %c0_i32 = arith.constant 0 : i32
    %c0_i32_0 = arith.constant 0 : i32
    %c0_i32_1 = arith.constant 0 : i32
    return %c0_i32, %c0_i32_0 : i32, i32
  }
  func.func @transform_2(%arg0: i32) -> (i32, i32) {
    %c0_i32 = arith.constant 0 : i32
    %c0_i32_0 = arith.constant 0 : i32
    %c0_i32_1 = arith.constant 0 : i32
    return %c0_i32, %c0_i32_0 : i32, i32
  }
  func.func @transform_3(%arg0: i32) -> (i32, i32) {
    %c0_i32 = arith.constant 0 : i32
    %c0_i32_0 = arith.constant 0 : i32
    return %arg0, %c0_i32 : i32, i32
  }
}

module attributes {stable_mosaic.version = 11 : i64} {
  func.func @_conv_relu_pool_kernel(%arg0: i32, %arg1: memref<4x32x150xf32, #tpu.memory_space<vmem>>, %arg2: memref<150x128xf32, #tpu.memory_space<vmem>>, %arg3: memref<1x128xf32, #tpu.memory_space<vmem>>, %arg4: memref<32x128xf32, #tpu.memory_space<vmem>>) attributes {dimension_semantics = [#tpu.dimension_semantics<parallel>], iteration_bounds = array<i64: 1>, scalar_prefetch = 0 : i64, scratch_operands = 0 : i64, tpu.core_type = #tpu.core_type<tc>, window_params = [{transform_indices = @transform_0, window_bounds = array<i64: 4, 32, 150>}, {pipeline_mode = #tpu.pipeline_mode<synchronous>, transform_indices = @transform_1, window_bounds = array<i64: 150, 128>}, {pipeline_mode = #tpu.pipeline_mode<synchronous>, transform_indices = @transform_2, window_bounds = array<i64: 1, 128>}, {transform_indices = @transform_3, window_bounds = array<i64: 32, 128>}]} {
    %c0 = arith.constant 0 : index
    %c0_0 = arith.constant 0 : index
    %0 = vector.load %arg2[%c0, %c0_0] : memref<150x128xf32, #tpu.memory_space<vmem>>, vector<150x128xf32>
    %c0_1 = arith.constant 0 : index
    %c0_2 = arith.constant 0 : index
    %1 = vector.load %arg3[%c0_1, %c0_2] : memref<1x128xf32, #tpu.memory_space<vmem>>, vector<1x128xf32>
    %c0_3 = arith.constant 0 : index
    %c0_4 = arith.constant 0 : index
    %c0_5 = arith.constant 0 : index
    %2 = vector.load %arg1[%c0_3, %c0_4, %c0_5] : memref<4x32x150xf32, #tpu.memory_space<vmem>>, vector<1x32x150xf32>
    %3 = vector.shape_cast %2 : vector<1x32x150xf32> to vector<32x150xf32>
    %cst = arith.constant dense<0.000000e+00> : vector<32x128xf32>
    %4 = tpu.matmul %3, %0, %cst {dimension_numbers = #tpu.dot_dimension_numbers<[1], [0], [0], [1], [0, 0, 1, 1], [], []>} : vector<32x150xf32>, vector<150x128xf32>, vector<32x128xf32> -> vector<32x128xf32>
    %5 = vector.broadcast %1 : vector<1x128xf32> to vector<32x128xf32>
    %6 = arith.addf %4, %5 : vector<32x128xf32>
    %cst_6 = arith.constant 0.000000e+00 : f32
    %7 = vector.broadcast %cst_6 : f32 to vector<32x128xf32>
    %8 = arith.maximumf %6, %7 : vector<32x128xf32>
    %c1 = arith.constant 1 : index
    %c0_7 = arith.constant 0 : index
    %c0_8 = arith.constant 0 : index
    %9 = vector.load %arg1[%c1, %c0_7, %c0_8] : memref<4x32x150xf32, #tpu.memory_space<vmem>>, vector<1x32x150xf32>
    %10 = vector.shape_cast %9 : vector<1x32x150xf32> to vector<32x150xf32>
    %cst_9 = arith.constant dense<0.000000e+00> : vector<32x128xf32>
    %11 = tpu.matmul %10, %0, %cst_9 {dimension_numbers = #tpu.dot_dimension_numbers<[1], [0], [0], [1], [0, 0, 1, 1], [], []>} : vector<32x150xf32>, vector<150x128xf32>, vector<32x128xf32> -> vector<32x128xf32>
    %12 = vector.broadcast %1 : vector<1x128xf32> to vector<32x128xf32>
    %13 = arith.addf %11, %12 : vector<32x128xf32>
    %cst_10 = arith.constant 0.000000e+00 : f32
    %14 = vector.broadcast %cst_10 : f32 to vector<32x128xf32>
    %15 = arith.maximumf %13, %14 : vector<32x128xf32>
    %16 = arith.maximumf %8, %15 : vector<32x128xf32>
    %c2 = arith.constant 2 : index
    %c0_11 = arith.constant 0 : index
    %c0_12 = arith.constant 0 : index
    %17 = vector.load %arg1[%c2, %c0_11, %c0_12] : memref<4x32x150xf32, #tpu.memory_space<vmem>>, vector<1x32x150xf32>
    %18 = vector.shape_cast %17 : vector<1x32x150xf32> to vector<32x150xf32>
    %cst_13 = arith.constant dense<0.000000e+00> : vector<32x128xf32>
    %19 = tpu.matmul %18, %0, %cst_13 {dimension_numbers = #tpu.dot_dimension_numbers<[1], [0], [0], [1], [0, 0, 1, 1], [], []>} : vector<32x150xf32>, vector<150x128xf32>, vector<32x128xf32> -> vector<32x128xf32>
    %20 = vector.broadcast %1 : vector<1x128xf32> to vector<32x128xf32>
    %21 = arith.addf %19, %20 : vector<32x128xf32>
    %cst_14 = arith.constant 0.000000e+00 : f32
    %22 = vector.broadcast %cst_14 : f32 to vector<32x128xf32>
    %23 = arith.maximumf %21, %22 : vector<32x128xf32>
    %c3 = arith.constant 3 : index
    %c0_15 = arith.constant 0 : index
    %c0_16 = arith.constant 0 : index
    %24 = vector.load %arg1[%c3, %c0_15, %c0_16] : memref<4x32x150xf32, #tpu.memory_space<vmem>>, vector<1x32x150xf32>
    %25 = vector.shape_cast %24 : vector<1x32x150xf32> to vector<32x150xf32>
    %cst_17 = arith.constant dense<0.000000e+00> : vector<32x128xf32>
    %26 = tpu.matmul %25, %0, %cst_17 {dimension_numbers = #tpu.dot_dimension_numbers<[1], [0], [0], [1], [0, 0, 1, 1], [], []>} : vector<32x150xf32>, vector<150x128xf32>, vector<32x128xf32> -> vector<32x128xf32>
    %27 = vector.broadcast %1 : vector<1x128xf32> to vector<32x128xf32>
    %28 = arith.addf %26, %27 : vector<32x128xf32>
    %cst_18 = arith.constant 0.000000e+00 : f32
    %29 = vector.broadcast %cst_18 : f32 to vector<32x128xf32>
    %30 = arith.maximumf %28, %29 : vector<32x128xf32>
    %31 = arith.maximumf %23, %30 : vector<32x128xf32>
    %32 = arith.maximumf %16, %31 : vector<32x128xf32>
    %c0_19 = arith.constant 0 : index
    %c0_20 = arith.constant 0 : index
    %33 = vector.load %arg4[%c0_19, %c0_20] : memref<32x128xf32, #tpu.memory_space<vmem>>, vector<32x128xf32>
    tpu.vector_store %arg4[%c0_19, %c0_20], %32 {strides = array<i32>} : memref<32x128xf32, #tpu.memory_space<vmem>>, vector<32x128xf32>,
    return
  }
  func.func @transform_0(%arg0: i32) -> (i32, i32, i32) {
    %c0_i32 = arith.constant 0 : i32
    %c0_i32_0 = arith.constant 0 : i32
    %c0_i32_1 = arith.constant 0 : i32
    return %c0_i32, %arg0, %c0_i32_0 : i32, i32, i32
  }
  func.func @transform_1(%arg0: i32) -> (i32, i32) {
    %c0_i32 = arith.constant 0 : i32
    %c0_i32_0 = arith.constant 0 : i32
    %c0_i32_1 = arith.constant 0 : i32
    return %c0_i32, %c0_i32_0 : i32, i32
  }
  func.func @transform_2(%arg0: i32) -> (i32, i32) {
    %c0_i32 = arith.constant 0 : i32
    %c0_i32_0 = arith.constant 0 : i32
    %c0_i32_1 = arith.constant 0 : i32
    return %c0_i32, %c0_i32_0 : i32, i32
  }
  func.func @transform_3(%arg0: i32) -> (i32, i32) {
    %c0_i32 = arith.constant 0 : i32
    %c0_i32_0 = arith.constant 0 : i32
    return %arg0, %c0_i32 : i32, i32
  }
}

module attributes {stable_mosaic.version = 11 : i64} {
  func.func @_fc_chain_kernel(%arg0: i32, %arg1: memref<2x2048xf32, #tpu.memory_space<vmem>>, %arg2: memref<2048x128xf32, #tpu.memory_space<vmem>>, %arg3: memref<1x128xf32, #tpu.memory_space<vmem>>, %arg4: memref<128x128xf32, #tpu.memory_space<vmem>>, %arg5: memref<1x128xf32, #tpu.memory_space<vmem>>, %arg6: memref<128x128xf32, #tpu.memory_space<vmem>>, %arg7: memref<1x128xf32, #tpu.memory_space<vmem>>, %arg8: memref<2x128xf32, #tpu.memory_space<vmem>>) attributes {dimension_semantics = [#tpu.dimension_semantics<parallel>], iteration_bounds = array<i64: 1>, scalar_prefetch = 0 : i64, scratch_operands = 0 : i64, tpu.core_type = #tpu.core_type<tc>, window_params = [{transform_indices = @transform_0, window_bounds = array<i64: 2, 2048>}, {pipeline_mode = #tpu.pipeline_mode<synchronous>, transform_indices = @transform_1, window_bounds = array<i64: 2048, 128>}, {pipeline_mode = #tpu.pipeline_mode<synchronous>, transform_indices = @transform_2, window_bounds = array<i64: 1, 128>}, {pipeline_mode = #tpu.pipeline_mode<synchronous>, transform_indices = @transform_3, window_bounds = array<i64: 128, 128>}, {pipeline_mode = #tpu.pipeline_mode<synchronous>, transform_indices = @transform_4, window_bounds = array<i64: 1, 128>}, {pipeline_mode = #tpu.pipeline_mode<synchronous>, transform_indices = @transform_5, window_bounds = array<i64: 128, 128>}, {pipeline_mode = #tpu.pipeline_mode<synchronous>, transform_indices = @transform_6, window_bounds = array<i64: 1, 128>}, {transform_indices = @transform_7, window_bounds = array<i64: 2, 128>}]} {
    %c0 = arith.constant 0 : index
    %c0_0 = arith.constant 0 : index
    %0 = vector.load %arg1[%c0, %c0_0] : memref<2x2048xf32, #tpu.memory_space<vmem>>, vector<2x2048xf32>
    %c0_1 = arith.constant 0 : index
    %c0_2 = arith.constant 0 : index
    %1 = vector.load %arg2[%c0_1, %c0_2] : memref<2048x128xf32, #tpu.memory_space<vmem>>, vector<2048x128xf32>
    %cst = arith.constant dense<0.000000e+00> : vector<2x128xf32>
    %2 = tpu.matmul %0, %1, %cst {dimension_numbers = #tpu.dot_dimension_numbers<[1], [0], [0], [1], [0, 0, 1, 1], [], []>} : vector<2x2048xf32>, vector<2048x128xf32>, vector<2x128xf32> -> vector<2x128xf32>
    %c0_3 = arith.constant 0 : index
    %c0_4 = arith.constant 0 : index
    %3 = vector.load %arg3[%c0_3, %c0_4] : memref<1x128xf32, #tpu.memory_space<vmem>>, vector<1x128xf32>
    %4 = vector.broadcast %3 : vector<1x128xf32> to vector<2x128xf32>
    %5 = arith.addf %2, %4 : vector<2x128xf32>
    %cst_5 = arith.constant 0.000000e+00 : f32
    %6 = vector.broadcast %cst_5 : f32 to vector<2x128xf32>
    %7 = arith.maximumf %5, %6 : vector<2x128xf32>
    %c0_6 = arith.constant 0 : index
    %c0_7 = arith.constant 0 : index
    %8 = vector.load %arg4[%c0_6, %c0_7] : memref<128x128xf32, #tpu.memory_space<vmem>>, vector<128x128xf32>
    %cst_8 = arith.constant dense<0.000000e+00> : vector<2x128xf32>
    %9 = tpu.matmul %7, %8, %cst_8 {dimension_numbers = #tpu.dot_dimension_numbers<[1], [0], [0], [1], [0, 0, 1, 1], [], []>} : vector<2x128xf32>, vector<128x128xf32>, vector<2x128xf32> -> vector<2x128xf32>
    %c0_9 = arith.constant 0 : index
    %c0_10 = arith.constant 0 : index
    %10 = vector.load %arg5[%c0_9, %c0_10] : memref<1x128xf32, #tpu.memory_space<vmem>>, vector<1x128xf32>
    %11 = vector.broadcast %10 : vector<1x128xf32> to vector<2x128xf32>
    %12 = arith.addf %9, %11 : vector<2x128xf32>
    %cst_11 = arith.constant 0.000000e+00 : f32
    %13 = vector.broadcast %cst_11 : f32 to vector<2x128xf32>
    %14 = arith.maximumf %12, %13 : vector<2x128xf32>
    %c0_12 = arith.constant 0 : index
    %c0_13 = arith.constant 0 : index
    %15 = vector.load %arg6[%c0_12, %c0_13] : memref<128x128xf32, #tpu.memory_space<vmem>>, vector<128x128xf32>
    %cst_14 = arith.constant dense<0.000000e+00> : vector<2x128xf32>
    %16 = tpu.matmul %14, %15, %cst_14 {dimension_numbers = #tpu.dot_dimension_numbers<[1], [0], [0], [1], [0, 0, 1, 1], [], []>} : vector<2x128xf32>, vector<128x128xf32>, vector<2x128xf32> -> vector<2x128xf32>
    %c0_15 = arith.constant 0 : index
    %c0_16 = arith.constant 0 : index
    %17 = vector.load %arg7[%c0_15, %c0_16] : memref<1x128xf32, #tpu.memory_space<vmem>>, vector<1x128xf32>
    %18 = vector.broadcast %17 : vector<1x128xf32> to vector<2x128xf32>
    %19 = arith.addf %16, %18 : vector<2x128xf32>
    %c0_17 = arith.constant 0 : index
    %c0_18 = arith.constant 0 : index
    %20 = vector.load %arg8[%c0_17, %c0_18] : memref<2x128xf32, #tpu.memory_space<vmem>>, vector<2x128xf32>
    tpu.vector_store %arg8[%c0_17, %c0_18], %19 {strides = array<i32>} : memref<2x128xf32, #tpu.memory_space<vmem>>, vector<2x128xf32>,
    return
  }
  func.func @transform_0(%arg0: i32) -> (i32, i32) {
    %c0_i32 = arith.constant 0 : i32
    %c0_i32_0 = arith.constant 0 : i32
    return %arg0, %c0_i32 : i32, i32
  }
  func.func @transform_1(%arg0: i32) -> (i32, i32) {
    %c0_i32 = arith.constant 0 : i32
    %c0_i32_0 = arith.constant 0 : i32
    %c0_i32_1 = arith.constant 0 : i32
    return %c0_i32, %c0_i32_0 : i32, i32
  }
  func.func @transform_2(%arg0: i32) -> (i32, i32) {
    %c0_i32 = arith.constant 0 : i32
    %c0_i32_0 = arith.constant 0 : i32
    %c0_i32_1 = arith.constant 0 : i32
    return %c0_i32, %c0_i32_0 : i32, i32
  }
  func.func @transform_3(%arg0: i32) -> (i32, i32) {
    %c0_i32 = arith.constant 0 : i32
    %c0_i32_0 = arith.constant 0 : i32
    %c0_i32_1 = arith.constant 0 : i32
    return %c0_i32, %c0_i32_0 : i32, i32
  }
  func.func @transform_4(%arg0: i32) -> (i32, i32) {
    %c0_i32 = arith.constant 0 : i32
    %c0_i32_0 = arith.constant 0 : i32
    %c0_i32_1 = arith.constant 0 : i32
    return %c0_i32, %c0_i32_0 : i32, i32
  }
  func.func @transform_5(%arg0: i32) -> (i32, i32) {
    %c0_i32 = arith.constant 0 : i32
    %c0_i32_0 = arith.constant 0 : i32
    %c0_i32_1 = arith.constant 0 : i32
    return %c0_i32, %c0_i32_0 : i32, i32
  }
  func.func @transform_6(%arg0: i32) -> (i32, i32) {
    %c0_i32 = arith.constant 0 : i32
    %c0_i32_0 = arith.constant 0 : i32
    %c0_i32_1 = arith.constant 0 : i32
    return %c0_i32, %c0_i32_0 : i32, i32
  }
  func.func @transform_7(%arg0: i32) -> (i32, i32) {
    %c0_i32 = arith.constant 0 : i32
    %c0_i32_0 = arith.constant 0 : i32
    return %arg0, %c0_i32 : i32, i32
  }
}

</mosaic_0001>

<bundles_post_ra>
// kernel: lenet5_forward.3
= control target key start
LH: loop header
LB: loop body
LE: loop exit
PB: predicated region body
PF: predicated region fallthrough
CT: control target
= control target key end

     0   :  { %vm170_vm0 = vcmask 1040384   ;;  %vm61_vm1 = vcmask 203776   ;;  %vm2588_vm2 = vmmov 1   ;;  %s3573_s1 = inlined_call_operand.vmem [shape: f32[25,128], index: 1, kind: input, shape index: {}]   ;;  %s3574_s0 = inlined_call_operand.vmem [shape: f32[4,288,25], index: 0, kind: input, shape index: {}]   ;;  %s3575_s2 = inlined_call_operand.vmem [shape: f32[1,128], index: 2, kind: input, shape index: {}]   ;;  %s3576_s3 = inlined_call_operand.vmem [shape: f32[288,128], index: 3, kind: output, shape index: {}]  }
   0x1   :  { %v14_v0 = vld [vmem:[%s3573_s1] sm:$0xff]  ;;  %v15_v1 = vld [vmem:[%s3573_s1 + $0x8] sm:$0xff]  ;;  %v16_v2 = vld [vmem:[%s3573_s1 + $0x10] sm:$0xff] }
   0x2   :  { %v2546_v3 = vpack.c.bf16 %v15_v1, %v14_v0  ;;  %v17_v4 = vld [vmem:[%s3573_s1 + $0x18] sm:$0x1]  ;;  %v19_v5 = vld [vmem:[%s3574_s0] sm:$0xff]  ;;  %vm2624_vm3 = vmpackc.low %vm170_vm0, %vm2588_vm2 }
   0x3   :  { %v2550_v6 = vpack.c.bf16 %v17_v4, %v16_v2  ;;  %2306 = vmatprep.mubr.msk.f32.mxu0 %vm61_vm1, %v19_v5  ;;  %v1919_v8 = vld [vmem:[%s3574_s0 + $0x120] sm:$0xff]  ;;  %v20_v9 = vld [vmem:[%s3574_s0 + $0x8] sm:$0xff]  ;;  %v21_v11 = vld [vmem:[%s3574_s0 + $0x10] sm:$0xff] }
   0x4   :  { %2547 = vmatprep.subr.bf16.mxu0 %v2546_v3  ;;  %2557 = vmatprep.subr.bf16.mxu1 %v2546_v3  ;;  %v1920_v10 = vld [vmem:[%s3574_s0 + $0x128] sm:$0xff]  ;;  %v1921_v12 = vld [vmem:[%s3574_s0 + $0x130] sm:$0xff]  ;;  %v22_v13 = vld [vmem:[%s3574_s0 + $0x18] sm:$0xff] }
   0x5   :  { %2549 = vmatpush3.bf16.msra.mxu0 %v2546_v3  ;;  %2559 = vmatpush3.bf16.msra.mxu1 %v2546_v3  ;;  %v1922_v14 = vld [vmem:[%s3574_s0 + $0x138] sm:$0xff]  ;;  %v23_v15 = vld [vmem:[%s3574_s0 + $0x20] sm:$0xff]  ;;  %v24_v17 = vld [vmem:[%s3574_s0 + $0x28] sm:$0xff] }
   0x6   :  { %2552 = vmatprep.subr.msk.bf16.mxu0 %vm2624_vm3, %v2550_v6  ;;  %2562 = vmatprep.subr.msk.bf16.mxu1 %vm2624_vm3, %v2550_v6  ;;  %v1923_v16 = vld [vmem:[%s3574_s0 + $0x140] sm:$0xff]  ;;  %v1924_v18 = vld [vmem:[%s3574_s0 + $0x148] sm:$0xff]  ;;  %v25_v19 = vld [vmem:[%s3574_s0 + $0x30] sm:$0xff] }
   0x7   :  { %2368 = vmatprep.mubr.msk.f32.mxu1 %vm61_vm1, %v1919_v8  ;;  %v1925_v20 = vld [vmem:[%s3574_s0 + $0x150] sm:$0xff]  ;;  %v26_v21 = vld [vmem:[%s3574_s0 + $0x38] sm:$0xff]  ;;  %v27_v23 = vld [vmem:[%s3574_s0 + $0x40] sm:$0xff] }
   0x8   :  { %v1926_v22 = vld [vmem:[%s3574_s0 + $0x158] sm:$0xff]  ;;  %v1927_v24 = vld [vmem:[%s3574_s0 + $0x160] sm:$0xff]  ;;  %v28_v25 = vld [vmem:[%s3574_s0 + $0x48] sm:$0xff] }
   0x9   :  { %2555 = vmatpush3.bf16.msk.msra.mxu0 %vm2624_vm3, %v2550_v6  ;;  %2565 = vmatpush3.bf16.msk.msra.mxu1 %vm2624_vm3, %v2550_v6  ;;  %v1928_v26 = vld [vmem:[%s3574_s0 + $0x168] sm:$0xff]  ;;  %v29_v27 = vld [vmem:[%s3574_s0 + $0x50] sm:$0xff]  ;;  %v30_v29 = vld [vmem:[%s3574_s0 + $0x58] sm:$0xff] }
   0xa   :  { %2567 = vmatprep.subr.bf16.mxu0 %v2546_v3  ;;  %2577 = vmatprep.subr.bf16.mxu1 %v2546_v3  ;;  %v1929_v28 = vld [vmem:[%s3574_s0 + $0x170] sm:$0xff]  ;;  %v1930_v30 = vld [vmem:[%s3574_s0 + $0x178] sm:$0xff]  ;;  %v31_v31 = vld [vmem:[%s3574_s0 + $0x60] sm:$0xff] }
   0xb   :  { %v1931_v32 = vld [vmem:[%s3574_s0 + $0x180] sm:$0xff]  ;;  %v32_v33 = vld [vmem:[%s3574_s0 + $0x68] sm:$0xff]  ;;  %v33_v35 = vld [vmem:[%s3574_s0 + $0x70] sm:$0xff] }
   0xc   :  { %2307 = vmatmul.mubr.msk.f32.vlgmr.msra.gmra.mrb[0].mxu0 %vm61_vm1, %v20_v9  ;;  %2369 = vmatmul.mubr.msk.f32.vlgmr.msra.gmra.mrb[0].mxu1 %vm61_vm1, %v1920_v10  ;;  %v1932_v34 = vld [vmem:[%s3574_s0 + $0x188] sm:$0xff]  ;;  %v1933_v36 = vld [vmem:[%s3574_s0 + $0x190] sm:$0xff]  ;;  %v34_v37 = vld [vmem:[%s3574_s0 + $0x78] sm:$0xff] }
   0xd   :  { %2569 = vmatpush3.bf16.msra.mxu0 %v2546_v3  ;;  %2579 = vmatpush3.bf16.msra.mxu1 %v2546_v3  ;;  %v1934_v38 = vld [vmem:[%s3574_s0 + $0x198] sm:$0xff]  ;;  %v35_v39 = vld [vmem:[%s3574_s0 + $0x80] sm:$0xff]  ;;  %v36_v41 = vld [vmem:[%s3574_s0 + $0x88] sm:$0xff] }
   0xe   :  { %2309 = vmatprep.mubr.msk.f32.mxu0 %vm61_vm1, %v21_v11  ;;  %2371 = vmatprep.mubr.msk.f32.mxu1 %vm61_vm1, %v1921_v12  ;;  %v1935_v40 = vld [vmem:[%s3574_s0 + $0x1a0] sm:$0xff]  ;;  %v1936_v42 = vld [vmem:[%s3574_s0 + $0x1a8] sm:$0xff]  ;;  %v37_v43 = vld [vmem:[%s3574_s0 + $0x90] sm:$0xff] }
   0xf   :  { %2572 = vmatprep.subr.msk.bf16.mxu0 %vm2624_vm3, %v2550_v6  ;;  %2582 = vmatprep.subr.msk.bf16.mxu1 %vm2624_vm3, %v2550_v6  ;;  %v1937_v44 = vld [vmem:[%s3574_s0 + $0x1b0] sm:$0xff]  ;;  %v38_v45 = vld [vmem:[%s3574_s0 + $0x98] sm:$0xff]  ;;  %v39_v47 = vld [vmem:[%s3574_s0 + $0xa0] sm:$0xff] }
  0x10   :  { %2310 = vmatmul.mubr.msk.f32.gmra.mrb[2].mxu0 %vm61_vm1, %v22_v13  ;;  %2372 = vmatmul.mubr.msk.f32.gmra.mrb[2].mxu1 %vm61_vm1, %v1922_v14  ;;  %v1938_v46 = vld [vmem:[%s3574_s0 + $0x1b8] sm:$0xff]  ;;  %v1939_v48 = vld [vmem:[%s3574_s0 + $0x1c0] sm:$0xff]  ;;  %v40_v49 = vld [vmem:[%s3574_s0 + $0xa8] sm:$0xff] }
  0x11   :  { %2312 = vmatprep.mubr.msk.f32.mxu0 %vm61_vm1, %v23_v15  ;;  %2374 = vmatprep.mubr.msk.f32.mxu1 %vm61_vm1, %v1923_v16  ;;  %v1940_v50 = vld [vmem:[%s3574_s0 + $0x1c8] sm:$0xff]  ;;  %v41_v51 = vld [vmem:[%s3574_s0 + $0xb0] sm:$0xff]  ;;  %v42_v53 = vld [vmem:[%s3574_s0 + $0xb8] sm:$0xff] }
  0x12   :  { %2575 = vmatpush3.bf16.msk.msra.mxu0 %vm2624_vm3, %v2550_v6  ;;  %2585 = vmatpush3.bf16.msk.msra.mxu1 %vm2624_vm3, %v2550_v6  ;;  %v1941_v52 = vld [vmem:[%s3574_s0 + $0x1d0] sm:$0xff]  ;;  %v1942_v54 = vld [vmem:[%s3574_s0 + $0x1d8] sm:$0xff]  ;;  %v43_v55 = vld [vmem:[%s3574_s0 + $0xc0] sm:$0xff] }
  0x13   :  { %v1943_v56 = vld [vmem:[%s3574_s0 + $0x1e0] sm:$0xff]  ;;  %v44_v57 = vld [vmem:[%s3574_s0 + $0xc8] sm:$0xff]  ;;  %v45_v59 = vld [vmem:[%s3574_s0 + $0xd0] sm:$0xff] }
  0x14   :  { %2313 = vmatmul.mubr.msk.f32.gmra.mrb[4].mxu0 %vm61_vm1, %v24_v17  ;;  %2375 = vmatmul.mubr.msk.f32.gmra.mrb[4].mxu1 %vm61_vm1, %v1924_v18  ;;  %v1944_v58 = vld [vmem:[%s3574_s0 + $0x1e8] sm:$0xff]  ;;  %v1945_v60 = vld [vmem:[%s3574_s0 + $0x1f0] sm:$0xff]  ;;  %v46_v61 = vld [vmem:[%s3574_s0 + $0xd8] sm:$0xff] }
  0x15   :  { %2315 = vmatprep.mubr.msk.f32.mxu0 %vm61_vm1, %v25_v19  ;;  %2377 = vmatprep.mubr.msk.f32.mxu1 %vm61_vm1, %v1925_v20  ;;  %v1946_v62 = vld [vmem:[%s3574_s0 + $0x1f8] sm:$0xff]  ;;  %v47_v63 = vld [vmem:[%s3574_s0 + $0xe0] sm:$0xff]  ;;  %v48_v1 = vld [vmem:[%s3574_s0 + $0xe8] sm:$0xff] }
  0x16   :  { %v1947_v0 = vld [vmem:[%s3574_s0 + $0x200] sm:$0xff]  ;;  %v1948_v2 = vld [vmem:[%s3574_s0 + $0x208] sm:$0xff]  ;;  %v49_v3 = vld [vmem:[%s3574_s0 + $0xf0] sm:$0xff] }
  0x17   :  { %v1949_v4 = vld [vmem:[%s3574_s0 + $0x210] sm:$0xff]  ;;  %v50_v5 = vld [vmem:[%s3574_s0 + $0xf8] sm:$0xff]  ;;  %v51_v7 = vld [vmem:[%s3574_s0 + $0x100] sm:$0xff] }
  0x18   :  { %2316 = vmatmul.mubr.msk.f32.gmra.mrb[6].mxu0 %vm61_vm1, %v26_v21  ;;  %2378 = vmatmul.mubr.msk.f32.gmra.mrb[6].mxu1 %vm61_vm1, %v1926_v22  ;;  %v1950_v6 = vld [vmem:[%s3574_s0 + $0x218] sm:$0xff]  ;;  %v1951_v8 = vld [vmem:[%s3574_s0 + $0x220] sm:$0xff]  ;;  %v52_v9 = vld [vmem:[%s3574_s0 + $0x108] sm:$0xff] }
  0x19   :  { %2318 = vmatprep.mubr.msk.f32.mxu0 %vm61_vm1, %v27_v23  ;;  %2380 = vmatprep.mubr.msk.f32.mxu1 %vm61_vm1, %v1927_v24  ;;  %v1952_v10 = vld [vmem:[%s3574_s0 + $0x228] sm:$0xff]  ;;  %v53_v11 = vld [vmem:[%s3574_s0 + $0x110] sm:$0xff]  ;;  %v54_v13 = vld [vmem:[%s3574_s0 + $0x118] sm:$0xff] }
  0x1a   :  { %v1953_v12 = vld [vmem:[%s3574_s0 + $0x230] sm:$0xff]  ;;  %v1954_v14 = vld [vmem:[%s3574_s0 + $0x238] sm:$0xff]  ;;  %v1992_v15 = vld [vmem:[%s3574_s0 + $0x240] sm:$0xff] }
  0x1b   :  { %v2065_v16 = vld [vmem:[%s3574_s0 + $0x360] sm:$0xff]  ;;  %v1993_v17 = vld [vmem:[%s3574_s0 + $0x248] sm:$0xff]  ;;  %v1994_v19 = vld [vmem:[%s3574_s0 + $0x250] sm:$0xff] }
  0x1c   :  { %2319 = vmatmul.mubr.msk.f32.gmra.mrb[8].mxu0 %vm61_vm1, %v28_v25  ;;  %2381 = vmatmul.mubr.msk.f32.gmra.mrb[8].mxu1 %vm61_vm1, %v1928_v26  ;;  %v2066_v18 = vld [vmem:[%s3574_s0 + $0x368] sm:$0xff]  ;;  %v2067_v20 = vld [vmem:[%s3574_s0 + $0x370] sm:$0xff]  ;;  %v1995_v21 = vld [vmem:[%s3574_s0 + $0x258] sm:$0xff] }
  0x1d   :  { %2321 = vmatprep.mubr.msk.f32.mxu0 %vm61_vm1, %v29_v27  ;;  %2383 = vmatprep.mubr.msk.f32.mxu1 %vm61_vm1, %v1929_v28  ;;  %v2068_v22 = vld [vmem:[%s3574_s0 + $0x378] sm:$0xff]  ;;  %v1996_v23 = vld [vmem:[%s3574_s0 + $0x260] sm:$0xff]  ;;  %v1997_v25 = vld [vmem:[%s3574_s0 + $0x268] sm:$0xff] }
  0x1e   :  { %v2069_v24 = vld [vmem:[%s3574_s0 + $0x380] sm:$0xff]  ;;  %v2070_v26 = vld [vmem:[%s3574_s0 + $0x388] sm:$0xff]  ;;  %v1998_v27 = vld [vmem:[%s3574_s0 + $0x270] sm:$0xff] }
  0x1f   :  { %v2071_v28 = vld [vmem:[%s3574_s0 + $0x390] sm:$0xff] }
  0x20   :  { %2322 = vmatmul.mubr.msk.f32.gmra.mrb[10].mxu0 %vm61_vm1, %v30_v29  ;;  %2384 = vmatmul.mubr.msk.f32.gmra.mrb[10].mxu1 %vm61_vm1, %v1930_v30  ;;  %v1999_v29 = vld [vmem:[%s3574_s0 + $0x278] sm:$0xff] }
  0x21   :  { %2324 = vmatprep.mubr.msk.f32.mxu0 %vm61_vm1, %v31_v31  ;;  %2386 = vmatprep.mubr.msk.f32.mxu1 %vm61_vm1, %v1931_v32  ;;  %v2072_v30 = vld [vmem:[%s3574_s0 + $0x398] sm:$0xff]  ;;  %v2000_v31 = vld [vmem:[%s3574_s0 + $0x280] sm:$0xff] }
  0x22   :  { %v2073_v32 = vld [vmem:[%s3574_s0 + $0x3a0] sm:$0xff] }
  0x24   :  { %2325 = vmatmul.mubr.msk.f32.gmra.mrb[12].mxu0 %vm61_vm1, %v32_v33  ;;  %2387 = vmatmul.mubr.msk.f32.gmra.mrb[12].mxu1 %vm61_vm1, %v1932_v34  ;;  %v2001_v33 = vld [vmem:[%s3574_s0 + $0x288] sm:$0xff] }
  0x25   :  { %2327 = vmatprep.mubr.msk.f32.mxu0 %vm61_vm1, %v33_v35  ;;  %2389 = vmatprep.mubr.msk.f32.mxu1 %vm61_vm1, %v1933_v36  ;;  %v2074_v34 = vld [vmem:[%s3574_s0 + $0x3a8] sm:$0xff]  ;;  %v2002_v35 = vld [vmem:[%s3574_s0 + $0x290] sm:$0xff] }
  0x26   :  { %v2075_v36 = vld [vmem:[%s3574_s0 + $0x3b0] sm:$0xff] }
  0x28   :  { %2328 = vmatmul.mubr.msk.f32.gmra.mrb[14].mxu0 %vm61_vm1, %v34_v37  ;;  %2390 = vmatmul.mubr.msk.f32.gmra.mrb[14].mxu1 %vm61_vm1, %v1934_v38  ;;  %v2003_v37 = vld [vmem:[%s3574_s0 + $0x298] sm:$0xff] }
  0x29   :  { %2330 = vmatprep.mubr.msk.f32.mxu0 %vm61_vm1, %v35_v39  ;;  %2392 = vmatprep.mubr.msk.f32.mxu1 %vm61_vm1, %v1935_v40  ;;  %v2076_v38 = vld [vmem:[%s3574_s0 + $0x3b8] sm:$0xff]  ;;  %v2004_v39 = vld [vmem:[%s3574_s0 + $0x2a0] sm:$0xff] }
  0x2a   :  { %v2077_v40 = vld [vmem:[%s3574_s0 + $0x3c0] sm:$0xff] }
  0x2c   :  { %2331 = vmatmul.mubr.msk.f32.gmra.mrb[16].mxu0 %vm61_vm1, %v36_v41  ;;  %2393 = vmatmul.mubr.msk.f32.gmra.mrb[16].mxu1 %vm61_vm1, %v1936_v42  ;;  %v2005_v41 = vld [vmem:[%s3574_s0 + $0x2a8] sm:$0xff] }
  0x2d   :  { %2333 = vmatprep.mubr.msk.f32.mxu0 %vm61_vm1, %v37_v43  ;;  %2395 = vmatprep.mubr.msk.f32.mxu1 %vm61_vm1, %v1937_v44  ;;  %v2078_v42 = vld [vmem:[%s3574_s0 + $0x3c8] sm:$0xff]  ;;  %v2006_v43 = vld [vmem:[%s3574_s0 + $0x2b0] sm:$0xff] }
  0x2e   :  { %v2079_v44 = vld [vmem:[%s3574_s0 + $0x3d0] sm:$0xff] }
  0x30   :  { %2334 = vmatmul.mubr.msk.f32.gmra.mrb[18].mxu0 %vm61_vm1, %v38_v45  ;;  %2396 = vmatmul.mubr.msk.f32.gmra.mrb[18].mxu1 %vm61_vm1, %v1938_v46  ;;  %v2007_v45 = vld [vmem:[%s3574_s0 + $0x2b8] sm:$0xff] }
  0x31   :  { %2336 = vmatprep.mubr.msk.f32.mxu0 %vm61_vm1, %v39_v47  ;;  %2398 = vmatprep.mubr.msk.f32.mxu1 %vm61_vm1, %v1939_v48  ;;  %v2080_v46 = vld [vmem:[%s3574_s0 + $0x3d8] sm:$0xff]  ;;  %v2008_v47 = vld [vmem:[%s3574_s0 + $0x2c0] sm:$0xff] }
  0x32   :  { %v2081_v48 = vld [vmem:[%s3574_s0 + $0x3e0] sm:$0xff] }
  0x34   :  { %2337 = vmatmul.mubr.msk.f32.gmra.mrb[20].mxu0 %vm61_vm1, %v40_v49  ;;  %2399 = vmatmul.mubr.msk.f32.gmra.mrb[20].mxu1 %vm61_vm1, %v1940_v50  ;;  %v2009_v49 = vld [vmem:[%s3574_s0 + $0x2c8] sm:$0xff] }
  0x35   :  { %2339 = vmatprep.mubr.msk.f32.mxu0 %vm61_vm1, %v41_v51  ;;  %2401 = vmatprep.mubr.msk.f32.mxu1 %vm61_vm1, %v1941_v52  ;;  %v2082_v50 = vld [vmem:[%s3574_s0 + $0x3e8] sm:$0xff]  ;;  %v2010_v51 = vld [vmem:[%s3574_s0 + $0x2d0] sm:$0xff] }
  0x36   :  { %v2083_v52 = vld [vmem:[%s3574_s0 + $0x3f0] sm:$0xff] }
  0x38   :  { %2340 = vmatmul.mubr.msk.f32.gmra.mrb[22].mxu0 %vm61_vm1, %v42_v53  ;;  %2402 = vmatmul.mubr.msk.f32.gmra.mrb[22].mxu1 %vm61_vm1, %v1942_v54  ;;  %v2011_v53 = vld [vmem:[%s3574_s0 + $0x2d8] sm:$0xff] }
  0x39   :  { %2342 = vmatprep.mubr.msk.f32.mxu0 %vm61_vm1, %v43_v55  ;;  %2404 = vmatprep.mubr.msk.f32.mxu1 %vm61_vm1, %v1943_v56  ;;  %v2084_v54 = vld [vmem:[%s3574_s0 + $0x3f8] sm:$0xff]  ;;  %v2012_v55 = vld [vmem:[%s3574_s0 + $0x2e0] sm:$0xff] }
  0x3a   :  { %v2085_v56 = vld [vmem:[%s3574_s0 + $0x400] sm:$0xff] }
  0x3c   :  { %2343 = vmatmul.mubr.msk.f32.gmra.mrb[24].mxu0 %vm61_vm1, %v44_v57  ;;  %2405 = vmatmul.mubr.msk.f32.gmra.mrb[24].mxu1 %vm61_vm1, %v1944_v58  ;;  %v2013_v57 = vld [vmem:[%s3574_s0 + $0x2e8] sm:$0xff] }
  0x3d   :  { %2345 = vmatprep.mubr.msk.f32.mxu0 %vm61_vm1, %v45_v59  ;;  %2407 = vmatprep.mubr.msk.f32.mxu1 %vm61_vm1, %v1945_v60  ;;  %v2086_v58 = vld [vmem:[%s3574_s0 + $0x408] sm:$0xff]  ;;  %v2014_v59 = vld [vmem:[%s3574_s0 + $0x2f0] sm:$0xff] }
  0x3e   :  { %v2087_v60 = vld [vmem:[%s3574_s0 + $0x410] sm:$0xff] }
  0x40   :  { %2346 = vmatmul.mubr.msk.f32.gmra.mrb[26].mxu0 %vm61_vm1, %v46_v61  ;;  %2408 = vmatmul.mubr.msk.f32.gmra.mrb[26].mxu1 %vm61_vm1, %v1946_v62  ;;  %v2015_v61 = vld [vmem:[%s3574_s0 + $0x2f8] sm:$0xff] }
  0x41   :  { %2348 = vmatprep.mubr.msk.f32.mxu0 %vm61_vm1, %v47_v63  ;;  %2410 = vmatprep.mubr.msk.f32.mxu1 %vm61_vm1, %v1947_v0  ;;  %v2088_v62 = vld [vmem:[%s3574_s0 + $0x418] sm:$0xff]  ;;  %v2016_v63 = vld [vmem:[%s3574_s0 + $0x300] sm:$0xff] }
  0x42   :  { %v2089_v0 = vld [vmem:[%s3574_s0 + $0x420] sm:$0xff] }
  0x44   :  { %2349 = vmatmul.mubr.msk.f32.gmra.mrb[28].mxu0 %vm61_vm1, %v48_v1  ;;  %2411 = vmatmul.mubr.msk.f32.gmra.mrb[28].mxu1 %vm61_vm1, %v1948_v2  ;;  %v2017_v1 = vld [vmem:[%s3574_s0 + $0x308] sm:$0xff] }
  0x45   :  { %2351 = vmatprep.mubr.msk.f32.mxu0 %vm61_vm1, %v49_v3  ;;  %2413 = vmatprep.mubr.msk.f32.mxu1 %vm61_vm1, %v1949_v4  ;;  %v2090_v2 = vld [vmem:[%s3574_s0 + $0x428] sm:$0xff]  ;;  %v2018_v3 = vld [vmem:[%s3574_s0 + $0x310] sm:$0xff] }
  0x46   :  { %v2091_v4 = vld [vmem:[%s3574_s0 + $0x430] sm:$0xff] }
  0x48   :  { %2352 = vmatmul.mubr.msk.f32.gmra.mrb[30].mxu0 %vm61_vm1, %v50_v5  ;;  %2414 = vmatmul.mubr.msk.f32.gmra.mrb[30].mxu1 %vm61_vm1, %v1950_v6  ;;  %v2019_v5 = vld [vmem:[%s3574_s0 + $0x318] sm:$0xff] }
  0x49   :  { %2354 = vmatprep.mubr.msk.f32.mxu0 %vm61_vm1, %v51_v7  ;;  %2416 = vmatprep.mubr.msk.f32.mxu1 %vm61_vm1, %v1951_v8  ;;  %v2092_v6 = vld [vmem:[%s3574_s0 + $0x438] sm:$0xff]  ;;  %v2020_v7 = vld [vmem:[%s3574_s0 + $0x320] sm:$0xff] }
  0x4a   :  { %v2093_v8 = vld [vmem:[%s3574_s0 + $0x440] sm:$0xff] }
  0x4c   :  { %2355 = vmatmul.mubr.msk.f32.gmra.mrb[32].mxu0 %vm61_vm1, %v52_v9  ;;  %2417 = vmatmul.mubr.msk.f32.gmra.mrb[32].mxu1 %vm61_vm1, %v1952_v10  ;;  %v2021_v9 = vld [vmem:[%s3574_s0 + $0x328] sm:$0xff] }
  0x4d   :  { %2357 = vmatprep.mubr.msk.f32.mxu0 %vm61_vm1, %v53_v11  ;;  %2419 = vmatprep.mubr.msk.f32.mxu1 %vm61_vm1, %v1953_v12  ;;  %v2094_v10 = vld [vmem:[%s3574_s0 + $0x448] sm:$0xff]  ;;  %v2022_v11 = vld [vmem:[%s3574_s0 + $0x330] sm:$0xff] }
  0x4e   :  { %v2095_v12 = vld [vmem:[%s3574_s0 + $0x450] sm:$0xff] }
  0x50   :  { %2358 = vmatmul.mubr.msk.f32.gmra.mrb[34].mxu0 %vm61_vm1, %v54_v13  ;;  %2420 = vmatmul.mubr.msk.f32.gmra.mrb[34].mxu1 %vm61_vm1, %v1954_v14  ;;  %v2023_v13 = vld [vmem:[%s3574_s0 + $0x338] sm:$0xff] }
  0x51   :  { %2430 = vmatprep.mubr.msk.f32.mxu0 %vm61_vm1, %v1992_v15  ;;  %2492 = vmatprep.mubr.msk.f32.mxu1 %vm61_vm1, %v2065_v16  ;;  %v2096_v14 = vld [vmem:[%s3574_s0 + $0x458] sm:$0xff]  ;;  %v2024_v15 = vld [vmem:[%s3574_s0 + $0x340] sm:$0xff] }
  0x52   :  { %v2097_v16 = vld [vmem:[%s3574_s0 + $0x460] sm:$0xff] }
  0x54   :  { %2431 = vmatmul.mubr.msk.f32.vlgmr.msra.gmra.mrb[36].mxu0 %vm61_vm1, %v1993_v17  ;;  %2493 = vmatmul.mubr.msk.f32.vlgmr.msra.gmra.mrb[36].mxu1 %vm61_vm1, %v2066_v18  ;;  %v2025_v17 = vld [vmem:[%s3574_s0 + $0x348] sm:$0xff] }
  0x55   :  { %2433 = vmatprep.mubr.msk.f32.mxu0 %vm61_vm1, %v1994_v19  ;;  %2495 = vmatprep.mubr.msk.f32.mxu1 %vm61_vm1, %v2067_v20  ;;  %v2098_v18 = vld [vmem:[%s3574_s0 + $0x468] sm:$0xff]  ;;  %v2026_v19 = vld [vmem:[%s3574_s0 + $0x350] sm:$0xff] }
  0x56   :  { %v2099_v20 = vld [vmem:[%s3574_s0 + $0x470] sm:$0xff] }
  0x58   :  { %2434 = vmatmul.mubr.msk.f32.gmra.mrb[38].mxu0 %vm61_vm1, %v1995_v21  ;;  %2496 = vmatmul.mubr.msk.f32.gmra.mrb[38].mxu1 %vm61_vm1, %v2068_v22  ;;  %v2027_v21 = vld [vmem:[%s3574_s0 + $0x358] sm:$0xff] }
  0x59   :  { %2436 = vmatprep.mubr.msk.f32.mxu0 %vm61_vm1, %v1996_v23  ;;  %2498 = vmatprep.mubr.msk.f32.mxu1 %vm61_vm1, %v2069_v24  ;;  %v2100_v22 = vld [vmem:[%s3574_s0 + $0x478] sm:$0xff]  ;;  %v3220_v23 = vld [vmem:[%s3575_s2] ss:$0 sm:$0xff] }
  0x5c   :  { %2437 = vmatmul.mubr.msk.f32.gmra.mrb[40].mxu0 %vm61_vm1, %v1997_v25  ;;  %2499 = vmatmul.mubr.msk.f32.gmra.mrb[40].mxu1 %vm61_vm1, %v2070_v26 }
  0x5d   :  { %2439 = vmatprep.mubr.msk.f32.mxu0 %vm61_vm1, %v1998_v27  ;;  %2501 = vmatprep.mubr.msk.f32.mxu1 %vm61_vm1, %v2071_v28 }
  0x60   :  { %2440 = vmatmul.mubr.msk.f32.gmra.mrb[42].mxu0 %vm61_vm1, %v1999_v29  ;;  %2502 = vmatmul.mubr.msk.f32.gmra.mrb[42].mxu1 %vm61_vm1, %v2072_v30 }
  0x61   :  { %2442 = vmatprep.mubr.msk.f32.mxu0 %vm61_vm1, %v2000_v31  ;;  %2504 = vmatprep.mubr.msk.f32.mxu1 %vm61_vm1, %v2073_v32 }
  0x64   :  { %2443 = vmatmul.mubr.msk.f32.gmra.mrb[44].mxu0 %vm61_vm1, %v2001_v33  ;;  %2505 = vmatmul.mubr.msk.f32.gmra.mrb[44].mxu1 %vm61_vm1, %v2074_v34 }
  0x65   :  { %2445 = vmatprep.mubr.msk.f32.mxu0 %vm61_vm1, %v2002_v35  ;;  %2507 = vmatprep.mubr.msk.f32.mxu1 %vm61_vm1, %v2075_v36 }
  0x68   :  { %2446 = vmatmul.mubr.msk.f32.gmra.mrb[46].mxu0 %vm61_vm1, %v2003_v37  ;;  %2508 = vmatmul.mubr.msk.f32.gmra.mrb[46].mxu1 %vm61_vm1, %v2076_v38 }
  0x69   :  { %2448 = vmatprep.mubr.msk.f32.mxu0 %vm61_vm1, %v2004_v39  ;;  %2510 = vmatprep.mubr.msk.f32.mxu1 %vm61_vm1, %v2077_v40 }
  0x6c   :  { %2449 = vmatmul.mubr.msk.f32.gmra.mrb[48].mxu0 %vm61_vm1, %v2005_v41  ;;  %2511 = vmatmul.mubr.msk.f32.gmra.mrb[48].mxu1 %vm61_vm1, %v2078_v42 }
  0x6d   :  { %2451 = vmatprep.mubr.msk.f32.mxu0 %vm61_vm1, %v2006_v43  ;;  %2513 = vmatprep.mubr.msk.f32.mxu1 %vm61_vm1, %v2079_v44 }
  0x70   :  { %2452 = vmatmul.mubr.msk.f32.gmra.mrb[50].mxu0 %vm61_vm1, %v2007_v45  ;;  %2514 = vmatmul.mubr.msk.f32.gmra.mrb[50].mxu1 %vm61_vm1, %v2080_v46 }
  0x71   :  { %2454 = vmatprep.mubr.msk.f32.mxu0 %vm61_vm1, %v2008_v47  ;;  %2516 = vmatprep.mubr.msk.f32.mxu1 %vm61_vm1, %v2081_v48 }
  0x74   :  { %2455 = vmatmul.mubr.msk.f32.gmra.mrb[52].mxu0 %vm61_vm1, %v2009_v49  ;;  %2517 = vmatmul.mubr.msk.f32.gmra.mrb[52].mxu1 %vm61_vm1, %v2082_v50 }
  0x75   :  { %2457 = vmatprep.mubr.msk.f32.mxu0 %vm61_vm1, %v2010_v51  ;;  %2519 = vmatprep.mubr.msk.f32.mxu1 %vm61_vm1, %v2083_v52 }
  0x78   :  { %2458 = vmatmul.mubr.msk.f32.gmra.mrb[54].mxu0 %vm61_vm1, %v2011_v53  ;;  %2520 = vmatmul.mubr.msk.f32.gmra.mrb[54].mxu1 %vm61_vm1, %v2084_v54 }
  0x79   :  { %2460 = vmatprep.mubr.msk.f32.mxu0 %vm61_vm1, %v2012_v55  ;;  %2522 = vmatprep.mubr.msk.f32.mxu1 %vm61_vm1, %v2085_v56 }
  0x7c   :  { %2461 = vmatmul.mubr.msk.f32.gmra.mrb[56].mxu0 %vm61_vm1, %v2013_v57  ;;  %2523 = vmatmul.mubr.msk.f32.gmra.mrb[56].mxu1 %vm61_vm1, %v2086_v58 }
  0x7d   :  { %2463 = vmatprep.mubr.msk.f32.mxu0 %vm61_vm1, %v2014_v59  ;;  %2525 = vmatprep.mubr.msk.f32.mxu1 %vm61_vm1, %v2087_v60 }
  0x80   :  { %2464 = vmatmul.mubr.msk.f32.gmra.mrb[58].mxu0 %vm61_vm1, %v2015_v61  ;;  %2526 = vmatmul.mubr.msk.f32.gmra.mrb[58].mxu1 %vm61_vm1, %v2088_v62 }
  0x81   :  { %2466 = vmatprep.mubr.msk.f32.mxu0 %vm61_vm1, %v2016_v63  ;;  %2528 = vmatprep.mubr.msk.f32.mxu1 %vm61_vm1, %v2089_v0 }
  0x84   :  { %2467 = vmatmul.mubr.msk.f32.gmra.mrb[60].mxu0 %vm61_vm1, %v2017_v1  ;;  %2529 = vmatmul.mubr.msk.f32.gmra.mrb[60].mxu1 %vm61_vm1, %v2090_v2 }
  0x85   :  { %2469 = vmatprep.mubr.msk.f32.mxu0 %vm61_vm1, %v2018_v3  ;;  %2531 = vmatprep.mubr.msk.f32.mxu1 %vm61_vm1, %v2091_v4 }
  0x88   :  { %2470 = vmatmul.mubr.msk.f32.gmra.mrb[62].mxu0 %vm61_vm1, %v2019_v5  ;;  %2532 = vmatmul.mubr.msk.f32.gmra.mrb[62].mxu1 %vm61_vm1, %v2092_v6 }
  0x89   :  { %2472 = vmatprep.mubr.msk.f32.mxu0 %vm61_vm1, %v2020_v7  ;;  %2534 = vmatprep.mubr.msk.f32.mxu1 %vm61_vm1, %v2093_v8 }
  0x8c   :  { %2473 = vmatmul.mubr.msk.f32.gmra.mrb[64].mxu0 %vm61_vm1, %v2021_v9  ;;  %2535 = vmatmul.mubr.msk.f32.gmra.mrb[64].mxu1 %vm61_vm1, %v2094_v10 }
  0x8d   :  { %2475 = vmatprep.mubr.msk.f32.mxu0 %vm61_vm1, %v2022_v11  ;;  %2537 = vmatprep.mubr.msk.f32.mxu1 %vm61_vm1, %v2095_v12 }
  0x90   :  { %2476 = vmatmul.mubr.msk.f32.gmra.mrb[66].mxu0 %vm61_vm1, %v2023_v13  ;;  %2538 = vmatmul.mubr.msk.f32.gmra.mrb[66].mxu1 %vm61_vm1, %v2096_v14 }
  0x91   :  { %2478 = vmatprep.mubr.msk.f32.mxu0 %vm61_vm1, %v2024_v15  ;;  %2540 = vmatprep.mubr.msk.f32.mxu1 %vm61_vm1, %v2097_v16 }
  0x94   :  { %2479 = vmatmul.mubr.msk.f32.gmra.mrb[68].mxu0 %vm61_vm1, %v2025_v17  ;;  %2541 = vmatmul.mubr.msk.f32.gmra.mrb[68].mxu1 %vm61_vm1, %v2098_v18 }
  0x95   :  { %2481 = vmatprep.mubr.msk.f32.mxu0 %vm61_vm1, %v2026_v19  ;;  %2543 = vmatprep.mubr.msk.f32.mxu1 %vm61_vm1, %v2099_v20 }
  0x98   :  { %2482 = vmatmul.mubr.msk.f32.gmra.mrb[70].mxu0 %vm61_vm1, %v2027_v21  ;;  %2544 = vmatmul.mubr.msk.f32.gmra.mrb[70].mxu1 %vm61_vm1, %v2100_v22 }
  0xdf   :  { %v2308_v24 = vpop.f32.mrb[0].mxu0  ;;  %v2370_v25 = vpop.f32.mrb[0].mxu1 }
  0xe0   :  { %v246_v26 = vadd.f32 %v2308_v24, %v3220_v23  ;;  %v672_v27 = vadd.f32 %v2370_v25, %v3220_v23  ;;  %v240_v28 = vpop.f32.mrb[1].mxu0  ;;  %v666_v29 = vpop.f32.mrb[1].mxu1 }
  0xe1   :  { %v241_v30 = vadd.f32 %v3220_v23, %v240_v28  ;;  %v667_v31 = vadd.f32 %v3220_v23, %v666_v29 }
  0xe2   :  { %v420_v32 = vmax.f32 %v246_v26, 0.0  ;;  %v846_v33 = vmax.f32 %v672_v27, 0.0 }
  0xe3   :  { %v419_v34 = vmax.f32 %v241_v30, 0.0  ;;  %v845_v35 = vmax.f32 %v667_v31, 0.0  ;;  %v2311_v36 = vpop.f32.mrb[2].mxu0  ;;  %v2373_v37 = vpop.f32.mrb[2].mxu1 }
  0xe4   :  { %v3226_v38 = vmax.f32 %v420_v32, %v846_v33  ;;  %v256_v39 = vadd.f32 %v2311_v36, %v3220_v23  ;;  %v682_v40 = vadd.f32 %v2373_v37, %v3220_v23  ;;  %v250_v41 = vpop.f32.mrb[3].mxu0  ;;  %v676_v42 = vpop.f32.mrb[3].mxu1 }
  0xe5   :  { %v3230_v43 = vmax.f32 %v419_v34, %v845_v35  ;;  %v251_v44 = vadd.f32 %v3220_v23, %v250_v41  ;;  %v677_v45 = vadd.f32 %v3220_v23, %v676_v42 }
  0xe6   :  { %v422_v46 = vmax.f32 %v256_v39, 0.0  ;;  %v848_v47 = vmax.f32 %v682_v40, 0.0 }
  0xe7   :  { %v421_v48 = vmax.f32 %v251_v44, 0.0  ;;  %v847_v49 = vmax.f32 %v677_v45, 0.0  ;;  %v2314_v50 = vpop.f32.mrb[4].mxu0  ;;  %v2376_v51 = vpop.f32.mrb[4].mxu1 }
  0xe8   :  { %v3234_v52 = vmax.f32 %v422_v46, %v848_v47  ;;  %v266_v53 = vadd.f32 %v2314_v50, %v3220_v23  ;;  %v692_v54 = vadd.f32 %v2376_v51, %v3220_v23  ;;  %v260_v55 = vpop.f32.mrb[5].mxu0  ;;  %v686_v56 = vpop.f32.mrb[5].mxu1 }
  0xe9   :  { %v3238_v57 = vmax.f32 %v421_v48, %v847_v49  ;;  %v261_v58 = vadd.f32 %v3220_v23, %v260_v55  ;;  %v687_v59 = vadd.f32 %v3220_v23, %v686_v56 }
  0xea   :  { %v424_v60 = vmax.f32 %v266_v53, 0.0  ;;  %v850_v61 = vmax.f32 %v692_v54, 0.0 }
  0xeb   :  { %v423_v62 = vmax.f32 %v261_v58, 0.0  ;;  %v849_v63 = vmax.f32 %v687_v59, 0.0  ;;  %v2317_v0 = vpop.f32.mrb[6].mxu0  ;;  %v2379_v1 = vpop.f32.mrb[6].mxu1 }
  0xec   :  { %v3242_v2 = vmax.f32 %v424_v60, %v850_v61  ;;  %v276_v3 = vadd.f32 %v2317_v0, %v3220_v23  ;;  %v702_v4 = vadd.f32 %v2379_v1, %v3220_v23  ;;  %v270_v5 = vpop.f32.mrb[7].mxu0  ;;  %v696_v6 = vpop.f32.mrb[7].mxu1 }
  0xed   :  { %v3246_v7 = vmax.f32 %v423_v62, %v849_v63  ;;  %v271_v8 = vadd.f32 %v3220_v23, %v270_v5  ;;  %v697_v9 = vadd.f32 %v3220_v23, %v696_v6 }
  0xee   :  { %v426_v10 = vmax.f32 %v276_v3, 0.0  ;;  %v852_v11 = vmax.f32 %v702_v4, 0.0 }
  0xef   :  { %v425_v12 = vmax.f32 %v271_v8, 0.0  ;;  %v851_v13 = vmax.f32 %v697_v9, 0.0  ;;  %v2320_v14 = vpop.f32.mrb[8].mxu0  ;;  %v2382_v15 = vpop.f32.mrb[8].mxu1 }
  0xf0   :  { %v3250_v16 = vmax.f32 %v426_v10, %v852_v11  ;;  %v286_v17 = vadd.f32 %v2320_v14, %v3220_v23  ;;  %v712_v18 = vadd.f32 %v2382_v15, %v3220_v23  ;;  %v280_v19 = vpop.f32.mrb[9].mxu0  ;;  %v706_v20 = vpop.f32.mrb[9].mxu1 }
  0xf1   :  { %v3254_v21 = vmax.f32 %v425_v12, %v851_v13  ;;  %v281_v22 = vadd.f32 %v3220_v23, %v280_v19  ;;  %v707_v24 = vadd.f32 %v3220_v23, %v706_v20 }
  0xf2   :  { %v428_v25 = vmax.f32 %v286_v17, 0.0  ;;  %v854_v26 = vmax.f32 %v712_v18, 0.0 }
  0xf3   :  { %v427_v27 = vmax.f32 %v281_v22, 0.0  ;;  %v853_v28 = vmax.f32 %v707_v24, 0.0  ;;  %v2323_v29 = vpop.f32.mrb[10].mxu0  ;;  %v2385_v30 = vpop.f32.mrb[10].mxu1 }
  0xf4   :  { %v3258_v31 = vmax.f32 %v428_v25, %v854_v26  ;;  %v296_v32 = vadd.f32 %v2323_v29, %v3220_v23  ;;  %v722_v33 = vadd.f32 %v2385_v30, %v3220_v23  ;;  %v290_v34 = vpop.f32.mrb[11].mxu0  ;;  %v716_v35 = vpop.f32.mrb[11].mxu1 }
  0xf5   :  { %v3262_v36 = vmax.f32 %v427_v27, %v853_v28  ;;  %v291_v37 = vadd.f32 %v3220_v23, %v290_v34  ;;  %v717_v39 = vadd.f32 %v3220_v23, %v716_v35 }
  0xf6   :  { %v430_v40 = vmax.f32 %v296_v32, 0.0  ;;  %v856_v41 = vmax.f32 %v722_v33, 0.0 }
  0xf7   :  { %v429_v42 = vmax.f32 %v291_v37, 0.0  ;;  %v855_v44 = vmax.f32 %v717_v39, 0.0  ;;  %v2326_v45 = vpop.f32.mrb[12].mxu0  ;;  %v2388_v46 = vpop.f32.mrb[12].mxu1 }
  0xf8   :  { %v3266_v47 = vmax.f32 %v430_v40, %v856_v41  ;;  %v306_v48 = vadd.f32 %v2326_v45, %v3220_v23  ;;  %v732_v49 = vadd.f32 %v2388_v46, %v3220_v23  ;;  %v300_v50 = vpop.f32.mrb[13].mxu0  ;;  %v726_v51 = vpop.f32.mrb[13].mxu1 }
  0xf9   :  { %v3270_v53 = vmax.f32 %v429_v42, %v855_v44  ;;  %v301_v54 = vadd.f32 %v3220_v23, %v300_v50  ;;  %v727_v55 = vadd.f32 %v3220_v23, %v726_v51 }
  0xfa   :  { %v432_v56 = vmax.f32 %v306_v48, 0.0  ;;  %v858_v58 = vmax.f32 %v732_v49, 0.0 }
  0xfb   :  { %v431_v59 = vmax.f32 %v301_v54, 0.0  ;;  %v857_v60 = vmax.f32 %v727_v55, 0.0  ;;  %v2329_v61 = vpop.f32.mrb[14].mxu0  ;;  %v2391_v62 = vpop.f32.mrb[14].mxu1 }
  0xfc   :  { %v3274_v63 = vmax.f32 %v432_v56, %v858_v58  ;;  %v316_v0 = vadd.f32 %v2329_v61, %v3220_v23  ;;  %v742_v1 = vadd.f32 %v2391_v62, %v3220_v23  ;;  %v310_v3 = vpop.f32.mrb[15].mxu0  ;;  %v736_v4 = vpop.f32.mrb[15].mxu1 }
  0xfd   :  { %v3278_v5 = vmax.f32 %v431_v59, %v857_v60  ;;  %v311_v6 = vadd.f32 %v3220_v23, %v310_v3  ;;  %v737_v8 = vadd.f32 %v3220_v23, %v736_v4 }
  0xfe   :  { %v434_v9 = vmax.f32 %v316_v0, 0.0  ;;  %v860_v10 = vmax.f32 %v742_v1, 0.0 }
  0xff   :  { %v433_v11 = vmax.f32 %v311_v6, 0.0  ;;  %v859_v12 = vmax.f32 %v737_v8, 0.0  ;;  %v2332_v13 = vpop.f32.mrb[16].mxu0  ;;  %v2394_v14 = vpop.f32.mrb[16].mxu1 }
 0x100   :  { %v3282_v15 = vmax.f32 %v434_v9, %v860_v10  ;;  %v326_v17 = vadd.f32 %v2332_v13, %v3220_v23  ;;  %v752_v18 = vadd.f32 %v2394_v14, %v3220_v23  ;;  %v320_v19 = vpop.f32.mrb[17].mxu0  ;;  %v746_v20 = vpop.f32.mrb[17].mxu1 }
 0x101   :  { %v3286_v22 = vmax.f32 %v433_v11, %v859_v12  ;;  %v321_v24 = vadd.f32 %v3220_v23, %v320_v19  ;;  %v747_v25 = vadd.f32 %v3220_v23, %v746_v20 }
 0x102   :  { %v436_v26 = vmax.f32 %v326_v17, 0.0  ;;  %v862_v27 = vmax.f32 %v752_v18, 0.0 }
 0x103   :  { %v435_v28 = vmax.f32 %v321_v24, 0.0  ;;  %v861_v29 = vmax.f32 %v747_v25, 0.0  ;;  %v2335_v30 = vpop.f32.mrb[18].mxu0  ;;  %v2397_v32 = vpop.f32.mrb[18].mxu1 }
 0x104   :  { %v3290_v33 = vmax.f32 %v436_v26, %v862_v27  ;;  %v336_v34 = vadd.f32 %v2335_v30, %v3220_v23  ;;  %v762_v35 = vadd.f32 %v2397_v32, %v3220_v23  ;;  %v330_v37 = vpop.f32.mrb[19].mxu0  ;;  %v756_v39 = vpop.f32.mrb[19].mxu1 }
 0x105   :  { %v3294_v40 = vmax.f32 %v435_v28, %v861_v29  ;;  %v331_v41 = vadd.f32 %v3220_v23, %v330_v37  ;;  %v757_v42 = vadd.f32 %v3220_v23, %v756_v39 }
 0x106   :  { %v438_v44 = vmax.f32 %v336_v34, 0.0  ;;  %v864_v45 = vmax.f32 %v762_v35, 0.0 }
 0x107   :  { %v437_v46 = vmax.f32 %v331_v41, 0.0  ;;  %v863_v48 = vmax.f32 %v757_v42, 0.0  ;;  %v2338_v49 = vpop.f32.mrb[20].mxu0  ;;  %v2400_v50 = vpop.f32.mrb[20].mxu1 }
 0x108   :  { %v3298_v51 = vmax.f32 %v438_v44, %v864_v45  ;;  %v346_v54 = vadd.f32 %v2338_v49, %v3220_v23  ;;  %v772_v55 = vadd.f32 %v2400_v50, %v3220_v23  ;;  %v340_v56 = vpop.f32.mrb[21].mxu0  ;;  %v766_v58 = vpop.f32.mrb[21].mxu1 }
 0x109   :  { %v3302_v59 = vmax.f32 %v437_v46, %v863_v48  ;;  %v341_v60 = vadd.f32 %v3220_v23, %v340_v56  ;;  %v767_v61 = vadd.f32 %v3220_v23, %v766_v58 }
 0x10a   :  { %v440_v62 = vmax.f32 %v346_v54, 0.0  ;;  %v866_v0 = vmax.f32 %v772_v55, 0.0 }
 0x10b   :  { %v439_v1 = vmax.f32 %v341_v60, 0.0  ;;  %v865_v3 = vmax.f32 %v767_v61, 0.0  ;;  %v2341_v4 = vpop.f32.mrb[22].mxu0  ;;  %v2403_v6 = vpop.f32.mrb[22].mxu1 }
 0x10c   :  { %v3306_v8 = vmax.f32 %v440_v62, %v866_v0  ;;  %v356_v9 = vadd.f32 %v2341_v4, %v3220_v23  ;;  %v782_v10 = vadd.f32 %v2403_v6, %v3220_v23  ;;  %v350_v11 = vpop.f32.mrb[23].mxu0  ;;  %v776_v12 = vpop.f32.mrb[23].mxu1 }
 0x10d   :  { %v3310_v13 = vmax.f32 %v439_v1, %v865_v3  ;;  %v351_v14 = vadd.f32 %v3220_v23, %v350_v11  ;;  %v777_v17 = vadd.f32 %v3220_v23, %v776_v12 }
 0x10e   :  { %v442_v18 = vmax.f32 %v356_v9, 0.0  ;;  %v868_v19 = vmax.f32 %v782_v10, 0.0 }
 0x10f   :  { %v441_v20 = vmax.f32 %v351_v14, 0.0  ;;  %v867_v24 = vmax.f32 %v777_v17, 0.0  ;;  %v2344_v25 = vpop.f32.mrb[24].mxu0  ;;  %v2406_v26 = vpop.f32.mrb[24].mxu1 }
 0x110   :  { %v3314_v27 = vmax.f32 %v442_v18, %v868_v19  ;;  %v366_v28 = vadd.f32 %v2344_v25, %v3220_v23  ;;  %v792_v29 = vadd.f32 %v2406_v26, %v3220_v23  ;;  %v360_v30 = vpop.f32.mrb[25].mxu0  ;;  %v786_v32 = vpop.f32.mrb[25].mxu1 }
 0x111   :  { %v3318_v34 = vmax.f32 %v441_v20, %v867_v24  ;;  %v361_v35 = vadd.f32 %v3220_v23, %v360_v30  ;;  %v787_v37 = vadd.f32 %v3220_v23, %v786_v32 }
 0x112   :  { %v444_v39 = vmax.f32 %v366_v28, 0.0  ;;  %v870_v41 = vmax.f32 %v792_v29, 0.0 }
 0x113   :  { %v443_v42 = vmax.f32 %v361_v35, 0.0  ;;  %v869_v44 = vmax.f32 %v787_v37, 0.0  ;;  %v2347_v45 = vpop.f32.mrb[26].mxu0  ;;  %v2409_v46 = vpop.f32.mrb[26].mxu1 }
 0x114   :  { %v3322_v48 = vmax.f32 %v444_v39, %v870_v41  ;;  %v376_v49 = vadd.f32 %v2347_v45, %v3220_v23  ;;  %v802_v50 = vadd.f32 %v2409_v46, %v3220_v23  ;;  %v370_v54 = vpop.f32.mrb[27].mxu0  ;;  %v796_v55 = vpop.f32.mrb[27].mxu1 }
 0x115   :  { %v3326_v56 = vmax.f32 %v443_v42, %v869_v44  ;;  %v371_v58 = vadd.f32 %v3220_v23, %v370_v54  ;;  %v797_v60 = vadd.f32 %v3220_v23, %v796_v55 }
 0x116   :  { %v446_v61 = vmax.f32 %v376_v49, 0.0  ;;  %v872_v62 = vmax.f32 %v802_v50, 0.0 }
 0x117   :  { %v445_v0 = vmax.f32 %v371_v58, 0.0  ;;  %v871_v1 = vmax.f32 %v797_v60, 0.0  ;;  %v2350_v3 = vpop.f32.mrb[28].mxu0  ;;  %v2412_v4 = vpop.f32.mrb[28].mxu1 }
 0x118   :  { %v3330_v6 = vmax.f32 %v446_v61, %v872_v62  ;;  %v386_v9 = vadd.f32 %v2350_v3, %v3220_v23  ;;  %v812_v10 = vadd.f32 %v2412_v4, %v3220_v23  ;;  %v380_v11 = vpop.f32.mrb[29].mxu0  ;;  %v806_v12 = vpop.f32.mrb[29].mxu1 }
 0x119   :  { %v3334_v14 = vmax.f32 %v445_v0, %v871_v1  ;;  %v381_v17 = vadd.f32 %v3220_v23, %v380_v11  ;;  %v807_v18 = vadd.f32 %v3220_v23, %v806_v12 }
 0x11a   :  { %v448_v19 = vmax.f32 %v386_v9, 0.0  ;;  %v874_v20 = vmax.f32 %v812_v10, 0.0 }
 0x11b   :  { %v447_v24 = vmax.f32 %v381_v17, 0.0  ;;  %v873_v25 = vmax.f32 %v807_v18, 0.0  ;;  %v2353_v26 = vpop.f32.mrb[30].mxu0  ;;  %v2415_v28 = vpop.f32.mrb[30].mxu1 }
 0x11c   :  { %v3338_v29 = vmax.f32 %v448_v19, %v874_v20  ;;  %v396_v30 = vadd.f32 %v2353_v26, %v3220_v23  ;;  %v822_v32 = vadd.f32 %v2415_v28, %v3220_v23  ;;  %v390_v35 = vpop.f32.mrb[31].mxu0  ;;  %v816_v37 = vpop.f32.mrb[31].mxu1 }
 0x11d   :  { %v3342_v39 = vmax.f32 %v447_v24, %v873_v25  ;;  %v391_v41 = vadd.f32 %v3220_v23, %v390_v35  ;;  %v817_v42 = vadd.f32 %v3220_v23, %v816_v37 }
 0x11e   :  { %v450_v44 = vmax.f32 %v396_v30, 0.0  ;;  %v876_v45 = vmax.f32 %v822_v32, 0.0 }
 0x11f   :  { %v449_v46 = vmax.f32 %v391_v41, 0.0  ;;  %v875_v49 = vmax.f32 %v817_v42, 0.0  ;;  %v2356_v50 = vpop.f32.mrb[32].mxu0  ;;  %v2418_v54 = vpop.f32.mrb[32].mxu1 }
 0x120   :  { %v3346_v55 = vmax.f32 %v450_v44, %v876_v45  ;;  %v406_v58 = vadd.f32 %v2356_v50, %v3220_v23  ;;  %v832_v60 = vadd.f32 %v2418_v54, %v3220_v23  ;;  %v400_v61 = vpop.f32.mrb[33].mxu0  ;;  %v826_v62 = vpop.f32.mrb[33].mxu1 }
 0x121   :  { %v3350_v0 = vmax.f32 %v449_v46, %v875_v49  ;;  %v401_v1 = vadd.f32 %v3220_v23, %v400_v61  ;;  %v827_v3 = vadd.f32 %v3220_v23, %v826_v62 }
 0x122   :  { %v452_v4 = vmax.f32 %v406_v58, 0.0  ;;  %v878_v9 = vmax.f32 %v832_v60, 0.0 }
 0x123   :  { %v451_v10 = vmax.f32 %v401_v1, 0.0  ;;  %v877_v11 = vmax.f32 %v827_v3, 0.0  ;;  %v2359_v12 = vpop.f32.mrb[34].mxu0  ;;  %v2421_v17 = vpop.f32.mrb[34].mxu1 }
 0x124   :  { %v3354_v18 = vmax.f32 %v452_v4, %v878_v9  ;;  %v416_v19 = vadd.f32 %v2359_v12, %v3220_v23  ;;  %v842_v20 = vadd.f32 %v2421_v17, %v3220_v23  ;;  %v410_v24 = vpop.f32.mrb[35].mxu0  ;;  %v836_v25 = vpop.f32.mrb[35].mxu1 }
 0x125   :  { %v3358_v26 = vmax.f32 %v451_v10, %v877_v11  ;;  %v411_v28 = vadd.f32 %v3220_v23, %v410_v24  ;;  %v837_v30 = vadd.f32 %v3220_v23, %v836_v25 }
 0x126   :  { %v454_v32 = vmax.f32 %v416_v19, 0.0  ;;  %v880_v35 = vmax.f32 %v842_v20, 0.0 }
 0x127   :  { %v453_v37 = vmax.f32 %v411_v28, 0.0  ;;  %v879_v41 = vmax.f32 %v837_v30, 0.0  ;;  %v2432_v42 = vpop.f32.mrb[36].mxu0  ;;  %v2494_v44 = vpop.f32.mrb[36].mxu1 }
 0x128   :  { %v3362_v45 = vmax.f32 %v454_v32, %v880_v35  ;;  %v1134_v46 = vadd.f32 %v2432_v42, %v3220_v23  ;;  %v1560_v49 = vadd.f32 %v2494_v44, %v3220_v23  ;;  %v1128_v50 = vpop.f32.mrb[37].mxu0  ;;  %v1554_v54 = vpop.f32.mrb[37].mxu1 }
 0x129   :  { %v3366_v58 = vmax.f32 %v453_v37, %v879_v41  ;;  %v1129_v60 = vadd.f32 %v3220_v23, %v1128_v50  ;;  %v1555_v61 = vadd.f32 %v3220_v23, %v1554_v54 }
 0x12a   :  { %v1308_v62 = vmax.f32 %v1134_v46, 0.0  ;;  %v1734_v1 = vmax.f32 %v1560_v49, 0.0 }
 0x12b   :  { %v1307_v3 = vmax.f32 %v1129_v60, 0.0  ;;  %v1733_v4 = vmax.f32 %v1555_v61, 0.0  ;;  %v2435_v9 = vpop.f32.mrb[38].mxu0  ;;  %v2497_v10 = vpop.f32.mrb[38].mxu1 }
 0x12c   :  { %v1770_v11 = vmax.f32 %v1308_v62, %v1734_v1  ;;  %v1144_v12 = vadd.f32 %v2435_v9, %v3220_v23  ;;  %v1570_v17 = vadd.f32 %v2497_v10, %v3220_v23  ;;  %v1138_v19 = vpop.f32.mrb[39].mxu0  ;;  %v1564_v20 = vpop.f32.mrb[39].mxu1 }
 0x12d   :  { %v1769_v24 = vmax.f32 %v1307_v3, %v1733_v4  ;;  %v1139_v25 = vadd.f32 %v3220_v23, %v1138_v19  ;;  %v1565_v28 = vadd.f32 %v3220_v23, %v1564_v20 }
 0x12e   :  { %v1806_v30 = vmax.f32 %v3226_v38, %v1770_v11  ;;  %v1310_v32 = vmax.f32 %v1144_v12, 0.0  ;;  %v1736_v35 = vmax.f32 %v1570_v17, 0.0 }
 0x12f   :  { %v1805_v37 = vmax.f32 %v3230_v43, %v1769_v24  ;;  %v1309_v41 = vmax.f32 %v1139_v25, 0.0  ;;  %v1735_v42 = vmax.f32 %v1565_v28, 0.0  ;;  %v2438_v44 = vpop.f32.mrb[40].mxu0  ;;  %v2500_v46 = vpop.f32.mrb[40].mxu1 }
 0x130   :  { %1842 = vst [vmem:[%s3576_s3 + $0x8] sm:$0xff] %v1806_v30  ;;  %v1772_v49 = vmax.f32 %v1310_v32, %v1736_v35  ;;  %v1154_v50 = vadd.f32 %v2438_v44, %v3220_v23  ;;  %v1580_v54 = vadd.f32 %v2500_v46, %v3220_v23  ;;  %v1148_v60 = vpop.f32.mrb[41].mxu0  ;;  %v1574_v61 = vpop.f32.mrb[41].mxu1 }
 0x131   :  { %1841 = vst [vmem:[%s3576_s3] sm:$0xff] %v1805_v37  ;;  %v1771_v38 = vmax.f32 %v1309_v41, %v1735_v42  ;;  %v1149_v43 = vadd.f32 %v3220_v23, %v1148_v60  ;;  %v1575_v62 = vadd.f32 %v3220_v23, %v1574_v61 }
 0x132   :  { %v1808_v1 = vmax.f32 %v3234_v52, %v1772_v49  ;;  %v1312_v3 = vmax.f32 %v1154_v50, 0.0  ;;  %v1738_v4 = vmax.f32 %v1580_v54, 0.0 }
 0x133   :  { %v1807_v9 = vmax.f32 %v3238_v57, %v1771_v38  ;;  %v1311_v10 = vmax.f32 %v1149_v43, 0.0  ;;  %v1737_v11 = vmax.f32 %v1575_v62, 0.0  ;;  %v2441_v12 = vpop.f32.mrb[42].mxu0  ;;  %v2503_v17 = vpop.f32.mrb[42].mxu1 }
 0x134   :  { %1844 = vst [vmem:[%s3576_s3 + $0x18] sm:$0xff] %v1808_v1  ;;  %v1774_v19 = vmax.f32 %v1312_v3, %v1738_v4  ;;  %v1164_v20 = vadd.f32 %v2441_v12, %v3220_v23  ;;  %v1590_v24 = vadd.f32 %v2503_v17, %v3220_v23  ;;  %v1158_v25 = vpop.f32.mrb[43].mxu0  ;;  %v1584_v28 = vpop.f32.mrb[43].mxu1 }
 0x135   :  { %1843 = vst [vmem:[%s3576_s3 + $0x10] sm:$0xff] %v1807_v9  ;;  %v1773_v52 = vmax.f32 %v1311_v10, %v1737_v11  ;;  %v1159_v57 = vadd.f32 %v3220_v23, %v1158_v25  ;;  %v1585_v30 = vadd.f32 %v3220_v23, %v1584_v28 }
 0x136   :  { %v1810_v32 = vmax.f32 %v3242_v2, %v1774_v19  ;;  %v1314_v35 = vmax.f32 %v1164_v20, 0.0  ;;  %v1740_v37 = vmax.f32 %v1590_v24, 0.0 }
 0x137   :  { %v1809_v41 = vmax.f32 %v3246_v7, %v1773_v52  ;;  %v1313_v42 = vmax.f32 %v1159_v57, 0.0  ;;  %v1739_v44 = vmax.f32 %v1585_v30, 0.0  ;;  %v2444_v46 = vpop.f32.mrb[44].mxu0  ;;  %v2506_v49 = vpop.f32.mrb[44].mxu1 }
 0x138   :  { %1846 = vst [vmem:[%s3576_s3 + $0x28] sm:$0xff] %v1810_v32  ;;  %v1776_v50 = vmax.f32 %v1314_v35, %v1740_v37  ;;  %v1174_v54 = vadd.f32 %v2444_v46, %v3220_v23  ;;  %v1600_v60 = vadd.f32 %v2506_v49, %v3220_v23  ;;  %v1168_v61 = vpop.f32.mrb[45].mxu0  ;;  %v1594_v38 = vpop.f32.mrb[45].mxu1 }
 0x139   :  { %1845 = vst [vmem:[%s3576_s3 + $0x20] sm:$0xff] %v1809_v41  ;;  %v1775_v2 = vmax.f32 %v1313_v42, %v1739_v44  ;;  %v1169_v7 = vadd.f32 %v3220_v23, %v1168_v61  ;;  %v1595_v43 = vadd.f32 %v3220_v23, %v1594_v38 }
 0x13a   :  { %v1812_v62 = vmax.f32 %v3250_v16, %v1776_v50  ;;  %v1316_v1 = vmax.f32 %v1174_v54, 0.0  ;;  %v1742_v3 = vmax.f32 %v1600_v60, 0.0 }
 0x13b   :  { %v1811_v4 = vmax.f32 %v3254_v21, %v1775_v2  ;;  %v1315_v9 = vmax.f32 %v1169_v7, 0.0  ;;  %v1741_v10 = vmax.f32 %v1595_v43, 0.0  ;;  %v2447_v11 = vpop.f32.mrb[46].mxu0  ;;  %v2509_v12 = vpop.f32.mrb[46].mxu1 }
 0x13c   :  { %1848 = vst [vmem:[%s3576_s3 + $0x38] sm:$0xff] %v1812_v62  ;;  %v1778_v17 = vmax.f32 %v1316_v1, %v1742_v3  ;;  %v1184_v19 = vadd.f32 %v2447_v11, %v3220_v23  ;;  %v1610_v20 = vadd.f32 %v2509_v12, %v3220_v23  ;;  %v1178_v24 = vpop.f32.mrb[47].mxu0  ;;  %v1604_v25 = vpop.f32.mrb[47].mxu1 }
 0x13d   :  { %1847 = vst [vmem:[%s3576_s3 + $0x30] sm:$0xff] %v1811_v4  ;;  %v1777_v16 = vmax.f32 %v1315_v9, %v1741_v10  ;;  %v1179_v21 = vadd.f32 %v3220_v23, %v1178_v24  ;;  %v1605_v28 = vadd.f32 %v3220_v23, %v1604_v25 }
 0x13e   :  { %v1814_v52 = vmax.f32 %v3258_v31, %v1778_v17  ;;  %v1318_v57 = vmax.f32 %v1184_v19, 0.0  ;;  %v1744_v30 = vmax.f32 %v1610_v20, 0.0 }
 0x13f   :  { %v1813_v32 = vmax.f32 %v3262_v36, %v1777_v16  ;;  %v1317_v35 = vmax.f32 %v1179_v21, 0.0  ;;  %v1743_v37 = vmax.f32 %v1605_v28, 0.0  ;;  %v2450_v41 = vpop.f32.mrb[48].mxu0  ;;  %v2512_v42 = vpop.f32.mrb[48].mxu1 }
 0x140   :  { %1850 = vst [vmem:[%s3576_s3 + $0x48] sm:$0xff] %v1814_v52  ;;  %v1780_v44 = vmax.f32 %v1318_v57, %v1744_v30  ;;  %v1194_v46 = vadd.f32 %v2450_v41, %v3220_v23  ;;  %v1620_v49 = vadd.f32 %v2512_v42, %v3220_v23  ;;  %v1188_v50 = vpop.f32.mrb[49].mxu0  ;;  %v1614_v54 = vpop.f32.mrb[49].mxu1 }
 0x141   :  { %1849 = vst [vmem:[%s3576_s3 + $0x40] sm:$0xff] %v1813_v32  ;;  %v1779_v31 = vmax.f32 %v1317_v35, %v1743_v37  ;;  %v1189_v36 = vadd.f32 %v3220_v23, %v1188_v50  ;;  %v1615_v60 = vadd.f32 %v3220_v23, %v1614_v54 }
 0x142   :  { %v1816_v61 = vmax.f32 %v3266_v47, %v1780_v44  ;;  %v1320_v38 = vmax.f32 %v1194_v46, 0.0  ;;  %v1746_v2 = vmax.f32 %v1620_v49, 0.0 }
 0x143   :  { %v1815_v7 = vmax.f32 %v3270_v53, %v1779_v31  ;;  %v1319_v43 = vmax.f32 %v1189_v36, 0.0  ;;  %v1745_v62 = vmax.f32 %v1615_v60, 0.0  ;;  %v2453_v1 = vpop.f32.mrb[50].mxu0  ;;  %v2515_v3 = vpop.f32.mrb[50].mxu1 }
 0x144   :  { %1852 = vst [vmem:[%s3576_s3 + $0x58] sm:$0xff] %v1816_v61  ;;  %v1782_v4 = vmax.f32 %v1320_v38, %v1746_v2  ;;  %v1204_v9 = vadd.f32 %v2453_v1, %v3220_v23  ;;  %v1630_v10 = vadd.f32 %v2515_v3, %v3220_v23  ;;  %v1198_v11 = vpop.f32.mrb[51].mxu0  ;;  %v1624_v12 = vpop.f32.mrb[51].mxu1 }
 0x145   :  { %1851 = vst [vmem:[%s3576_s3 + $0x50] sm:$0xff] %v1815_v7  ;;  %v1781_v47 = vmax.f32 %v1319_v43, %v1745_v62  ;;  %v1199_v53 = vadd.f32 %v3220_v23, %v1198_v11  ;;  %v1625_v17 = vadd.f32 %v3220_v23, %v1624_v12 }
 0x146   :  { %v1818_v19 = vmax.f32 %v3274_v63, %v1782_v4  ;;  %v1322_v20 = vmax.f32 %v1204_v9, 0.0  ;;  %v1748_v24 = vmax.f32 %v1630_v10, 0.0 }
 0x147   :  { %v1817_v25 = vmax.f32 %v3278_v5, %v1781_v47  ;;  %v1321_v16 = vmax.f32 %v1199_v53, 0.0  ;;  %v1747_v21 = vmax.f32 %v1625_v17, 0.0  ;;  %v2456_v28 = vpop.f32.mrb[52].mxu0  ;;  %v2518_v52 = vpop.f32.mrb[52].mxu1 }
 0x148   :  { %1854 = vst [vmem:[%s3576_s3 + $0x68] sm:$0xff] %v1818_v19  ;;  %v1784_v57 = vmax.f32 %v1322_v20, %v1748_v24  ;;  %v1214_v30 = vadd.f32 %v2456_v28, %v3220_v23  ;;  %v1640_v32 = vadd.f32 %v2518_v52, %v3220_v23  ;;  %v1208_v35 = vpop.f32.mrb[53].mxu0  ;;  %v1634_v37 = vpop.f32.mrb[53].mxu1 }
 0x149   :  { %1853 = vst [vmem:[%s3576_s3 + $0x60] sm:$0xff] %v1817_v25  ;;  %v1783_v63 = vmax.f32 %v1321_v16, %v1747_v21  ;;  %v1209_v5 = vadd.f32 %v3220_v23, %v1208_v35  ;;  %v1635_v41 = vadd.f32 %v3220_v23, %v1634_v37 }
 0x14a   :  { %v1820_v42 = vmax.f32 %v3282_v15, %v1784_v57  ;;  %v1324_v44 = vmax.f32 %v1214_v30, 0.0  ;;  %v1750_v46 = vmax.f32 %v1640_v32, 0.0 }
 0x14b   :  { %v1819_v49 = vmax.f32 %v3286_v22, %v1783_v63  ;;  %v1323_v50 = vmax.f32 %v1209_v5, 0.0  ;;  %v1749_v54 = vmax.f32 %v1635_v41, 0.0  ;;  %v2459_v31 = vpop.f32.mrb[54].mxu0  ;;  %v2521_v36 = vpop.f32.mrb[54].mxu1 }
 0x14c   :  { %1856 = vst [vmem:[%s3576_s3 + $0x78] sm:$0xff] %v1820_v42  ;;  %v1786_v60 = vmax.f32 %v1324_v44, %v1750_v46  ;;  %v1224_v61 = vadd.f32 %v2459_v31, %v3220_v23  ;;  %v1650_v38 = vadd.f32 %v2521_v36, %v3220_v23  ;;  %v1218_v2 = vpop.f32.mrb[55].mxu0  ;;  %v1644_v7 = vpop.f32.mrb[55].mxu1 }
 0x14d   :  { %1855 = vst [vmem:[%s3576_s3 + $0x70] sm:$0xff] %v1819_v49  ;;  %v1785_v15 = vmax.f32 %v1323_v50, %v1749_v54  ;;  %v1219_v22 = vadd.f32 %v3220_v23, %v1218_v2  ;;  %v1645_v43 = vadd.f32 %v3220_v23, %v1644_v7 }
 0x14e   :  { %v1822_v62 = vmax.f32 %v3290_v33, %v1786_v60  ;;  %v1326_v1 = vmax.f32 %v1224_v61, 0.0  ;;  %v1752_v3 = vmax.f32 %v1650_v38, 0.0 }
 0x14f   :  { %v1821_v4 = vmax.f32 %v3294_v40, %v1785_v15  ;;  %v1325_v9 = vmax.f32 %v1219_v22, 0.0  ;;  %v1751_v10 = vmax.f32 %v1645_v43, 0.0  ;;  %v2462_v11 = vpop.f32.mrb[56].mxu0  ;;  %v2524_v12 = vpop.f32.mrb[56].mxu1 }
 0x150   :  { %1858 = vst [vmem:[%s3576_s3 + $0x88] sm:$0xff] %v1822_v62  ;;  %v1788_v47 = vmax.f32 %v1326_v1, %v1752_v3  ;;  %v1234_v53 = vadd.f32 %v2462_v11, %v3220_v23  ;;  %v1660_v17 = vadd.f32 %v2524_v12, %v3220_v23  ;;  %v1228_v19 = vpop.f32.mrb[57].mxu0  ;;  %v1654_v20 = vpop.f32.mrb[57].mxu1 }
 0x151   :  { %1857 = vst [vmem:[%s3576_s3 + $0x80] sm:$0xff] %v1821_v4  ;;  %v1787_v33 = vmax.f32 %v1325_v9, %v1751_v10  ;;  %v1229_v40 = vadd.f32 %v3220_v23, %v1228_v19  ;;  %v1655_v24 = vadd.f32 %v3220_v23, %v1654_v20 }
 0x152   :  { %v1824_v25 = vmax.f32 %v3298_v51, %v1788_v47  ;;  %v1328_v16 = vmax.f32 %v1234_v53, 0.0  ;;  %v1754_v21 = vmax.f32 %v1660_v17, 0.0 }
 0x153   :  { %v1823_v28 = vmax.f32 %v3302_v59, %v1787_v33  ;;  %v1327_v52 = vmax.f32 %v1229_v40, 0.0  ;;  %v1753_v57 = vmax.f32 %v1655_v24, 0.0  ;;  %v2465_v30 = vpop.f32.mrb[58].mxu0  ;;  %v2527_v32 = vpop.f32.mrb[58].mxu1 }
 0x154   :  { %1860 = vst [vmem:[%s3576_s3 + $0x98] sm:$0xff] %v1824_v25  ;;  %v1790_v35 = vmax.f32 %v1328_v16, %v1754_v21  ;;  %v1244_v37 = vadd.f32 %v2465_v30, %v3220_v23  ;;  %v1670_v63 = vadd.f32 %v2527_v32, %v3220_v23  ;;  %v1238_v5 = vpop.f32.mrb[59].mxu0  ;;  %v1664_v41 = vpop.f32.mrb[59].mxu1 }
 0x155   :  { %1859 = vst [vmem:[%s3576_s3 + $0x90] sm:$0xff] %v1823_v28  ;;  %v1789_v51 = vmax.f32 %v1327_v52, %v1753_v57  ;;  %v1239_v59 = vadd.f32 %v3220_v23, %v1238_v5  ;;  %v1665_v42 = vadd.f32 %v3220_v23, %v1664_v41 }
 0x156   :  { %v1826_v44 = vmax.f32 %v3306_v8, %v1790_v35  ;;  %v1330_v46 = vmax.f32 %v1244_v37, 0.0  ;;  %v1756_v49 = vmax.f32 %v1670_v63, 0.0 }
 0x157   :  { %v1825_v50 = vmax.f32 %v3310_v13, %v1789_v51  ;;  %v1329_v54 = vmax.f32 %v1239_v59, 0.0  ;;  %v1755_v31 = vmax.f32 %v1665_v42, 0.0  ;;  %v2468_v36 = vpop.f32.mrb[60].mxu0  ;;  %v2530_v60 = vpop.f32.mrb[60].mxu1 }
 0x158   :  { %1862 = vst [vmem:[%s3576_s3 + $0xa8] sm:$0xff] %v1826_v44  ;;  %v1792_v61 = vmax.f32 %v1330_v46, %v1756_v49  ;;  %v1254_v38 = vadd.f32 %v2468_v36, %v3220_v23  ;;  %v1680_v2 = vadd.f32 %v2530_v60, %v3220_v23  ;;  %v1248_v7 = vpop.f32.mrb[61].mxu0  ;;  %v1674_v15 = vpop.f32.mrb[61].mxu1 }
 0x159   :  { %1861 = vst [vmem:[%s3576_s3 + $0xa0] sm:$0xff] %v1825_v50  ;;  %v1791_v8 = vmax.f32 %v1329_v54, %v1755_v31  ;;  %v1249_v13 = vadd.f32 %v3220_v23, %v1248_v7  ;;  %v1675_v22 = vadd.f32 %v3220_v23, %v1674_v15  ;;  %v2587_v54 = vld [vmem:[%s3575_s2] ss:$0 sm:$0xff] }
 0x15a   :  { %v1828_v43 = vmax.f32 %v3314_v27, %v1792_v61  ;;  %v1332_v62 = vmax.f32 %v1254_v38, 0.0  ;;  %v1758_v1 = vmax.f32 %v1680_v2, 0.0 }
 0x15b   :  { %v1827_v3 = vmax.f32 %v3318_v34, %v1791_v8  ;;  %v1331_v4 = vmax.f32 %v1249_v13, 0.0  ;;  %v1757_v9 = vmax.f32 %v1675_v22, 0.0  ;;  %v2471_v10 = vpop.f32.mrb[62].mxu0  ;;  %v2533_v11 = vpop.f32.mrb[62].mxu1 }
 0x15c   :  { %1864 = vst [vmem:[%s3576_s3 + $0xb8] sm:$0xff] %v1828_v43  ;;  %v1794_v12 = vmax.f32 %v1332_v62, %v1758_v1  ;;  %v1264_v47 = vadd.f32 %v2471_v10, %v3220_v23  ;;  %v1690_v53 = vadd.f32 %v2533_v11, %v3220_v23  ;;  %v1258_v17 = vpop.f32.mrb[63].mxu0  ;;  %v1684_v19 = vpop.f32.mrb[63].mxu1 }
 0x15d   :  { %1863 = vst [vmem:[%s3576_s3 + $0xb0] sm:$0xff] %v1827_v3  ;;  %v1793_v27 = vmax.f32 %v1331_v4, %v1757_v9  ;;  %v1259_v34 = vadd.f32 %v3220_v23, %v1258_v17  ;;  %v1685_v20 = vadd.f32 %v3220_v23, %v1684_v19 }
 0x15e   :  { %v1830_v33 = vmax.f32 %v3322_v48, %v1794_v12  ;;  %v1334_v40 = vmax.f32 %v1264_v47, 0.0  ;;  %v1760_v24 = vmax.f32 %v1690_v53, 0.0 }
 0x15f   :  { %v1829_v25 = vmax.f32 %v3326_v56, %v1793_v27  ;;  %v1333_v16 = vmax.f32 %v1259_v34, 0.0  ;;  %v1759_v21 = vmax.f32 %v1685_v20, 0.0  ;;  %v2474_v28 = vpop.f32.mrb[64].mxu0  ;;  %v2536_v52 = vpop.f32.mrb[64].mxu1 }
 0x160   :  { %1866 = vst [vmem:[%s3576_s3 + $0xc8] sm:$0xff] %v1830_v33  ;;  %v1796_v57 = vmax.f32 %v1334_v40, %v1760_v24  ;;  %v1274_v30 = vadd.f32 %v2474_v28, %v3220_v23  ;;  %v1700_v32 = vadd.f32 %v2536_v52, %v3220_v23  ;;  %v1268_v35 = vpop.f32.mrb[65].mxu0  ;;  %v1694_v37 = vpop.f32.mrb[65].mxu1 }
 0x161   :  { %1865 = vst [vmem:[%s3576_s3 + $0xc0] sm:$0xff] %v1829_v25  ;;  %v1795_v48 = vmax.f32 %v1333_v16, %v1759_v21  ;;  %v1269_v56 = vadd.f32 %v3220_v23, %v1268_v35  ;;  %v1695_v63 = vadd.f32 %v3220_v23, %v1694_v37 }
 0x162   :  { %v1832_v5 = vmax.f32 %v3330_v6, %v1796_v57  ;;  %v1336_v41 = vmax.f32 %v1274_v30, 0.0  ;;  %v1762_v51 = vmax.f32 %v1700_v32, 0.0 }
 0x163   :  { %v1831_v59 = vmax.f32 %v3334_v14, %v1795_v48  ;;  %v1335_v42 = vmax.f32 %v1269_v56, 0.0  ;;  %v1761_v44 = vmax.f32 %v1695_v63, 0.0  ;;  %v2477_v46 = vpop.f32.mrb[66].mxu0  ;;  %v2539_v49 = vpop.f32.mrb[66].mxu1 }
 0x164   :  { %1868 = vst [vmem:[%s3576_s3 + $0xd8] sm:$0xff] %v1832_v5  ;;  %v1798_v50 = vmax.f32 %v1336_v41, %v1762_v51  ;;  %v1284_v23 = vadd.f32 %v2587_v54, %v2477_v46  ;;  %v1710_v31 = vadd.f32 %v2587_v54, %v2539_v49  ;;  %v1278_v6 = vpop.f32.mrb[67].mxu0  ;;  %v1704_v36 = vpop.f32.mrb[67].mxu1 }
 0x165   :  { %1867 = vst [vmem:[%s3576_s3 + $0xd0] sm:$0xff] %v1831_v59  ;;  %v1797_v14 = vmax.f32 %v1335_v42, %v1761_v44  ;;  %v1279_v60 = vadd.f32 %v2587_v54, %v1278_v6  ;;  %v1705_v61 = vadd.f32 %v2587_v54, %v1704_v36 }
 0x166   :  { %v1834_v38 = vmax.f32 %v3338_v29, %v1798_v50  ;;  %v1338_v2 = vmax.f32 %v1284_v23, 0.0  ;;  %v1764_v7 = vmax.f32 %v1710_v31, 0.0 }
 0x167   :  { %v1833_v15 = vmax.f32 %v3342_v39, %v1797_v14  ;;  %v1337_v8 = vmax.f32 %v1279_v60, 0.0  ;;  %v1763_v13 = vmax.f32 %v1705_v61, 0.0  ;;  %v2480_v22 = vpop.f32.mrb[68].mxu0  ;;  %v2542_v43 = vpop.f32.mrb[68].mxu1 }
 0x168   :  { %1870 = vst [vmem:[%s3576_s3 + $0xe8] sm:$0xff] %v1834_v38  ;;  %v1800_v62 = vmax.f32 %v1338_v2, %v1764_v7  ;;  %v1294_v1 = vadd.f32 %v2587_v54, %v2480_v22  ;;  %v1720_v3 = vadd.f32 %v2587_v54, %v2542_v43  ;;  %v1288_v4 = vpop.f32.mrb[69].mxu0  ;;  %v1714_v9 = vpop.f32.mrb[69].mxu1 }
 0x169   :  { %1869 = vst [vmem:[%s3576_s3 + $0xe0] sm:$0xff] %v1833_v15  ;;  %v1799_v29 = vmax.f32 %v1337_v8, %v1763_v13  ;;  %v1289_v10 = vadd.f32 %v2587_v54, %v1288_v4  ;;  %v1715_v39 = vadd.f32 %v2587_v54, %v1714_v9 }
 0x16a   :  { %v1836_v11 = vmax.f32 %v3346_v55, %v1800_v62  ;;  %v1340_v12 = vmax.f32 %v1294_v1, 0.0  ;;  %v1766_v47 = vmax.f32 %v1720_v3, 0.0 }
 0x16b   :  { %v1835_v53 = vmax.f32 %v3350_v0, %v1799_v29  ;;  %v1339_v17 = vmax.f32 %v1289_v10, 0.0  ;;  %v1765_v19 = vmax.f32 %v1715_v39, 0.0  ;;  %v2483_v27 = vpop.f32.mrb[70].mxu0  ;;  %v2545_v34 = vpop.f32.mrb[70].mxu1 }
 0x16c   :  { %1872 = vst [vmem:[%s3576_s3 + $0xf8] sm:$0xff] %v1836_v11  ;;  %v1802_v20 = vmax.f32 %v1340_v12, %v1766_v47  ;;  %v1304_v33 = vadd.f32 %v2587_v54, %v2483_v27  ;;  %v1730_v40 = vadd.f32 %v2587_v54, %v2545_v34  ;;  %v1298_v24 = vpop.f32.mrb[71].mxu0  ;;  %v1724_v25 = vpop.f32.mrb[71].mxu1 }
 0x16d   :  { %1871 = vst [vmem:[%s3576_s3 + $0xf0] sm:$0xff] %v1835_v53  ;;  %v1801_v55 = vmax.f32 %v1339_v17, %v1765_v19  ;;  %v1299_v16 = vadd.f32 %v2587_v54, %v1298_v24  ;;  %v1725_v0 = vadd.f32 %v2587_v54, %v1724_v25 }
 0x16e   :  { %v1838_v21 = vmax.f32 %v3354_v18, %v1802_v20  ;;  %v1342_v28 = vmax.f32 %v1304_v33, 0.0  ;;  %v1768_v52 = vmax.f32 %v1730_v40, 0.0 }
 0x16f   :  { %v1837_v57 = vmax.f32 %v3358_v26, %v1801_v55  ;;  %v1341_v30 = vmax.f32 %v1299_v16, 0.0  ;;  %v1767_v32 = vmax.f32 %v1725_v0, 0.0 }
 0x170   :  { %1874 = vst [vmem:[%s3576_s3 + $0x108] sm:$0xff] %v1838_v21  ;;  %v1804_v35 = vmax.f32 %v1342_v28, %v1768_v52 }
 0x171   :  { %1873 = vst [vmem:[%s3576_s3 + $0x100] sm:$0xff] %v1837_v57  ;;  %v1803_v37 = vmax.f32 %v1341_v30, %v1767_v32 }
 0x172   :  { %v1840_v48 = vmax.f32 %v3362_v45, %v1804_v35 }
 0x173   :  { %v1839_v18 = vmax.f32 %v3366_v58, %v1803_v37 }
 0x174   :  { %1876 = vst [vmem:[%s3576_s3 + $0x118] sm:$0xff] %v1840_v48 }
 0x175   :  { %1875 = vst [vmem:[%s3576_s3 + $0x110] sm:$0xff] %v1839_v18 }

// kernel: lenet5_forward.4
= control target key start
LH: loop header
LB: loop body
LE: loop exit
PB: predicated region body
PF: predicated region fallthrough
CT: control target
= control target key end

     0   :  { %v659_v0 = vmov 0.0|0.0   ;;  %vm48_vm0 = vcmask 179200   ;;  %v660_v30 = vmov 0.0   ;;  %vm61_vm1 = vcmask 1045504   ;;  %s987_s1 = inlined_call_operand.vmem [shape: f32[150,128], index: 1, kind: input, shape index: {}]   ;;  %s988_s0 = inlined_call_operand.vmem [shape: f32[4,32,150], index: 0, kind: input, shape index: {}]   ;;  %s989_s2 = inlined_call_operand.vmem [shape: f32[1,128], index: 2, kind: input, shape index: {}]   ;;  %s990_s3 = inlined_call_operand.vmem [shape: f32[32,128], index: 3, kind: output, shape index: {}]  }
   0x1   :  { %549 = vmatprep.subr.bf16.mxu0 %v659_v0  ;;  %576 = vmatprep.subr.bf16.mxu1 %v659_v0  ;;  %v14_v1 = vld [vmem:[%s987_s1] sm:$0xff]  ;;  %v15_v2 = vld [vmem:[%s987_s1 + $0x8] sm:$0xff]  ;;  %v16_v3 = vld [vmem:[%s987_s1 + $0x10] sm:$0xff] }
   0x2   :  { %v692_v4 = vpack.c.bf16 %v15_v2, %v14_v1  ;;  %v17_v5 = vld [vmem:[%s987_s1 + $0x18] sm:$0xff]  ;;  %v18_v7 = vld [vmem:[%s987_s1 + $0x20] sm:$0xff]  ;;  %v19_v8 = vld [vmem:[%s987_s1 + $0x28] sm:$0xff] }
   0x3   :  { %v699_v6 = vpack.c.bf16 %v17_v5, %v16_v3  ;;  %v35_v9 = vld [vmem:[%s988_s0 + $0x8] sm:$0xff]  ;;  %v717_v11 = vpack.c.bf16 %v19_v8, %v18_v7  ;;  %v20_v12 = vld [vmem:[%s987_s1 + $0x30] sm:$0xff]  ;;  %v21_v13 = vld [vmem:[%s987_s1 + $0x38] sm:$0xff] }
   0x4   :  { %551 = vmatpush1.bf16.msra.mxu0 %v692_v4  ;;  %578 = vmatpush1.bf16.msra.mxu1 %v692_v4  ;;  %v511_v10 = vld [vmem:[%s988_s0 + $0x48] sm:$0xff]  ;;  %v731_v14 = vpack.c.bf16 %v21_v13, %v20_v12  ;;  %v22_v15 = vld [vmem:[%s987_s1 + $0x40] sm:$0xff]  ;;  %v24_v18 = vld [vmem:[%s987_s1 + $0x50] sm:$0xff] }
   0x5   :  { %552 = vmatprep.subr.bf16.mxu0 %v659_v0  ;;  %579 = vmatprep.subr.bf16.mxu1 %v659_v0  ;;  %v23_v16 = vld [vmem:[%s987_s1 + $0x48] sm:$0xff]  ;;  %v25_v19 = vld [vmem:[%s987_s1 + $0x58] sm:$0xff]  ;;  %v26_v21 = vld [vmem:[%s987_s1 + $0x60] sm:$0xff] }
   0x6   :  { %506 = vmatprep.mubr.msk.f32.mxu0 %vm48_vm0, %v35_v9  ;;  %519 = vmatprep.mubr.msk.f32.mxu1 %vm48_vm0, %v511_v10  ;;  %v743_v17 = vpack.c.bf16 %v23_v16, %v22_v15  ;;  %v755_v20 = vpack.c.bf16 %v25_v19, %v24_v18  ;;  %v27_v22 = vld [vmem:[%s987_s1 + $0x68] sm:$0xff]  ;;  %v28_v24 = vld [vmem:[%s987_s1 + $0x70] sm:$0xff]  ;;  %v29_v25 = vld [vmem:[%s987_s1 + $0x78] sm:$0xff] }
   0x7   :  { %v767_v23 = vpack.c.bf16 %v27_v22, %v26_v21  ;;  %v779_v26 = vpack.c.bf16 %v29_v25, %v28_v24  ;;  %v30_v27 = vld [vmem:[%s987_s1 + $0x80] sm:$0xff]  ;;  %v31_v28 = vld [vmem:[%s987_s1 + $0x88] sm:$0xff]  ;;  %v802_v31 = vld [vmem:[%s987_s1 + $0x90] sm:$0x3f] }
   0x8   :  { %554 = vmatpush1.bf16.msra.mxu0 %v699_v6  ;;  %581 = vmatpush1.bf16.msra.mxu1 %v699_v6  ;;  %v791_v29 = vpack.c.bf16 %v31_v28, %v30_v27  ;;  %v34_v32 = vld [vmem:[%s988_s0] sm:$0xff]  ;;  %v37_v34 = vld [vmem:[%s988_s0 + $0x18] sm:$0xff]  ;;  %v36_v36 = vld [vmem:[%s988_s0 + $0x10] sm:$0xff] }
   0x9   :  { %555 = vmatprep.subr.bf16.mxu0 %v659_v0  ;;  %582 = vmatprep.subr.bf16.mxu1 %v659_v0  ;;  %v510_v33 = vld [vmem:[%s988_s0 + $0x40] sm:$0xff]  ;;  %v513_v35 = vld [vmem:[%s988_s0 + $0x58] sm:$0xff]  ;;  %v512_v37 = vld [vmem:[%s988_s0 + $0x50] sm:$0xff] }
   0xa   :  { %v39_v38 = vld [vmem:[%s988_s0 + $0x28] sm:$0xff]  ;;  %v38_v40 = vld [vmem:[%s988_s0 + $0x20] sm:$0xff]  ;;  %v41_v42 = vld [vmem:[%s988_s0 + $0x38] sm:$0xff] }
   0xb   :  { %v515_v39 = vld [vmem:[%s988_s0 + $0x68] sm:$0xff]  ;;  %v514_v41 = vld [vmem:[%s988_s0 + $0x60] sm:$0xff]  ;;  %v517_v43 = vld [vmem:[%s988_s0 + $0x78] sm:$0xff] }
   0xc   :  { %557 = vmatpush1.bf16.msra.mxu0 %v717_v11  ;;  %584 = vmatpush1.bf16.msra.mxu1 %v717_v11  ;;  %v40_v44 = vld [vmem:[%s988_s0 + $0x30] sm:$0xff]  ;;  %v524_v46 = vld [vmem:[%s988_s0 + $0x88] sm:$0xff]  ;;  %v523_v48 = vld [vmem:[%s988_s0 + $0x80] sm:$0xff] }
   0xd   :  { %558 = vmatprep.subr.bf16.mxu0 %v659_v0  ;;  %585 = vmatprep.subr.bf16.mxu1 %v659_v0  ;;  %v516_v45 = vld [vmem:[%s988_s0 + $0x70] sm:$0xff]  ;;  %v537_v47 = vld [vmem:[%s988_s0 + $0xc8] sm:$0xff]  ;;  %v536_v49 = vld [vmem:[%s988_s0 + $0xc0] sm:$0xff] }
   0xe   :  { %v526_v50 = vld [vmem:[%s988_s0 + $0x98] sm:$0xff]  ;;  %v525_v52 = vld [vmem:[%s988_s0 + $0x90] sm:$0xff]  ;;  %v528_v54 = vld [vmem:[%s988_s0 + $0xa8] sm:$0xff] }
   0xf   :  { %v539_v51 = vld [vmem:[%s988_s0 + $0xd8] sm:$0xff]  ;;  %v538_v53 = vld [vmem:[%s988_s0 + $0xd0] sm:$0xff]  ;;  %v541_v55 = vld [vmem:[%s988_s0 + $0xe8] sm:$0xff] }
  0x10   :  { %560 = vmatpush1.bf16.msra.mxu0 %v731_v14  ;;  %587 = vmatpush1.bf16.msra.mxu1 %v731_v14  ;;  %v527_v56 = vld [vmem:[%s988_s0 + $0xa0] sm:$0xff]  ;;  %v530_v58 = vld [vmem:[%s988_s0 + $0xb8] sm:$0xff]  ;;  %v529_v60 = vld [vmem:[%s988_s0 + $0xb0] sm:$0xff] }
  0x11   :  { %561 = vmatprep.subr.bf16.mxu0 %v659_v0  ;;  %588 = vmatprep.subr.bf16.mxu1 %v659_v0  ;;  %v540_v57 = vld [vmem:[%s988_s0 + $0xe0] sm:$0xff]  ;;  %v543_v59 = vld [vmem:[%s988_s0 + $0xf8] sm:$0xff]  ;;  %v542_v61 = vld [vmem:[%s988_s0 + $0xf0] sm:$0xff] }
  0x12   :  { %v957_v62 = vld [vmem:[%s989_s2] ss:$0 sm:$0xff] }
  0x14   :  { %563 = vmatpush1.bf16.msra.mxu0 %v743_v17  ;;  %590 = vmatpush1.bf16.msra.mxu1 %v743_v17 }
  0x15   :  { %564 = vmatprep.subr.bf16.mxu0 %v659_v0  ;;  %591 = vmatprep.subr.bf16.mxu1 %v659_v0 }
  0x18   :  { %566 = vmatpush1.bf16.msra.mxu0 %v755_v20  ;;  %593 = vmatpush1.bf16.msra.mxu1 %v755_v20 }
  0x19   :  { %567 = vmatprep.subr.bf16.mxu0 %v659_v0  ;;  %594 = vmatprep.subr.bf16.mxu1 %v659_v0 }
  0x1c   :  { %569 = vmatpush1.bf16.msra.mxu0 %v767_v23  ;;  %596 = vmatpush1.bf16.msra.mxu1 %v767_v23 }
  0x1d   :  { %570 = vmatprep.subr.bf16.mxu0 %v659_v0  ;;  %597 = vmatprep.subr.bf16.mxu1 %v659_v0 }
  0x20   :  { %572 = vmatpush1.bf16.msra.mxu0 %v779_v26  ;;  %599 = vmatpush1.bf16.msra.mxu1 %v779_v26 }
  0x21   :  { %573 = vmatprep.subr.bf16.mxu0 %v659_v0  ;;  %600 = vmatprep.subr.bf16.mxu1 %v659_v0 }
  0x24   :  { %575 = vmatpush1.bf16.msra.mxu0 %v791_v29  ;;  %602 = vmatpush1.bf16.msra.mxu1 %v791_v29 }
  0x25   :  { %101 = vmatprep.subr.mxu0 %v660_v30  ;;  %211 = vmatprep.subr.mxu1 %v660_v30 }
  0x28   :  { %505 = vmatpush1.msk.msra.mxu0 %vm61_vm1, %v802_v31  ;;  %518 = vmatpush1.msk.msra.mxu1 %vm61_vm1, %v802_v31 }
  0x29   :  { %130 = vmatmul.mubr.f32.vlgmr.msra.gmra.mrb[0].mxu0 %v34_v32  ;;  %240 = vmatmul.mubr.f32.vlgmr.msra.gmra.mrb[0].mxu1 %v510_v33 }
  0x2a   :  { %603 = vmatprep.subr.bf16.mxu0 %v659_v0  ;;  %630 = vmatprep.subr.bf16.mxu1 %v659_v0 }
  0x2b   :  { %605 = vmatpush1.bf16.msra.mxu0 %v692_v4  ;;  %632 = vmatpush1.bf16.msra.mxu1 %v692_v4 }
  0x2c   :  { %606 = vmatprep.subr.bf16.mxu0 %v659_v0  ;;  %633 = vmatprep.subr.bf16.mxu1 %v659_v0 }
  0x2d   :  { %507 = vmatprep.mubr.msk.f32.mxu0 %vm48_vm0, %v37_v34  ;;  %520 = vmatprep.mubr.msk.f32.mxu1 %vm48_vm0, %v513_v35 }
  0x2e   :  { %135 = vmatmul.mubr.f32.gmra.mrb[2].mxu0 %v36_v36  ;;  %245 = vmatmul.mubr.f32.gmra.mrb[2].mxu1 %v512_v37 }
  0x2f   :  { %608 = vmatpush1.bf16.msra.mxu0 %v699_v6  ;;  %635 = vmatpush1.bf16.msra.mxu1 %v699_v6 }
  0x30   :  { %609 = vmatprep.subr.bf16.mxu0 %v659_v0  ;;  %636 = vmatprep.subr.bf16.mxu1 %v659_v0 }
  0x31   :  { %508 = vmatprep.mubr.msk.f32.mxu0 %vm48_vm0, %v39_v38  ;;  %521 = vmatprep.mubr.msk.f32.mxu1 %vm48_vm0, %v515_v39 }
  0x32   :  { %140 = vmatmul.mubr.f32.gmra.mrb[4].mxu0 %v38_v40  ;;  %250 = vmatmul.mubr.f32.gmra.mrb[4].mxu1 %v514_v41 }
  0x33   :  { %611 = vmatpush1.bf16.msra.mxu0 %v717_v11  ;;  %638 = vmatpush1.bf16.msra.mxu1 %v717_v11 }
  0x34   :  { %612 = vmatprep.subr.bf16.mxu0 %v659_v0  ;;  %639 = vmatprep.subr.bf16.mxu1 %v659_v0 }
  0x35   :  { %509 = vmatprep.mubr.msk.f32.mxu0 %vm48_vm0, %v41_v42  ;;  %522 = vmatprep.mubr.msk.f32.mxu1 %vm48_vm0, %v517_v43 }
  0x36   :  { %145 = vmatmul.mubr.f32.gmra.mrb[6].mxu0 %v40_v44  ;;  %255 = vmatmul.mubr.f32.gmra.mrb[6].mxu1 %v516_v45 }
  0x37   :  { %614 = vmatpush1.bf16.msra.mxu0 %v731_v14  ;;  %641 = vmatpush1.bf16.msra.mxu1 %v731_v14 }
  0x38   :  { %615 = vmatprep.subr.bf16.mxu0 %v659_v0  ;;  %642 = vmatprep.subr.bf16.mxu1 %v659_v0 }
  0x39   :  { %532 = vmatprep.mubr.msk.f32.mxu0 %vm48_vm0, %v524_v46  ;;  %545 = vmatprep.mubr.msk.f32.mxu1 %vm48_vm0, %v537_v47 }
  0x3b   :  { %617 = vmatpush1.bf16.msra.mxu0 %v743_v17  ;;  %644 = vmatpush1.bf16.msra.mxu1 %v743_v17 }
  0x3c   :  { %618 = vmatprep.subr.bf16.mxu0 %v659_v0  ;;  %645 = vmatprep.subr.bf16.mxu1 %v659_v0 }
  0x3f   :  { %620 = vmatpush1.bf16.msra.mxu0 %v755_v20  ;;  %647 = vmatpush1.bf16.msra.mxu1 %v755_v20 }
  0x40   :  { %621 = vmatprep.subr.bf16.mxu0 %v659_v0  ;;  %648 = vmatprep.subr.bf16.mxu1 %v659_v0 }
  0x43   :  { %623 = vmatpush1.bf16.msra.mxu0 %v767_v23  ;;  %650 = vmatpush1.bf16.msra.mxu1 %v767_v23 }
  0x44   :  { %624 = vmatprep.subr.bf16.mxu0 %v659_v0  ;;  %651 = vmatprep.subr.bf16.mxu1 %v659_v0 }
  0x47   :  { %626 = vmatpush1.bf16.msra.mxu0 %v779_v26  ;;  %653 = vmatpush1.bf16.msra.mxu1 %v779_v26 }
  0x48   :  { %627 = vmatprep.subr.bf16.mxu0 %v659_v0  ;;  %654 = vmatprep.subr.bf16.mxu1 %v659_v0 }
  0x4b   :  { %629 = vmatpush1.bf16.msra.mxu0 %v791_v29  ;;  %656 = vmatpush1.bf16.msra.mxu1 %v791_v29 }
  0x4c   :  { %325 = vmatprep.subr.mxu0 %v660_v30  ;;  %435 = vmatprep.subr.mxu1 %v660_v30 }
  0x4f   :  { %531 = vmatpush1.msk.msra.mxu0 %vm61_vm1, %v802_v31  ;;  %544 = vmatpush1.msk.msra.mxu1 %vm61_vm1, %v802_v31 }
  0x50   :  { %354 = vmatmul.mubr.f32.vlgmr.msra.gmra.mrb[8].mxu0 %v523_v48  ;;  %464 = vmatmul.mubr.f32.vlgmr.msra.gmra.mrb[8].mxu1 %v536_v49 }
  0x51   :  { %533 = vmatprep.mubr.msk.f32.mxu0 %vm48_vm0, %v526_v50  ;;  %546 = vmatprep.mubr.msk.f32.mxu1 %vm48_vm0, %v539_v51 }
  0x54   :  { %359 = vmatmul.mubr.f32.gmra.mrb[10].mxu0 %v525_v52  ;;  %469 = vmatmul.mubr.f32.gmra.mrb[10].mxu1 %v538_v53 }
  0x55   :  { %534 = vmatprep.mubr.msk.f32.mxu0 %vm48_vm0, %v528_v54  ;;  %547 = vmatprep.mubr.msk.f32.mxu1 %vm48_vm0, %v541_v55 }
  0x58   :  { %364 = vmatmul.mubr.f32.gmra.mrb[12].mxu0 %v527_v56  ;;  %474 = vmatmul.mubr.f32.gmra.mrb[12].mxu1 %v540_v57 }
  0x59   :  { %535 = vmatprep.mubr.msk.f32.mxu0 %vm48_vm0, %v530_v58  ;;  %548 = vmatprep.mubr.msk.f32.mxu1 %vm48_vm0, %v543_v59 }
  0x5c   :  { %369 = vmatmul.mubr.f32.gmra.mrb[14].mxu0 %v529_v60  ;;  %479 = vmatmul.mubr.f32.gmra.mrb[14].mxu1 %v542_v61 }
  0xfc   :  { %v131_v63 = vpop.f32.mrb[0].mxu0  ;;  %v241_v0 = vpop.f32.mrb[0].mxu1 }
  0xfd   :  { %v132_v1 = vadd.f32 %v957_v62, %v131_v63  ;;  %v242_v2 = vadd.f32 %v957_v62, %v241_v0  ;;  %v133_v3 = vpop.f32.mrb[1].mxu0  ;;  %v243_v4 = vpop.f32.mrb[1].mxu1 }
  0xff   :  { %v150_v5 = vmax.f32 %v132_v1, 0.0  ;;  %v260_v6 = vmax.f32 %v242_v2, 0.0 }
 0x101   :  { %v264_v7 = vmax.f32 %v150_v5, %v260_v6  ;;  %v136_v8 = vpop.f32.mrb[2].mxu0  ;;  %v246_v9 = vpop.f32.mrb[2].mxu1 }
 0x102   :  { %v137_v10 = vadd.f32 %v957_v62, %v136_v8  ;;  %v247_v11 = vadd.f32 %v957_v62, %v246_v9  ;;  %v138_v12 = vpop.f32.mrb[3].mxu0  ;;  %v248_v13 = vpop.f32.mrb[3].mxu1 }
 0x104   :  { %v151_v14 = vmax.f32 %v137_v10, 0.0  ;;  %v261_v15 = vmax.f32 %v247_v11, 0.0 }
 0x105   :  { %v141_v16 = vpop.f32.mrb[4].mxu0  ;;  %v251_v17 = vpop.f32.mrb[4].mxu1 }
 0x106   :  { %v265_v18 = vmax.f32 %v151_v14, %v261_v15  ;;  %v142_v19 = vadd.f32 %v957_v62, %v141_v16  ;;  %v252_v20 = vadd.f32 %v957_v62, %v251_v17  ;;  %v143_v21 = vpop.f32.mrb[5].mxu0  ;;  %v253_v22 = vpop.f32.mrb[5].mxu1 }
 0x108   :  { %v152_v23 = vmax.f32 %v142_v19, 0.0  ;;  %v262_v24 = vmax.f32 %v252_v20, 0.0 }
 0x109   :  { %v146_v25 = vpop.f32.mrb[6].mxu0  ;;  %v256_v26 = vpop.f32.mrb[6].mxu1 }
 0x10a   :  { %v266_v27 = vmax.f32 %v152_v23, %v262_v24  ;;  %v147_v28 = vadd.f32 %v957_v62, %v146_v25  ;;  %v257_v29 = vadd.f32 %v957_v62, %v256_v26  ;;  %v148_v30 = vpop.f32.mrb[7].mxu0  ;;  %v258_v31 = vpop.f32.mrb[7].mxu1 }
 0x10c   :  { %v153_v32 = vmax.f32 %v147_v28, 0.0  ;;  %v263_v33 = vmax.f32 %v257_v29, 0.0 }
 0x10e   :  { %v267_v34 = vmax.f32 %v153_v32, %v263_v33 }
 0x123   :  { %v355_v35 = vpop.f32.mrb[8].mxu0  ;;  %v465_v36 = vpop.f32.mrb[8].mxu1 }
 0x124   :  { %v356_v37 = vadd.f32 %v957_v62, %v355_v35  ;;  %v466_v38 = vadd.f32 %v957_v62, %v465_v36  ;;  %v357_v39 = vpop.f32.mrb[9].mxu0  ;;  %v467_v40 = vpop.f32.mrb[9].mxu1 }
 0x126   :  { %v374_v41 = vmax.f32 %v356_v37, 0.0  ;;  %v484_v42 = vmax.f32 %v466_v38, 0.0 }
 0x127   :  { %v360_v43 = vpop.f32.mrb[10].mxu0  ;;  %v470_v44 = vpop.f32.mrb[10].mxu1 }
 0x128   :  { %v488_v45 = vmax.f32 %v374_v41, %v484_v42  ;;  %v361_v46 = vadd.f32 %v957_v62, %v360_v43  ;;  %v471_v47 = vadd.f32 %v957_v62, %v470_v44  ;;  %v362_v48 = vpop.f32.mrb[11].mxu0  ;;  %v472_v49 = vpop.f32.mrb[11].mxu1 }
 0x12a   :  { %v492_v50 = vmax.f32 %v264_v7, %v488_v45  ;;  %v375_v51 = vmax.f32 %v361_v46, 0.0  ;;  %v485_v52 = vmax.f32 %v471_v47, 0.0 }
 0x12b   :  { %v365_v53 = vpop.f32.mrb[12].mxu0  ;;  %v475_v54 = vpop.f32.mrb[12].mxu1 }
 0x12c   :  { %496 = vst [vmem:[%s990_s3] sm:$0xff] %v492_v50  ;;  %v489_v55 = vmax.f32 %v375_v51, %v485_v52  ;;  %v366_v56 = vadd.f32 %v957_v62, %v365_v53  ;;  %v476_v57 = vadd.f32 %v957_v62, %v475_v54  ;;  %v367_v58 = vpop.f32.mrb[13].mxu0  ;;  %v477_v59 = vpop.f32.mrb[13].mxu1 }
 0x12e   :  { %v493_v60 = vmax.f32 %v265_v18, %v489_v55  ;;  %v376_v61 = vmax.f32 %v366_v56, 0.0  ;;  %v486_v63 = vmax.f32 %v476_v57, 0.0 }
 0x12f   :  { %v370_v0 = vpop.f32.mrb[14].mxu0  ;;  %v480_v1 = vpop.f32.mrb[14].mxu1 }
 0x130   :  { %497 = vst [vmem:[%s990_s3 + $0x8] sm:$0xff] %v493_v60  ;;  %v490_v2 = vmax.f32 %v376_v61, %v486_v63  ;;  %v371_v3 = vadd.f32 %v957_v62, %v370_v0  ;;  %v481_v4 = vadd.f32 %v957_v62, %v480_v1  ;;  %v372_v5 = vpop.f32.mrb[15].mxu0  ;;  %v482_v6 = vpop.f32.mrb[15].mxu1 }
 0x132   :  { %v494_v7 = vmax.f32 %v266_v27, %v490_v2  ;;  %v377_v8 = vmax.f32 %v371_v3, 0.0  ;;  %v487_v9 = vmax.f32 %v481_v4, 0.0 }
 0x134   :  { %498 = vst [vmem:[%s990_s3 + $0x10] sm:$0xff] %v494_v7  ;;  %v491_v10 = vmax.f32 %v377_v8, %v487_v9 }
 0x136   :  { %v495_v11 = vmax.f32 %v267_v34, %v491_v10 }
 0x138   :  { %499 = vst [vmem:[%s990_s3 + $0x18] sm:$0xff] %v495_v11 }

// kernel: lenet5_forward.5
= control target key start
LH: loop header
LB: loop body
LE: loop exit
PB: predicated region body
PF: predicated region fallthrough
CT: control target
= control target key end

     0   :  { %v1869_v47 = vmov 1983009808   ;;  %v302_v49 = vlaneseq  ;;  %s2867_s0 = inlined_call_operand.vmem [shape: f32[2,2048], index: 0, kind: input, shape index: {}]   ;;  %s2868_s1 = inlined_call_operand.vmem [shape: f32[2048,128], index: 1, kind: input, shape index: {}]   ;;  %s2869_s2 = inlined_call_operand.vmem [shape: f32[1,128], index: 2, kind: input, shape index: {}]   ;;  %s2870_s3 = inlined_call_operand.vmem [shape: f32[128,128], index: 3, kind: input, shape index: {}]   ;;  %s2871_s4 = inlined_call_operand.vmem [shape: f32[1,128], index: 4, kind: input, shape index: {}]   ;;  %s2872_s5 = inlined_call_operand.vmem [shape: f32[128,128], index: 5, kind: input, shape index: {}]   ;;  %s2873_s6 = inlined_call_operand.vmem [shape: f32[1,128], index: 6, kind: input, shape index: {}]   ;;  %s2874_s7 = inlined_call_operand.hbm [shape: f32[2,128], index: 7, kind: output, shape index: {}]  }
   0x1   :  { %v47_v0 = vld [vmem:[%s2868_s1 + $0x80] sm:$0xff]  ;;  %v48_v1 = vld [vmem:[%s2868_s1 + $0x88] sm:$0xff]  ;;  %v49_v11 = vld [vmem:[%s2868_s1 + $0x90] sm:$0xff]  ;;  %v300_v48 = vunpack.c.l.s4 %v1869_v47 }
   0x2   :  { %v31_v2 = vld [vmem:[%s2868_s1] sm:$0xff]  ;;  %v1532_v3 = vpack.c.bf16 %v48_v1, %v47_v0  ;;  %v32_v4 = vld [vmem:[%s2868_s1 + $0x8] sm:$0xff]  ;;  %v50_v13 = vld [vmem:[%s2868_s1 + $0x98] sm:$0xff]  ;;  %v303_v0 = vshrl.u32 %v302_v49, 7 }
   0x3   :  { %v79_v5 = vld [vmem:[%s2868_s1 + $0x180] sm:$0xff]  ;;  %v80_v6 = vld [vmem:[%s2868_s1 + $0x188] sm:$0xff]  ;;  %v1534_v7 = vpack.c.bf16 %v32_v4, %v31_v2  ;;  %v33_v14 = vld [vmem:[%s2868_s1 + $0x10] sm:$0xff]  ;;  %v1536_v16 = vpack.c.bf16 %v50_v13, %v49_v11  ;;  %v301_v63 = vunpack.c.0.s8 %v300_v48 }
   0x4   :  { %v1564_v8 = vpack.c.bf16 %v80_v6, %v79_v5  ;;  %v63_v9 = vld [vmem:[%s2868_s1 + $0x100] sm:$0xff]  ;;  %v64_v10 = vld [vmem:[%s2868_s1 + $0x108] sm:$0xff]  ;;  %1533 = vmatprep.subr.bf16.mxu0 %v1532_v3  ;;  %v34_v15 = vld [vmem:[%s2868_s1 + $0x18] sm:$0xff] }
   0x5   :  { %v1566_v12 = vpack.c.bf16 %v64_v10, %v63_v9  ;;  %1535 = vmatpush3.bf16.msra.mxu0 %v1534_v7  ;;  %v1538_v17 = vpack.c.bf16 %v34_v15, %v33_v14  ;;  %v81_v18 = vld [vmem:[%s2868_s1 + $0x190] sm:$0xff]  ;;  %v82_v19 = vld [vmem:[%s2868_s1 + $0x198] sm:$0xff]  ;;  %v51_v23 = vld [vmem:[%s2868_s1 + $0xa0] sm:$0xff]  ;;  %v2064_v13 = vsub.s32 %v301_v63, %v303_v0 }
   0x6   :  { %1565 = vmatprep.subr.bf16.mxu1 %v1564_v8  ;;  %v65_v20 = vld [vmem:[%s2868_s1 + $0x110] sm:$0xff]  ;;  %v1568_v21 = vpack.c.bf16 %v82_v19, %v81_v18  ;;  %v66_v22 = vld [vmem:[%s2868_s1 + $0x118] sm:$0xff]  ;;  %v52_v24 = vld [vmem:[%s2868_s1 + $0xa8] sm:$0xff]  ;;  %1537 = vmatprep.subr.bf16.mxu0 %v1536_v16 }
   0x7   :  { %1567 = vmatpush3.bf16.msra.mxu1 %v1566_v12  ;;  %v1570_v25 = vpack.c.bf16 %v66_v22, %v65_v20  ;;  %v1540_v26 = vpack.c.bf16 %v52_v24, %v51_v23  ;;  %v35_v27 = vld [vmem:[%s2868_s1 + $0x20] sm:$0xff]  ;;  %v36_v28 = vld [vmem:[%s2868_s1 + $0x28] sm:$0xff]  ;;  %v53_v35 = vld [vmem:[%s2868_s1 + $0xb0] sm:$0xff] }
   0x8   :  { %v83_v29 = vld [vmem:[%s2868_s1 + $0x1a0] sm:$0xff]  ;;  %1569 = vmatprep.subr.bf16.mxu1 %v1568_v21  ;;  %v84_v30 = vld [vmem:[%s2868_s1 + $0x1a8] sm:$0xff]  ;;  %v1542_v33 = vpack.c.bf16 %v36_v28, %v35_v27  ;;  %v54_v36 = vld [vmem:[%s2868_s1 + $0xb8] sm:$0xff] }
   0x9   :  { %v67_v31 = vld [vmem:[%s2868_s1 + $0x120] sm:$0xff]  ;;  %v68_v32 = vld [vmem:[%s2868_s1 + $0x128] sm:$0xff]  ;;  %1539 = vmatpush3.bf16.msra.mxu0 %v1538_v17  ;;  %v1572_v34 = vpack.c.bf16 %v84_v30, %v83_v29  ;;  %v37_v37 = vld [vmem:[%s2868_s1 + $0x30] sm:$0xff]  ;;  %v1544_v39 = vpack.c.bf16 %v54_v36, %v53_v35 }
   0xa   :  { %1541 = vmatprep.subr.bf16.mxu0 %v1540_v26  ;;  %v1574_v38 = vpack.c.bf16 %v68_v32, %v67_v31  ;;  %v38_v40 = vld [vmem:[%s2868_s1 + $0x38] sm:$0xff]  ;;  %v85_v41 = vld [vmem:[%s2868_s1 + $0x1b0] sm:$0xff]  ;;  %v55_v46 = vld [vmem:[%s2868_s1 + $0xc0] sm:$0xff] }
   0xb   :  { %1571 = vmatpush3.bf16.msra.mxu1 %v1570_v25  ;;  %v86_v42 = vld [vmem:[%s2868_s1 + $0x1b8] sm:$0xff]  ;;  %v69_v44 = vld [vmem:[%s2868_s1 + $0x130] sm:$0xff]  ;;  %v56_v50 = vld [vmem:[%s2868_s1 + $0xc8] sm:$0xff]  ;;  %v1546_v51 = vpack.c.bf16 %v38_v40, %v37_v37 }
   0xc   :  { %1573 = vmatprep.subr.bf16.mxu1 %v1572_v34  ;;  %v1576_v43 = vpack.c.bf16 %v86_v42, %v85_v41  ;;  %v70_v45 = vld [vmem:[%s2868_s1 + $0x138] sm:$0xff]  ;;  %v87_v52 = vld [vmem:[%s2868_s1 + $0x1c0] sm:$0xff]  ;;  %v88_v53 = vld [vmem:[%s2868_s1 + $0x1c8] sm:$0xff]  ;;  %v1548_v55 = vpack.c.bf16 %v56_v50, %v55_v46 }
   0xd   :  { %1543 = vmatpush3.bf16.msra.mxu0 %v1542_v33  ;;  %v1578_v54 = vpack.c.bf16 %v70_v45, %v69_v44  ;;  %v39_v56 = vld [vmem:[%s2868_s1 + $0x40] sm:$0xff]  ;;  %v40_v57 = vld [vmem:[%s2868_s1 + $0x48] sm:$0xff]  ;;  %v1580_v59 = vpack.c.bf16 %v88_v53, %v87_v52  ;;  %v57_v61 = vld [vmem:[%s2868_s1 + $0xd0] sm:$0xff] }
   0xe   :  { %1545 = vmatprep.subr.bf16.mxu0 %v1544_v39  ;;  %v71_v58 = vld [vmem:[%s2868_s1 + $0x140] sm:$0xff]  ;;  %v72_v60 = vld [vmem:[%s2868_s1 + $0x148] sm:$0xff]  ;;  %v58_v62 = vld [vmem:[%s2868_s1 + $0xd8] sm:$0xff]  ;;  %v1550_v3 = vpack.c.bf16 %v40_v57, %v39_v56 }
   0xf   :  { %1575 = vmatpush3.bf16.msra.mxu1 %v1574_v38  ;;  %v89_v1 = vld [vmem:[%s2868_s1 + $0x1d0] sm:$0xff]  ;;  %v90_v2 = vld [vmem:[%s2868_s1 + $0x1d8] sm:$0xff]  ;;  %v1582_v4 = vpack.c.bf16 %v72_v60, %v71_v58  ;;  %v1552_v5 = vpack.c.bf16 %v58_v62, %v57_v61  ;;  %v59_v11 = vld [vmem:[%s2868_s1 + $0xe0] sm:$0xff] }
  0x10   :  { %1577 = vmatprep.subr.bf16.mxu1 %v1576_v43  ;;  %v41_v6 = vld [vmem:[%s2868_s1 + $0x50] sm:$0xff]  ;;  %v42_v7 = vld [vmem:[%s2868_s1 + $0x58] sm:$0xff]  ;;  %v1584_v9 = vpack.c.bf16 %v90_v2, %v89_v1  ;;  %v60_v12 = vld [vmem:[%s2868_s1 + $0xe8] sm:$0xff] }
  0x11   :  { %1547 = vmatpush3.bf16.msra.mxu0 %v1546_v51  ;;  %v73_v8 = vld [vmem:[%s2868_s1 + $0x150] sm:$0xff]  ;;  %v74_v10 = vld [vmem:[%s2868_s1 + $0x158] sm:$0xff]  ;;  %v91_v14 = vld [vmem:[%s2868_s1 + $0x1e0] sm:$0xff]  ;;  %v1554_v16 = vpack.c.bf16 %v42_v7, %v41_v6  ;;  %v1556_v19 = vpack.c.bf16 %v60_v12, %v59_v11 }
  0x12   :  { %1549 = vmatprep.subr.bf16.mxu0 %v1548_v55  ;;  %v92_v15 = vld [vmem:[%s2868_s1 + $0x1e8] sm:$0xff]  ;;  %v43_v17 = vld [vmem:[%s2868_s1 + $0x60] sm:$0xff]  ;;  %v1586_v18 = vpack.c.bf16 %v74_v10, %v73_v8  ;;  %v61_v25 = vld [vmem:[%s2868_s1 + $0xf0] sm:$0xff] }
  0x13   :  { %1579 = vmatpush3.bf16.msra.mxu1 %v1578_v54  ;;  %v44_v20 = vld [vmem:[%s2868_s1 + $0x68] sm:$0xff]  ;;  %v75_v21 = vld [vmem:[%s2868_s1 + $0x160] sm:$0xff]  ;;  %v1588_v23 = vpack.c.bf16 %v92_v15, %v91_v14  ;;  %v62_v26 = vld [vmem:[%s2868_s1 + $0xf8] sm:$0xff] }
  0x14   :  { %1581 = vmatprep.subr.bf16.mxu1 %v1580_v59  ;;  %v27_v22 = vld [vmem:[%s2867_s0] sm:$0xff]  ;;  %v76_v24 = vld [vmem:[%s2868_s1 + $0x168] sm:$0xff]  ;;  %v93_v29 = vld [vmem:[%s2868_s1 + $0x1f0] sm:$0xff]  ;;  %v1558_v31 = vpack.c.bf16 %v44_v20, %v43_v17  ;;  %v1560_v35 = vpack.c.bf16 %v62_v26, %v61_v25 }
  0x15   :  { %1551 = vmatpush3.bf16.msra.mxu0 %v1550_v3  ;;  %v305_v27 = vrot.slane %v27_v22, %v2064_v13  ;;  %v298_v28 = vcombine.high %v27_v22, %v27_v22  ;;  %v94_v30 = vld [vmem:[%s2868_s1 + $0x1f8] sm:$0xff]  ;;  %v1590_v34 = vpack.c.bf16 %v76_v24, %v75_v21  ;;  %v45_v36 = vld [vmem:[%s2868_s1 + $0x70] sm:$0xff]  ;;  %v111_v41 = vld [vmem:[%s2868_s1 + $0x280] sm:$0xff] }
  0x16   :  { %1553 = vmatprep.subr.bf16.mxu0 %v1552_v5  ;;  %v46_v37 = vld [vmem:[%s2868_s1 + $0x78] sm:$0xff]  ;;  %v77_v38 = vld [vmem:[%s2868_s1 + $0x170] sm:$0xff]  ;;  %v1592_v39 = vpack.c.bf16 %v94_v30, %v93_v29  ;;  %v112_v42 = vld [vmem:[%s2868_s1 + $0x288] sm:$0xff] }
  0x17   :  { %1583 = vmatpush3.bf16.msra.mxu1 %v1582_v4  ;;  %v313_v32 = vcombine.high %v305_v27, %v305_v27  ;;  %v312_v33 = vrot.slane %v298_v28, %v2064_v13  ;;  %v78_v40 = vld [vmem:[%s2868_s1 + $0x178] sm:$0xff]  ;;  %v143_v44 = vld [vmem:[%s2868_s1 + $0x380] sm:$0xff]  ;;  %v144_v45 = vld [vmem:[%s2868_s1 + $0x388] sm:$0xff]  ;;  %v1562_v46 = vpack.c.bf16 %v46_v37, %v45_v36  ;;  %v1596_v48 = vpack.c.bf16 %v112_v42, %v111_v41 }
  0x18   :  { %1585 = vmatprep.subr.bf16.mxu1 %v1584_v9  ;;  %v1594_v47 = vpack.c.bf16 %v78_v40, %v77_v38  ;;  %v95_v49 = vld [vmem:[%s2868_s1 + $0x200] sm:$0xff]  ;;  %v96_v50 = vld [vmem:[%s2868_s1 + $0x208] sm:$0xff]  ;;  %v1628_v52 = vpack.c.bf16 %v144_v45, %v143_v44  ;;  %v113_v54 = vld [vmem:[%s2868_s1 + $0x290] sm:$0xff] }
  0x19   :  { %1555 = vmatpush3.bf16.msra.mxu0 %v1554_v16  ;;  %446 = vmatprep.mubr.f32.mxu0 %v313_v32  ;;  %v314_v43 = vcombine.high %v312_v33, %v312_v33  ;;  %v127_v51 = vld [vmem:[%s2868_s1 + $0x300] sm:$0xff]  ;;  %v128_v53 = vld [vmem:[%s2868_s1 + $0x308] sm:$0xff]  ;;  %v114_v55 = vld [vmem:[%s2868_s1 + $0x298] sm:$0xff]  ;;  %v1598_v58 = vpack.c.bf16 %v96_v50, %v95_v49 }
  0x1a   :  { %1557 = vmatprep.subr.bf16.mxu0 %v1556_v19  ;;  %v145_v56 = vld [vmem:[%s2868_s1 + $0x390] sm:$0xff]  ;;  %v146_v57 = vld [vmem:[%s2868_s1 + $0x398] sm:$0xff]  ;;  %v1630_v59 = vpack.c.bf16 %v128_v53, %v127_v51  ;;  %v1600_v60 = vpack.c.bf16 %v114_v55, %v113_v54  ;;  %v115_v2 = vld [vmem:[%s2868_s1 + $0x2a0] sm:$0xff] }
  0x1b   :  { %1587 = vmatpush3.bf16.msra.mxu1 %v1586_v18  ;;  %516 = vmatprep.mubr.f32.mxu1 %v314_v43  ;;  %v97_v61 = vld [vmem:[%s2868_s1 + $0x210] sm:$0xff]  ;;  %v98_v62 = vld [vmem:[%s2868_s1 + $0x218] sm:$0xff]  ;;  %v1632_v0 = vpack.c.bf16 %v146_v57, %v145_v56  ;;  %v116_v3 = vld [vmem:[%s2868_s1 + $0x2a8] sm:$0xff] }
  0x1c   :  { %1589 = vmatprep.subr.bf16.mxu1 %v1588_v23  ;;  %v129_v63 = vld [vmem:[%s2868_s1 + $0x310] sm:$0xff]  ;;  %v130_v1 = vld [vmem:[%s2868_s1 + $0x318] sm:$0xff]  ;;  %v147_v4 = vld [vmem:[%s2868_s1 + $0x3a0] sm:$0xff]  ;;  %v1602_v6 = vpack.c.bf16 %v98_v62, %v97_v61  ;;  %v1604_v8 = vpack.c.bf16 %v116_v3, %v115_v2 }
  0x1d   :  { %1559 = vmatpush3.bf16.msra.mxu0 %v1558_v31  ;;  %v148_v5 = vld [vmem:[%s2868_s1 + $0x3a8] sm:$0xff]  ;;  %v1634_v7 = vpack.c.bf16 %v130_v1, %v129_v63  ;;  %v99_v9 = vld [vmem:[%s2868_s1 + $0x220] sm:$0xff]  ;;  %v117_v15 = vld [vmem:[%s2868_s1 + $0x2b0] sm:$0xff] }
  0x1e   :  { %1561 = vmatprep.subr.bf16.mxu0 %v1560_v35  ;;  %v100_v10 = vld [vmem:[%s2868_s1 + $0x228] sm:$0xff]  ;;  %v131_v11 = vld [vmem:[%s2868_s1 + $0x320] sm:$0xff]  ;;  %v1636_v12 = vpack.c.bf16 %v148_v5, %v147_v4  ;;  %v118_v16 = vld [vmem:[%s2868_s1 + $0x2b8] sm:$0xff] }
  0x1f   :  { %1591 = vmatpush3.bf16.msra.mxu1 %v1590_v34  ;;  %v132_v14 = vld [vmem:[%s2868_s1 + $0x328] sm:$0xff]  ;;  %v149_v17 = vld [vmem:[%s2868_s1 + $0x3b0] sm:$0xff]  ;;  %v150_v18 = vld [vmem:[%s2868_s1 + $0x3b8] sm:$0xff]  ;;  %v1606_v19 = vpack.c.bf16 %v100_v10, %v99_v9  ;;  %v1608_v21 = vpack.c.bf16 %v118_v16, %v117_v15 }
  0x20   :  { %1593 = vmatprep.subr.bf16.mxu1 %v1592_v39  ;;  %v1638_v20 = vpack.c.bf16 %v132_v14, %v131_v11  ;;  %v101_v22 = vld [vmem:[%s2868_s1 + $0x230] sm:$0xff]  ;;  %v102_v23 = vld [vmem:[%s2868_s1 + $0x238] sm:$0xff]  ;;  %v1640_v25 = vpack.c.bf16 %v150_v18, %v149_v17  ;;  %v120_v28 = vld [vmem:[%s2868_s1 + $0x2c8] sm:$0xff] }
  0x21   :  { %1563 = vmatpush3.bf16.msra.mxu0 %v1562_v46  ;;  %v133_v24 = vld [vmem:[%s2868_s1 + $0x330] sm:$0xff]  ;;  %v134_v26 = vld [vmem:[%s2868_s1 + $0x338] sm:$0xff]  ;;  %v151_v29 = vld [vmem:[%s2868_s1 + $0x3c0] sm:$0xff]  ;;  %v1610_v32 = vpack.c.bf16 %v102_v23, %v101_v22 }
  0x22   :  { %1597 = vmatprep.subr.bf16.mxu0 %v1596_v48  ;;  %v152_v30 = vld [vmem:[%s2868_s1 + $0x3c8] sm:$0xff]  ;;  %v1642_v35 = vpack.c.bf16 %v134_v26, %v133_v24  ;;  %v103_v37 = vld [vmem:[%s2868_s1 + $0x240] sm:$0xff]  ;;  %v121_v42 = vld [vmem:[%s2868_s1 + $0x2d0] sm:$0xff] }
  0x23   :  { %1595 = vmatpush3.bf16.msra.mxu1 %v1594_v47  ;;  %v28_v31 = vld [vmem:[%s2867_s0 + $0x8] sm:$0xff]  ;;  %v135_v39 = vld [vmem:[%s2868_s1 + $0x340] sm:$0xff]  ;;  %v1644_v40 = vpack.c.bf16 %v152_v30, %v151_v29  ;;  %v122_v43 = vld [vmem:[%s2868_s1 + $0x2d8] sm:$0xff] }
  0x24   :  { %1629 = vmatprep.subr.bf16.mxu1 %v1628_v52  ;;  %447 = vmatmul.mubr.f32.vlgmr.msra.gmra.mrb[0].mxu0 %v305_v27  ;;  %v119_v27 = vld [vmem:[%s2868_s1 + $0x2c0] sm:$0xff]  ;;  %v315_v34 = vcombine.high %v28_v31, %v28_v31  ;;  %v104_v38 = vld [vmem:[%s2868_s1 + $0x248] sm:$0xff]  ;;  %v153_v46 = vld [vmem:[%s2868_s1 + $0x3d0] sm:$0xff]  ;;  %v1616_v51 = vpack.c.bf16 %v122_v43, %v121_v42 }
  0x25   :  { %1599 = vmatpush3.bf16.msra.mxu0 %v1598_v58  ;;  %v1612_v36 = vpack.c.bf16 %v120_v28, %v119_v27  ;;  %v136_v41 = vld [vmem:[%s2868_s1 + $0x348] sm:$0xff]  ;;  %v154_v47 = vld [vmem:[%s2868_s1 + $0x3d8] sm:$0xff]  ;;  %v1614_v48 = vpack.c.bf16 %v104_v38, %v103_v37  ;;  %v105_v52 = vld [vmem:[%s2868_s1 + $0x250] sm:$0xff] }
  0x26   :  { %517 = vmatmul.mubr.f32.vlgmr.msra.gmra.mrb[0].mxu1 %v312_v33  ;;  %1601 = vmatprep.subr.bf16.mxu0 %v1600_v60  ;;  %v2225_v33 = vrot.slane %v28_v31, %v2064_v13  ;;  %v2248_v45 = vrot.slane %v315_v34, %v2064_v13  ;;  %v1646_v50 = vpack.c.bf16 %v136_v41, %v135_v39  ;;  %v106_v53 = vld [vmem:[%s2868_s1 + $0x258] sm:$0xff]  ;;  %v137_v54 = vld [vmem:[%s2868_s1 + $0x350] sm:$0xff]  ;;  %v123_v57 = vld [vmem:[%s2868_s1 + $0x2e0] sm:$0xff] }
  0x27   :  { %1631 = vmatpush3.bf16.msra.mxu1 %v1630_v59  ;;  %v1648_v55 = vpack.c.bf16 %v154_v47, %v153_v46  ;;  %v138_v56 = vld [vmem:[%s2868_s1 + $0x358] sm:$0xff]  ;;  %v124_v58 = vld [vmem:[%s2868_s1 + $0x2e8] sm:$0xff]  ;;  %v155_v59 = vld [vmem:[%s2868_s1 + $0x3e0] sm:$0xff]  ;;  %v1618_v61 = vpack.c.bf16 %v106_v53, %v105_v52 }
  0x28   :  { %1633 = vmatprep.subr.bf16.mxu1 %v1632_v0  ;;  %v330_v44 = vcombine.high %v2225_v33, %v2225_v33  ;;  %v331_v49 = vcombine.high %v2248_v45, %v2248_v45  ;;  %v156_v60 = vld [vmem:[%s2868_s1 + $0x3e8] sm:$0xff]  ;;  %v1650_v62 = vpack.c.bf16 %v138_v56, %v137_v54  ;;  %v1620_v63 = vpack.c.bf16 %v124_v58, %v123_v57  ;;  %v107_v0 = vld [vmem:[%s2868_s1 + $0x260] sm:$0xff]  ;;  %v125_v5 = vld [vmem:[%s2868_s1 + $0x2f0] sm:$0xff] }
  0x29   :  { %1603 = vmatpush3.bf16.msra.mxu0 %v1602_v6  ;;  %v108_v1 = vld [vmem:[%s2868_s1 + $0x268] sm:$0xff]  ;;  %v139_v2 = vld [vmem:[%s2868_s1 + $0x360] sm:$0xff]  ;;  %v1652_v3 = vpack.c.bf16 %v156_v60, %v155_v59  ;;  %v126_v6 = vld [vmem:[%s2868_s1 + $0x2f8] sm:$0xff] }
  0x2a   :  { %1605 = vmatprep.subr.bf16.mxu0 %v1604_v8  ;;  %586 = vmatprep.mubr.f32.mxu0 %v330_v44  ;;  %v140_v4 = vld [vmem:[%s2868_s1 + $0x368] sm:$0xff]  ;;  %v158_v8 = vld [vmem:[%s2868_s1 + $0x3f8] sm:$0xff]  ;;  %v1622_v9 = vpack.c.bf16 %v108_v1, %v107_v0  ;;  %v1624_v11 = vpack.c.bf16 %v126_v6, %v125_v5  ;;  %v141_v15 = vld [vmem:[%s2868_s1 + $0x370] sm:$0xff] }
  0x2b   :  { %1635 = vmatpush3.bf16.msra.mxu1 %v1634_v7  ;;  %656 = vmatprep.mubr.f32.mxu1 %v331_v49  ;;  %v157_v7 = vld [vmem:[%s2868_s1 + $0x3f0] sm:$0xff]  ;;  %v1654_v10 = vpack.c.bf16 %v140_v4, %v139_v2  ;;  %v110_v14 = vld [vmem:[%s2868_s1 + $0x278] sm:$0xff]  ;;  %v175_v18 = vld [vmem:[%s2868_s1 + $0x480] sm:$0xff] }
  0x2c   :  { %1637 = vmatprep.subr.bf16.mxu1 %v1636_v12  ;;  %v109_v12 = vld [vmem:[%s2868_s1 + $0x270] sm:$0xff]  ;;  %v1656_v16 = vpack.c.bf16 %v158_v8, %v157_v7  ;;  %v142_v17 = vld [vmem:[%s2868_s1 + $0x378] sm:$0xff]  ;;  %v159_v23 = vld [vmem:[%s2868_s1 + $0x400] sm:$0xff] }
  0x2d   :  { %1607 = vmatpush3.bf16.msra.mxu0 %v1606_v19  ;;  %v176_v19 = vld [vmem:[%s2868_s1 + $0x488] sm:$0xff]  ;;  %v1626_v22 = vpack.c.bf16 %v110_v14, %v109_v12  ;;  %v1658_v24 = vpack.c.bf16 %v142_v17, %v141_v15  ;;  %v191_v27 = vld [vmem:[%s2868_s1 + $0x500] sm:$0xff]  ;;  %v177_v30 = vld [vmem:[%s2868_s1 + $0x490] sm:$0xff] }
  0x2e   :  { %1609 = vmatprep.subr.bf16.mxu0 %v1608_v21  ;;  %v208_v21 = vld [vmem:[%s2868_s1 + $0x588] sm:$0xff]  ;;  %v178_v31 = vld [vmem:[%s2868_s1 + $0x498] sm:$0xff]  ;;  %v29_v37 = vld [vmem:[%s2867_s0 + $0x10] sm:$0xff] }
  0x2f   :  { %1639 = vmatpush3.bf16.msra.mxu1 %v1638_v20  ;;  %v207_v20 = vld [vmem:[%s2868_s1 + $0x580] sm:$0xff]  ;;  %v160_v26 = vld [vmem:[%s2868_s1 + $0x408] sm:$0xff]  ;;  %v210_v34 = vld [vmem:[%s2868_s1 + $0x598] sm:$0xff]  ;;  %v1664_v38 = vpack.c.bf16 %v178_v31, %v177_v30  ;;  %v2367_v42 = vrot.slane %v29_v37, %v2064_v13  ;;  %v332_v43 = vcombine.high %v29_v37, %v29_v37 }
  0x30   :  { %1641 = vmatprep.subr.bf16.mxu1 %v1640_v25  ;;  %v1660_v25 = vpack.c.bf16 %v176_v19, %v175_v18  ;;  %v192_v28 = vld [vmem:[%s2868_s1 + $0x508] sm:$0xff]  ;;  %v1692_v29 = vpack.c.bf16 %v208_v21, %v207_v20  ;;  %v161_v39 = vld [vmem:[%s2868_s1 + $0x410] sm:$0xff]  ;;  %v194_v46 = vld [vmem:[%s2868_s1 + $0x518] sm:$0xff] }
  0x31   :  { %1611 = vmatpush3.bf16.msra.mxu0 %v1610_v32  ;;  %v209_v32 = vld [vmem:[%s2868_s1 + $0x590] sm:$0xff]  ;;  %v179_v47 = vld [vmem:[%s2868_s1 + $0x4a0] sm:$0xff]  ;;  %v2388_v52 = vrot.slane %v332_v43, %v2064_v13  ;;  %v164_v56 = vld [vmem:[%s2868_s1 + $0x428] sm:$0xff] }
  0x32   :  { %1613 = vmatprep.subr.bf16.mxu0 %v1612_v36  ;;  %v1694_v36 = vpack.c.bf16 %v192_v28, %v191_v27  ;;  %v193_v41 = vld [vmem:[%s2868_s1 + $0x510] sm:$0xff]  ;;  %v1696_v44 = vpack.c.bf16 %v210_v34, %v209_v32  ;;  %v211_v49 = vld [vmem:[%s2868_s1 + $0x5a0] sm:$0xff]  ;;  %v196_v59 = vld [vmem:[%s2868_s1 + $0x528] sm:$0xff] }
  0x33   :  { %1643 = vmatpush3.bf16.msra.mxu1 %v1642_v35  ;;  %v1662_v35 = vpack.c.bf16 %v160_v26, %v159_v23  ;;  %v195_v57 = vld [vmem:[%s2868_s1 + $0x520] sm:$0xff]  ;;  %v181_v60 = vld [vmem:[%s2868_s1 + $0x4b0] sm:$0xff]  ;;  %v166_v4 = vld [vmem:[%s2868_s1 + $0x438] sm:$0xff] }
  0x34   :  { %1645 = vmatprep.subr.bf16.mxu1 %v1644_v40  ;;  %v162_v40 = vld [vmem:[%s2868_s1 + $0x418] sm:$0xff]  ;;  %v1702_v1 = vpack.c.bf16 %v196_v59, %v195_v57  ;;  %v197_v5 = vld [vmem:[%s2868_s1 + $0x530] sm:$0xff]  ;;  %v183_v8 = vld [vmem:[%s2868_s1 + $0x4c0] sm:$0xff] }
  0x35   :  { %1615 = vmatpush3.bf16.msra.mxu0 %v1614_v48  ;;  %v180_v48 = vld [vmem:[%s2868_s1 + $0x4a8] sm:$0xff]  ;;  %v1666_v53 = vpack.c.bf16 %v162_v40, %v161_v39  ;;  %v198_v7 = vld [vmem:[%s2868_s1 + $0x538] sm:$0xff]  ;;  %v199_v18 = vld [vmem:[%s2868_s1 + $0x540] sm:$0xff] }
  0x36   :  { %1617 = vmatprep.subr.bf16.mxu0 %v1616_v51  ;;  %v347_v51 = vcombine.high %v2367_v42, %v2367_v42  ;;  %v1668_v54 = vpack.c.bf16 %v180_v48, %v179_v47  ;;  %v1706_v14 = vpack.c.bf16 %v198_v7, %v197_v5  ;;  %v168_v17 = vld [vmem:[%s2868_s1 + $0x448] sm:$0xff]  ;;  %v185_v21 = vld [vmem:[%s2868_s1 + $0x4d0] sm:$0xff]  ;;  %v202_v32 = vld [vmem:[%s2868_s1 + $0x558] sm:$0xff] }
  0x37   :  { %1647 = vmatpush3.bf16.msra.mxu1 %v1646_v50  ;;  %v212_v50 = vld [vmem:[%s2868_s1 + $0x5a8] sm:$0xff]  ;;  %v217_v23 = vld [vmem:[%s2868_s1 + $0x5d0] sm:$0xff]  ;;  %v187_v34 = vld [vmem:[%s2868_s1 + $0x4e0] sm:$0xff] }
  0x38   :  { %1649 = vmatprep.subr.bf16.mxu1 %v1648_v55  ;;  %v163_v55 = vld [vmem:[%s2868_s1 + $0x420] sm:$0xff]  ;;  %v1700_v58 = vpack.c.bf16 %v212_v50, %v211_v49  ;;  %v200_v20 = vld [vmem:[%s2868_s1 + $0x548] sm:$0xff]  ;;  %v169_v28 = vld [vmem:[%s2868_s1 + $0x450] sm:$0xff] }
  0x39   :  { %1619 = vmatpush3.bf16.msra.mxu0 %v1618_v61  ;;  %v182_v61 = vld [vmem:[%s2868_s1 + $0x4b8] sm:$0xff]  ;;  %v1670_v0 = vpack.c.bf16 %v164_v56, %v163_v55  ;;  %v1710_v26 = vpack.c.bf16 %v200_v20, %v199_v18  ;;  %v201_v30 = vld [vmem:[%s2868_s1 + $0x550] sm:$0xff]  ;;  %v220_v37 = vld [vmem:[%s2868_s1 + $0x5e8] sm:$0xff] }
  0x3a   :  { %1621 = vmatprep.subr.bf16.mxu0 %v1620_v63  ;;  %v214_v63 = vld [vmem:[%s2868_s1 + $0x5b8] sm:$0xff]  ;;  %v1672_v2 = vpack.c.bf16 %v182_v61, %v181_v60  ;;  %v171_v39 = vld [vmem:[%s2868_s1 + $0x460] sm:$0xff]  ;;  %v1714_v40 = vpack.c.bf16 %v202_v32, %v201_v30  ;;  %v172_v43 = vld [vmem:[%s2868_s1 + $0x468] sm:$0xff] }
  0x3b   :  { %1651 = vmatpush3.bf16.msra.mxu1 %v1650_v62  ;;  %v213_v62 = vld [vmem:[%s2868_s1 + $0x5b0] sm:$0xff]  ;;  %v190_v49 = vld [vmem:[%s2868_s1 + $0x4f8] sm:$0xff] }
  0x3c   :  { %1653 = vmatprep.subr.bf16.mxu1 %v1652_v3  ;;  %v165_v3 = vld [vmem:[%s2868_s1 + $0x430] sm:$0xff]  ;;  %v1704_v6 = vpack.c.bf16 %v214_v63, %v213_v62 }
  0x3d   :  { %1623 = vmatpush3.bf16.msra.mxu0 %v1622_v9  ;;  %v184_v9 = vld [vmem:[%s2868_s1 + $0x4c8] sm:$0xff]  ;;  %v1674_v12 = vpack.c.bf16 %v166_v4, %v165_v3  ;;  %v189_v48 = vld [vmem:[%s2868_s1 + $0x4f0] sm:$0xff] }
  0x3e   :  { %1625 = vmatprep.subr.bf16.mxu0 %v1624_v11  ;;  %v216_v11 = vld [vmem:[%s2868_s1 + $0x5c8] sm:$0xff]  ;;  %v1676_v15 = vpack.c.bf16 %v184_v9, %v183_v8 }
  0x3f   :  { %1655 = vmatpush3.bf16.msra.mxu1 %v1654_v10  ;;  %v215_v10 = vld [vmem:[%s2868_s1 + $0x5c0] sm:$0xff] }
  0x40   :  { %1657 = vmatprep.subr.bf16.mxu1 %v1656_v16  ;;  %v167_v16 = vld [vmem:[%s2868_s1 + $0x440] sm:$0xff]  ;;  %v1708_v19 = vpack.c.bf16 %v216_v11, %v215_v10 }
  0x41   :  { %1627 = vmatpush3.bf16.msra.mxu0 %v1626_v22  ;;  %v186_v22 = vld [vmem:[%s2868_s1 + $0x4d8] sm:$0xff] }
  0x42   :  { %1661 = vmatprep.subr.bf16.mxu0 %v1660_v25  ;;  %v1678_v25 = vpack.c.bf16 %v168_v17, %v167_v16  ;;  %v1680_v27 = vpack.c.bf16 %v186_v22, %v185_v21 }
  0x43   :  { %1659 = vmatpush3.bf16.msra.mxu1 %v1658_v24  ;;  %v218_v24 = vld [vmem:[%s2868_s1 + $0x5d8] sm:$0xff] }
  0x44   :  { %1693 = vmatprep.subr.bf16.mxu1 %v1692_v29  ;;  %587 = vmatmul.mubr.f32.vlgmr.msra.gmra.mrb[2].mxu0 %v2225_v33  ;;  %v1698_v33 = vpack.c.bf16 %v194_v46, %v193_v41  ;;  %v170_v29 = vld [vmem:[%s2868_s1 + $0x458] sm:$0xff]  ;;  %v1712_v31 = vpack.c.bf16 %v218_v24, %v217_v23  ;;  %v204_v46 = vld [vmem:[%s2868_s1 + $0x568] sm:$0xff] }
  0x45   :  { %1663 = vmatpush3.bf16.msra.mxu0 %v1662_v35  ;;  %726 = vmatprep.mubr.f32.mxu0 %v347_v51  ;;  %v188_v35 = vld [vmem:[%s2868_s1 + $0x4e8] sm:$0xff] }
  0x46   :  { %657 = vmatmul.mubr.f32.vlgmr.msra.gmra.mrb[2].mxu1 %v2248_v45  ;;  %1665 = vmatprep.subr.bf16.mxu0 %v1664_v38  ;;  %v348_v45 = vcombine.high %v2388_v52, %v2388_v52  ;;  %v1682_v38 = vpack.c.bf16 %v170_v29, %v169_v28  ;;  %v1684_v41 = vpack.c.bf16 %v188_v35, %v187_v34 }
  0x47   :  { %1695 = vmatpush3.bf16.msra.mxu1 %v1694_v36  ;;  %v219_v36 = vld [vmem:[%s2868_s1 + $0x5e0] sm:$0xff] }
  0x48   :  { %1697 = vmatprep.subr.bf16.mxu1 %v1696_v44  ;;  %796 = vmatprep.mubr.f32.mxu1 %v348_v45  ;;  %v203_v44 = vld [vmem:[%s2868_s1 + $0x560] sm:$0xff]  ;;  %v1716_v47 = vpack.c.bf16 %v220_v37, %v219_v36 }
  0x49   :  { %1667 = vmatpush3.bf16.msra.mxu0 %v1666_v53 }
  0x4a   :  { %1669 = vmatprep.subr.bf16.mxu0 %v1668_v54 }
  0x4b   :  { %1699 = vmatpush3.bf16.msra.mxu1 %v1698_v33 }
  0x4c   :  { %1701 = vmatprep.subr.bf16.mxu1 %v1700_v58 }
  0x4d   :  { %1671 = vmatpush3.bf16.msra.mxu0 %v1670_v0 }
  0x4e   :  { %1673 = vmatprep.subr.bf16.mxu0 %v1672_v2 }
  0x4f   :  { %1703 = vmatpush3.bf16.msra.mxu1 %v1702_v1 }
  0x50   :  { %1705 = vmatprep.subr.bf16.mxu1 %v1704_v6 }
  0x51   :  { %1675 = vmatpush3.bf16.msra.mxu0 %v1674_v12 }
  0x52   :  { %1677 = vmatprep.subr.bf16.mxu0 %v1676_v15 }
  0x53   :  { %1707 = vmatpush3.bf16.msra.mxu1 %v1706_v14 }
  0x54   :  { %1709 = vmatprep.subr.bf16.mxu1 %v1708_v19 }
  0x55   :  { %1679 = vmatpush3.bf16.msra.mxu0 %v1678_v25 }
  0x56   :  { %1681 = vmatprep.subr.bf16.mxu0 %v1680_v27 }
  0x57   :  { %1711 = vmatpush3.bf16.msra.mxu1 %v1710_v26 }
  0x58   :  { %1713 = vmatprep.subr.bf16.mxu1 %v1712_v31 }
  0x59   :  { %12 = vsyncpa [#allocation3], 0  ;;  %v221_v50 = vld [vmem:[%s2868_s1 + $0x5f0] sm:$0xff]  ;;  %v222_v51 = vld [vmem:[%s2868_s1 + $0x5f8] sm:$0xff]  ;;  %1683 = vmatpush3.bf16.msra.mxu0 %v1682_v38  ;;  %v1686_v53 = vpack.c.bf16 %v172_v43, %v171_v39  ;;  %v1718_v54 = vpack.c.bf16 %v204_v46, %v203_v44  ;;  %v1688_v55 = vpack.c.bf16 %v190_v49, %v189_v48  ;;  %vm1871_vm0 = vmmov 0   ;;  %s1873_s24 = smov [#allocation2]  }
  0x5a   :  { %v30_v33 = vld [vmem:[%s2867_s0 + $0x18] sm:$0xff]  ;;  %1685 = vmatprep.subr.bf16.mxu0 %v1684_v41  ;;  %v173_v56 = vld [vmem:[%s2868_s1 + $0x470] sm:$0xff]  ;;  %v1720_v58 = vpack.c.bf16 %v222_v51, %v221_v50  ;;  %v239_v60 = vld [vmem:[%s2868_s1 + $0x680] sm:$0xff]  ;;  %s1137_s25 = sshll.u32 %s1873_s24, 4  ;;  %s1138_s25 = int_to_ptr.vmem [resolvable:$true] %s1137_s25 }
  0x5b   :  { %1715 = vmatpush3.bf16.msra.mxu1 %v1714_v40  ;;  %v174_v57 = vld [vmem:[%s2868_s1 + $0x478] sm:$0xff]  ;;  %v205_v45 = vld [vmem:[%s2868_s1 + $0x570] sm:$0xff]  ;;  %v240_v61 = vld [vmem:[%s2868_s1 + $0x688] sm:$0xff]  ;;  %v349_v0 = vcombine.high %v30_v33, %v30_v33  ;;  %v2559_v11 = vrot.slane %v30_v33, %v2064_v13  ;;  %p1850_p1 = scmp.lt.s32.totalorder %s1138_s25, %s1138_s25 }
  0x5c   :  { %1717 = vmatprep.subr.bf16.mxu1 %v1716_v47  ;;  %v206_v59 = vld [vmem:[%s2868_s1 + $0x578] sm:$0xff]  ;;  %v271_v62 = vld [vmem:[%s2868_s1 + $0x780] sm:$0xff]  ;;  %v272_v63 = vld [vmem:[%s2868_s1 + $0x788] sm:$0xff]  ;;  %v1690_v1 = vpack.c.bf16 %v174_v57, %v173_v56  ;;  %v1724_v3 = vpack.c.bf16 %v240_v61, %v239_v60 }
  0x5d   :  { %1687 = vmatpush3.bf16.msra.mxu0 %v1686_v53  ;;  %v1722_v2 = vpack.c.bf16 %v206_v59, %v205_v45  ;;  %v223_v4 = vld [vmem:[%s2868_s1 + $0x600] sm:$0xff]  ;;  %v224_v5 = vld [vmem:[%s2868_s1 + $0x608] sm:$0xff]  ;;  %v1756_v7 = vpack.c.bf16 %v272_v63, %v271_v62  ;;  %v241_v9 = vld [vmem:[%s2868_s1 + $0x690] sm:$0xff]  ;;  %v2568_v15 = vrot.slane %v349_v0, %v2064_v13  ;;  %v364_v25 = vcombine.high %v2559_v11, %v2559_v11 }
  0x5e   :  { %1689 = vmatprep.subr.bf16.mxu0 %v1688_v55  ;;  %v255_v6 = vld [vmem:[%s2868_s1 + $0x700] sm:$0xff]  ;;  %v256_v8 = vld [vmem:[%s2868_s1 + $0x708] sm:$0xff]  ;;  %v242_v10 = vld [vmem:[%s2868_s1 + $0x698] sm:$0xff]  ;;  %v1726_v16 = vpack.c.bf16 %v224_v5, %v223_v4 }
  0x5f   :  { %1719 = vmatpush3.bf16.msra.mxu1 %v1718_v54  ;;  %v273_v12 = vld [vmem:[%s2868_s1 + $0x790] sm:$0xff]  ;;  %v274_v14 = vld [vmem:[%s2868_s1 + $0x798] sm:$0xff]  ;;  %v1758_v17 = vpack.c.bf16 %v256_v8, %v255_v6  ;;  %v1728_v18 = vpack.c.bf16 %v242_v10, %v241_v9  ;;  %v243_v23 = vld [vmem:[%s2868_s1 + $0x6a0] sm:$0xff]  ;;  %v365_v28 = vcombine.high %v2568_v15, %v2568_v15 }
  0x60   :  { %1721 = vmatprep.subr.bf16.mxu1 %v1720_v58  ;;  %v225_v19 = vld [vmem:[%s2868_s1 + $0x610] sm:$0xff]  ;;  %v226_v20 = vld [vmem:[%s2868_s1 + $0x618] sm:$0xff]  ;;  %v1760_v13 = vpack.c.bf16 %v274_v14, %v273_v12  ;;  %v244_v24 = vld [vmem:[%s2868_s1 + $0x6a8] sm:$0xff] }
  0x61   :  { %1691 = vmatpush3.bf16.msra.mxu0 %v1690_v1  ;;  %v257_v21 = vld [vmem:[%s2868_s1 + $0x710] sm:$0xff]  ;;  %v258_v22 = vld [vmem:[%s2868_s1 + $0x718] sm:$0xff]  ;;  %v275_v26 = vld [vmem:[%s2868_s1 + $0x7a0] sm:$0xff]  ;;  %v1730_v29 = vpack.c.bf16 %v226_v20, %v225_v19  ;;  %v1732_v31 = vpack.c.bf16 %v244_v24, %v243_v23 }
  0x62   :  { %1725 = vmatprep.subr.bf16.mxu0 %v1724_v3  ;;  %v276_v27 = vld [vmem:[%s2868_s1 + $0x7a8] sm:$0xff]  ;;  %v1762_v30 = vpack.c.bf16 %v258_v22, %v257_v21  ;;  %v259_v34 = vld [vmem:[%s2868_s1 + $0x720] sm:$0xff]  ;;  %v245_v36 = vld [vmem:[%s2868_s1 + $0x6b0] sm:$0xff] }
  0x63   :  { %1723 = vmatpush3.bf16.msra.mxu1 %v1722_v2  ;;  %v228_v32 = vld [vmem:[%s2868_s1 + $0x628] sm:$0xff]  ;;  %v1764_v35 = vpack.c.bf16 %v276_v27, %v275_v26  ;;  %v246_v37 = vld [vmem:[%s2868_s1 + $0x6b8] sm:$0xff]  ;;  %v277_v38 = vld [vmem:[%s2868_s1 + $0x7b0] sm:$0xff] }
  0x64   :  { %1757 = vmatprep.subr.bf16.mxu1 %v1756_v7  ;;  %727 = vmatmul.mubr.f32.vlgmr.msra.gmra.mrb[4].mxu0 %v2367_v42  ;;  %v227_v42 = vld [vmem:[%s2868_s1 + $0x620] sm:$0xff]  ;;  %v278_v39 = vld [vmem:[%s2868_s1 + $0x7b8] sm:$0xff]  ;;  %v1736_v43 = vpack.c.bf16 %v246_v37, %v245_v36  ;;  %v229_v44 = vld [vmem:[%s2868_s1 + $0x630] sm:$0xff] }
  0x65   :  { %1727 = vmatpush3.bf16.msra.mxu0 %v1726_v16  ;;  %866 = vmatprep.mubr.f32.mxu0 %v364_v25  ;;  %v1734_v40 = vpack.c.bf16 %v228_v32, %v227_v42  ;;  %v230_v46 = vld [vmem:[%s2868_s1 + $0x638] sm:$0xff]  ;;  %v261_v47 = vld [vmem:[%s2868_s1 + $0x730] sm:$0xff]  ;;  %v1768_v48 = vpack.c.bf16 %v278_v39, %v277_v38  ;;  %v247_v50 = vld [vmem:[%s2868_s1 + $0x6c0] sm:$0xff]  ;;  %v1870_v39 = vmov 0.0|0.0  }
  0x66   :  { %797 = vmatmul.mubr.f32.vlgmr.msra.gmra.mrb[4].mxu1 %v2388_v52  ;;  %1729 = vmatprep.subr.bf16.mxu0 %v1728_v18  ;;  %v260_v52 = vld [vmem:[%s2868_s1 + $0x728] sm:$0xff]  ;;  %v262_v49 = vld [vmem:[%s2868_s1 + $0x738] sm:$0xff]  ;;  %v279_v53 = vld [vmem:[%s2868_s1 + $0x7c0] sm:$0xff]  ;;  %v1738_v54 = vpack.c.bf16 %v230_v46, %v229_v44 }
  0x67   :  { %1759 = vmatpush3.bf16.msra.mxu1 %v1758_v17  ;;  %936 = vmatprep.mubr.f32.mxu1 %v365_v28  ;;  %v1766_v41 = vpack.c.bf16 %v260_v52, %v259_v34  ;;  %v248_v51 = vld [vmem:[%s2868_s1 + $0x6c8] sm:$0xff]  ;;  %v1770_v55 = vpack.c.bf16 %v262_v49, %v261_v47  ;;  %v231_v57 = vld [vmem:[%s2868_s1 + $0x640] sm:$0xff]  ;;  %v249_v61 = vld [vmem:[%s2868_s1 + $0x6d0] sm:$0xff] }
  0x68   :  { %1761 = vmatprep.subr.bf16.mxu1 %v1760_v13  ;;  %v280_v33 = vld [vmem:[%s2868_s1 + $0x7c8] sm:$0xff]  ;;  %v1740_v56 = vpack.c.bf16 %v248_v51, %v247_v50  ;;  %v263_v58 = vld [vmem:[%s2868_s1 + $0x740] sm:$0xff]  ;;  %v250_v62 = vld [vmem:[%s2868_s1 + $0x6d8] sm:$0xff] }
  0x69   :  { %1731 = vmatpush3.bf16.msra.mxu0 %v1730_v29  ;;  %v232_v45 = vld [vmem:[%s2868_s1 + $0x648] sm:$0xff]  ;;  %v1772_v59 = vpack.c.bf16 %v280_v33, %v279_v53  ;;  %v281_v63 = vld [vmem:[%s2868_s1 + $0x7d0] sm:$0xff]  ;;  %v282_v0 = vld [vmem:[%s2868_s1 + $0x7d8] sm:$0xff]  ;;  %v1744_v3 = vpack.c.bf16 %v250_v62, %v249_v61 }
  0x6a   :  { %1733 = vmatprep.subr.bf16.mxu0 %v1732_v31  ;;  %v264_v60 = vld [vmem:[%s2868_s1 + $0x748] sm:$0xff]  ;;  %v1742_v1 = vpack.c.bf16 %v232_v45, %v231_v57  ;;  %v233_v4 = vld [vmem:[%s2868_s1 + $0x650] sm:$0xff]  ;;  %v234_v5 = vld [vmem:[%s2868_s1 + $0x658] sm:$0xff]  ;;  %v1776_v7 = vpack.c.bf16 %v282_v0, %v281_v63 }
  0x6b   :  { %1763 = vmatpush3.bf16.msra.mxu1 %v1762_v30  ;;  %v1774_v2 = vpack.c.bf16 %v264_v60, %v263_v58  ;;  %v265_v6 = vld [vmem:[%s2868_s1 + $0x750] sm:$0xff]  ;;  %v266_v8 = vld [vmem:[%s2868_s1 + $0x758] sm:$0xff]  ;;  %v251_v9 = vld [vmem:[%s2868_s1 + $0x6e0] sm:$0xff]  ;;  %v1746_v16 = vpack.c.bf16 %v234_v5, %v233_v4  ;;  %v1872_v60 = vmov 0.0  }
  0x6c   :  { %1765 = vmatprep.subr.bf16.mxu1 %v1764_v35  ;;  %v252_v10 = vld [vmem:[%s2868_s1 + $0x6e8] sm:$0xff]  ;;  %v283_v12 = vld [vmem:[%s2868_s1 + $0x7e0] sm:$0xff]  ;;  %v1778_v17 = vpack.c.bf16 %v266_v8, %v265_v6  ;;  %v253_v23 = vld [vmem:[%s2868_s1 + $0x6f0] sm:$0xff] }
  0x6d   :  { %1735 = vmatpush3.bf16.msra.mxu0 %v1734_v40  ;;  %v284_v14 = vld [vmem:[%s2868_s1 + $0x7e8] sm:$0xff]  ;;  %v1748_v18 = vpack.c.bf16 %v252_v10, %v251_v9  ;;  %v235_v19 = vld [vmem:[%s2868_s1 + $0x660] sm:$0xff]  ;;  %v254_v24 = vld [vmem:[%s2868_s1 + $0x6f8] sm:$0xff] }
  0x6e   :  { %1737 = vmatprep.subr.bf16.mxu0 %v1736_v43  ;;  %v236_v20 = vld [vmem:[%s2868_s1 + $0x668] sm:$0xff]  ;;  %v267_v21 = vld [vmem:[%s2868_s1 + $0x760] sm:$0xff]  ;;  %v1780_v13 = vpack.c.bf16 %v284_v14, %v283_v12  ;;  %v285_v25 = vld [vmem:[%s2868_s1 + $0x7f0] sm:$0xff]  ;;  %v1752_v29 = vpack.c.bf16 %v254_v24, %v253_v23 }
  0x6f   :  { %1767 = vmatpush3.bf16.msra.mxu1 %v1766_v41  ;;  %v268_v22 = vld [vmem:[%s2868_s1 + $0x768] sm:$0xff]  ;;  %v286_v26 = vld [vmem:[%s2868_s1 + $0x7f8] sm:$0xff]  ;;  %v1750_v27 = vpack.c.bf16 %v236_v20, %v235_v19  ;;  %v237_v30 = vld [vmem:[%s2868_s1 + $0x670] sm:$0xff] }
  0x70   :  { %1769 = vmatprep.subr.bf16.mxu1 %v1768_v48  ;;  %v1782_v28 = vpack.c.bf16 %v268_v22, %v267_v21  ;;  %v238_v31 = vld [vmem:[%s2868_s1 + $0x678] sm:$0xff]  ;;  %v1784_v42 = vpack.c.bf16 %v286_v26, %v285_v25  ;;  %v269_v32 = vld [vmem:[%s2868_s1 + $0x770] sm:$0xff]  ;;  %v943_v36 = vld [vmem:[%s2870_s3] sm:$0xff] }
  0x71   :  { %1739 = vmatpush3.bf16.msra.mxu0 %v1738_v54  ;;  %v270_v34 = vld [vmem:[%s2868_s1 + $0x778] sm:$0xff]  ;;  %v1754_v35 = vpack.c.bf16 %v238_v31, %v237_v30  ;;  %v944_v37 = vld [vmem:[%s2870_s3 + $0x8] sm:$0xff]  ;;  %v945_v38 = vld [vmem:[%s2870_s3 + $0x10] sm:$0xff] }
  0x72   :  { %1741 = vmatprep.subr.bf16.mxu0 %v1740_v56  ;;  %v1786_v52 = vpack.c.bf16 %v270_v34, %v269_v32  ;;  %v1789_v40 = vpack.c.bf16 %v944_v37, %v943_v36  ;;  %v947_v41 = vld [vmem:[%s2870_s3 + $0x20] sm:$0xff]  ;;  %v948_v43 = vld [vmem:[%s2870_s3 + $0x28] sm:$0xff]  ;;  %v949_v46 = vld [vmem:[%s2870_s3 + $0x30] sm:$0xff] }
  0x73   :  { %1771 = vmatpush3.bf16.msra.mxu1 %v1770_v55  ;;  %v1795_v44 = vpack.c.bf16 %v948_v43, %v947_v41  ;;  %v950_v47 = vld [vmem:[%s2870_s3 + $0x38] sm:$0xff]  ;;  %v951_v49 = vld [vmem:[%s2870_s3 + $0x40] sm:$0xff]  ;;  %v952_v50 = vld [vmem:[%s2870_s3 + $0x48] sm:$0xff] }
  0x74   :  { %1773 = vmatprep.subr.bf16.mxu1 %v1772_v59  ;;  %v1798_v48 = vpack.c.bf16 %v950_v47, %v949_v46  ;;  %v1801_v51 = vpack.c.bf16 %v952_v50, %v951_v49  ;;  %v953_v53 = vld [vmem:[%s2870_s3 + $0x50] sm:$0xff]  ;;  %v954_v33 = vld [vmem:[%s2870_s3 + $0x58] sm:$0xff]  ;;  %v955_v55 = vld [vmem:[%s2870_s3 + $0x60] sm:$0xff] }
  0x75   :  { %1743 = vmatpush3.bf16.msra.mxu0 %v1742_v1  ;;  %v1804_v54 = vpack.c.bf16 %v954_v33, %v953_v53  ;;  %v956_v56 = vld [vmem:[%s2870_s3 + $0x68] sm:$0xff]  ;;  %v957_v45 = vld [vmem:[%s2870_s3 + $0x70] sm:$0xff]  ;;  %v958_v58 = vld [vmem:[%s2870_s3 + $0x78] sm:$0xff] }
  0x76   :  { %1745 = vmatprep.subr.bf16.mxu0 %v1744_v3  ;;  %v1807_v57 = vpack.c.bf16 %v956_v56, %v955_v55  ;;  %v1810_v59 = vpack.c.bf16 %v958_v58, %v957_v45  ;;  %v1037_v61 = vld [vmem:[%s2872_s5] sm:$0xff]  ;;  %v1038_v62 = vld [vmem:[%s2872_s5 + $0x8] sm:$0xff]  ;;  %v1039_v63 = vld [vmem:[%s2872_s5 + $0x10] sm:$0xff] }
  0x77   :  { %1775 = vmatpush3.bf16.msra.mxu1 %v1774_v2  ;;  %v1813_v0 = vpack.c.bf16 %v1038_v62, %v1037_v61  ;;  %v1040_v1 = vld [vmem:[%s2872_s5 + $0x18] sm:$0xff]  ;;  %v1041_v3 = vld [vmem:[%s2872_s5 + $0x20] sm:$0xff]  ;;  %v1042_v4 = vld [vmem:[%s2872_s5 + $0x28] sm:$0xff] }
  0x78   :  { %1777 = vmatprep.subr.bf16.mxu1 %v1776_v7  ;;  %v1816_v2 = vpack.c.bf16 %v1040_v1, %v1039_v63  ;;  %v1819_v5 = vpack.c.bf16 %v1042_v4, %v1041_v3  ;;  %v1043_v6 = vld [vmem:[%s2872_s5 + $0x30] sm:$0xff]  ;;  %v1044_v7 = vld [vmem:[%s2872_s5 + $0x38] sm:$0xff]  ;;  %v1045_v9 = vld [vmem:[%s2872_s5 + $0x40] sm:$0xff] }
  0x79   :  { %1747 = vmatpush3.bf16.msra.mxu0 %v1746_v16  ;;  %v1822_v8 = vpack.c.bf16 %v1044_v7, %v1043_v6  ;;  %v1046_v10 = vld [vmem:[%s2872_s5 + $0x48] sm:$0xff]  ;;  %v1047_v14 = vld [vmem:[%s2872_s5 + $0x50] sm:$0xff]  ;;  %v1048_v16 = vld [vmem:[%s2872_s5 + $0x58] sm:$0xff] }
  0x7a   :  { %1749 = vmatprep.subr.bf16.mxu0 %v1748_v18  ;;  %v1825_v12 = vpack.c.bf16 %v1046_v10, %v1045_v9  ;;  %v1049_v18 = vld [vmem:[%s2872_s5 + $0x60] sm:$0xff]  ;;  %v1050_v19 = vld [vmem:[%s2872_s5 + $0x68] sm:$0xff]  ;;  %v1051_v33 = vld [vmem:[%s2872_s5 + $0x70] sm:$0xff] }
  0x7b   :  { %1779 = vmatpush3.bf16.msra.mxu1 %v1778_v17  ;;  %v1828_v17 = vpack.c.bf16 %v1048_v16, %v1047_v14  ;;  %v1145_v21 = vld [vmem:[%s2869_s2] ss:$0 sm:$0xff]  ;;  %v1831_v23 = vpack.c.bf16 %v1050_v19, %v1049_v18 }
  0x7c   :  { %1781 = vmatprep.subr.bf16.mxu1 %v1780_v13  ;;  %v1146_v56 = vld [vmem:[%s2871_s4] ss:$0 sm:$0xff] }
  0x7d   :  { %1751 = vmatpush3.bf16.msra.mxu0 %v1750_v27 }
  0x7e   :  { %1753 = vmatprep.subr.bf16.mxu0 %v1752_v29 }
  0x7f   :  { %1783 = vmatpush3.bf16.msra.mxu1 %v1782_v28 }
  0x80   :  { %1785 = vmatprep.subr.bf16.mxu1 %v1784_v42 }
  0x81   :  { %1755 = vmatpush3.bf16.msra.mxu0 %v1754_v35 }
  0x82   :  { %1788 = vmatprep.subr.bf16.mxu0 %v1870_v39 }
  0x83   :  { %1787 = vmatpush3.bf16.msra.mxu1 %v1786_v52 }
  0x84   :  { %867 = vmatmul.mubr.f32.vlgmr.msra.gmra.mrb[6].mxu0 %v2559_v11  ;;  %v946_v11 = vld [vmem:[%s2870_s3 + $0x18] sm:$0xff]  ;;  %1812 = vmatprep.subr.bf16.mxu1 %v1870_v39 }
  0x85   :  { %1790 = vmatpush3.bf16.msra.mxu0 %v1789_v40  ;;  %1494 = vmatprep.mubr.msk.f32.mxu0 %vm1871_vm0, %v1872_v60 }
  0x86   :  { %937 = vmatmul.mubr.f32.vlgmr.msra.gmra.mrb[6].mxu1 %v2568_v15  ;;  %v1792_v15 = vpack.c.bf16 %v946_v11, %v945_v38  ;;  %1791 = vmatprep.subr.bf16.mxu0 %v1870_v39 }
  0x87   :  { %1529 = vmatprep.mubr.msk.f32.mxu1 %vm1871_vm0, %v1872_v60  ;;  %1814 = vmatpush3.bf16.msra.mxu1 %v1813_v0  ;;  %v1147_v60 = vld [vmem:[%s2873_s6] ss:$0 sm:$0xff] }
  0x88   :  { %1815 = vmatprep.subr.bf16.mxu1 %v1870_v39 }
  0x89   :  { %1793 = vmatpush3.bf16.msra.mxu0 %v1792_v15 }
  0x8a   :  { %1794 = vmatprep.subr.bf16.mxu0 %v1870_v39 }
  0x8b   :  { %1817 = vmatpush3.bf16.msra.mxu1 %v1816_v2 }
  0x8c   :  { %1818 = vmatprep.subr.bf16.mxu1 %v1870_v39 }
  0x8d   :  { %1796 = vmatpush3.bf16.msra.mxu0 %v1795_v44 }
  0x8e   :  { %1797 = vmatprep.subr.bf16.mxu0 %v1870_v39 }
  0x8f   :  { %1820 = vmatpush3.bf16.msra.mxu1 %v1819_v5 }
  0x90   :  { %1821 = vmatprep.subr.bf16.mxu1 %v1870_v39 }
  0x91   :  { %1799 = vmatpush3.bf16.msra.mxu0 %v1798_v48 }
  0x92   :  { %1800 = vmatprep.subr.bf16.mxu0 %v1870_v39 }
  0x93   :  { %1823 = vmatpush3.bf16.msra.mxu1 %v1822_v8 }
  0x94   :  { %1824 = vmatprep.subr.bf16.mxu1 %v1870_v39 }
  0x95   :  { %1802 = vmatpush3.bf16.msra.mxu0 %v1801_v51 }
  0x96   :  { %1803 = vmatprep.subr.bf16.mxu0 %v1870_v39 }
  0x97   :  { %1826 = vmatpush3.bf16.msra.mxu1 %v1825_v12 }
  0x98   :  { %1827 = vmatprep.subr.bf16.mxu1 %v1870_v39 }
  0x99   :  { %1805 = vmatpush3.bf16.msra.mxu0 %v1804_v54  ;;  %v1052_v54 = vld [vmem:[%s2872_s5 + $0x78] sm:$0xff]  ;;  %s1845_s5 = scalar_lea.vmem %s1138_s25, 32 }
  0x9a   :  { %1806 = vmatprep.subr.bf16.mxu0 %v1870_v39  ;;  %v1834_v55 = vpack.c.bf16 %v1052_v54, %v1051_v33  ;;  %p1846_p0 = scmp.ne.s32.totalorder %s1138_s25, %s1845_s5  ;;  %p1851_p2 = scmp.lt.s32.totalorder %s1845_s5, %s1845_s5 }
  0x9b   :  { %1829 = vmatpush3.bf16.msra.mxu1 %v1828_v17 }
  0x9c   :  { %1830 = vmatprep.subr.bf16.mxu1 %v1870_v39  ;;  %p1852_p3 = por %p1851_p2, %p1850_p1 }
  0x9d   :  { %1808 = vmatpush3.bf16.msra.mxu0 %v1807_v57 }
  0x9e   :  { %1809 = vmatprep.subr.bf16.mxu0 %v1870_v39  ;;  %p1853_p4 = pnand %p1852_p3, %p1846_p0 }
  0x9f   :  { %1832 = vmatpush3.bf16.msra.mxu1 %v1831_v23 }
  0xa0   :  { %1833 = vmatprep.subr.bf16.mxu1 %v1870_v39 }
  0xa1   :  { %1811 = vmatpush3.bf16.msra.mxu0 %v1810_v59 }
  0xa3   :  { %1835 = vmatpush3.bf16.msra.mxu1 %v1834_v55 }
  0xf7   :  { %v1180_v20 = vpop.f32.mrb[0].mxu0 }
  0xf8   :  { %v1181_v13 = vpop.f32.mrb[1].mxu0 }
  0xf9   :  { %v1215_v22 = vpop.f32.mrb[0].mxu1  ;;  %v1182_v24 = vadd.f32 %v1181_v13, %v1180_v20 }
  0xfa   :  { %v1216_v25 = vpop.f32.mrb[1].mxu1 }
  0xfb   :  { %v1217_v26 = vadd.f32 %v1216_v25, %v1215_v22  ;;  %v449_v27 = vadd.f32 %v1182_v24, %v1145_v21 }
  0xfd   :  { %v519_v28 = vadd.f32 %v1217_v26, %v449_v27 }
 0x117   :  { %v1250_v29 = vpop.f32.mrb[2].mxu0 }
 0x118   :  { %v1251_v30 = vpop.f32.mrb[3].mxu0 }
 0x119   :  { %v1285_v31 = vpop.f32.mrb[2].mxu1  ;;  %v1252_v42 = vadd.f32 %v1251_v30, %v1250_v29 }
 0x11a   :  { %v1286_v32 = vpop.f32.mrb[3].mxu1 }
 0x11b   :  { %v1287_v34 = vadd.f32 %v1286_v32, %v1285_v31  ;;  %v589_v35 = vadd.f32 %v1252_v42, %v519_v28 }
 0x11d   :  { %v659_v52 = vadd.f32 %v1287_v34, %v589_v35 }
 0x137   :  { %v1320_v36 = vpop.f32.mrb[4].mxu0 }
 0x138   :  { %v1321_v37 = vpop.f32.mrb[5].mxu0 }
 0x139   :  { %v1355_v38 = vpop.f32.mrb[4].mxu1  ;;  %v1322_v40 = vadd.f32 %v1321_v37, %v1320_v36 }
 0x13a   :  { %v1356_v11 = vpop.f32.mrb[5].mxu1 }
 0x13b   :  { %v1357_v15 = vadd.f32 %v1356_v11, %v1355_v38  ;;  %v729_v41 = vadd.f32 %v1322_v40, %v659_v52 }
 0x13d   :  { %v799_v43 = vadd.f32 %v1357_v15, %v729_v41 }
 0x157   :  { %v1390_v44 = vpop.f32.mrb[6].mxu0 }
 0x158   :  { %v1391_v46 = vpop.f32.mrb[7].mxu0 }
 0x159   :  { %v1425_v47 = vpop.f32.mrb[6].mxu1  ;;  %v1392_v39 = vadd.f32 %v1391_v46, %v1390_v44 }
 0x15a   :  { %v1426_v48 = vpop.f32.mrb[7].mxu1 }
 0x15b   :  { %v1427_v49 = vadd.f32 %v1426_v48, %v1425_v47  ;;  %v869_v50 = vadd.f32 %v1392_v39, %v799_v43 }
 0x15d   :  { %v939_v51 = vadd.f32 %v1427_v49, %v869_v50 }
 0x15f   :  { %v942_v53 = vmax.f32 %v939_v51, 0.0 }
 0x161   :  { %1495 = vmatmul.mubr.f32.vlgmr.msra.gmra.mrb[8].mxu0 %v942_v53 }
 0x234   :  { %v1032_v57 = vpop.f32.mrb[8].mxu0 }
 0x235   :  { %v1033_v45 = vadd.f32 %v1146_v56, %v1032_v57  ;;  %v1496_v58 = vpop.f32.mrb[9].mxu0 }
 0x237   :  { %v1036_v59 = vmax.f32 %v1033_v45, 0.0 }
 0x239   :  { %1530 = vmatmul.mubr.f32.vlgmr.msra.gmra.mrb[8].mxu1 %v1036_v59 }
 0x30c   :  { %v1126_v61 = vpop.f32.mrb[8].mxu1 }
 0x30d   :  { %v1127_v62 = vadd.f32 %v1147_v60, %v1126_v61  ;;  %v1531_v63 = vpop.f32.mrb[9].mxu1 }
 0x30f   :  { %1130 = vst [vmem:[#allocation2] sm:$0x3] %v1127_v62 }
 0x310   :  { %1856 = shalt.err (!%p1853_p4)
}
 0x311   :  { %s1857_s27 = scalar_lea.hbm %s2874_s7, 32 }
 0x312   :  { %p1858_p5 = scmp.ne.s32.totalorder %s2874_s7, %s1857_s27  ;;  %p1861_p6 = scmp.lt.u32.totalorder %s1857_s27, %s2874_s7 }
 0x314   :  { %p1863_p7 = pnand %p1861_p6, %p1858_p5 }
 0x316   :  { %1866 = shalt.err (!%p1863_p7)
}
 0x317   :  { %1140 = dma.vmem_to_hbm [thread:$0]  %s1138_s25, 32, %s2874_s7, [#allocation3]  }
 0x318   :  { %1867 = dma.done.wait [#allocation3], 32  }
 0x319   :  { %1868 = vsyncadd [#allocation3], 4294967264 }
 0x31a   :  { %1144 = vsyncpa [#allocation3], 1 }

</bundles_post_ra>
